<compile_context>
chip_gen: v6e
topology: v6e:2x2x1
jax: 0.10.0
libtpu: 0.0.40
codegen_flags: <defaults>
</compile_context>

<pallas_src>
import functools
import math

import numpy as np

import jax
import jax.numpy as jnp
from jax.experimental import pallas as pl
from jax.experimental.pallas import tpu as pltpu


_MXU_DTYPE = jnp.bfloat16   # matmul operand dtype (accumulation is f32)


# ----------------------------- Pallas kernel ---------------------------------

def _fused_forward_kernel(*refs, block_has_shortcut):
    """Entire ResidualDancer forward in a single kernel.

    refs = [x, (T1, b1, T2, b2[, T3, b3]) * n_blocks, Wd1, bd1, Wd2, bd2, out]
    Matrices (T*, Wd*) are bf16; biases and the activation chain are f32.
    """
    out_ref = refs[-1]
    it = iter(refs[:-1])

    def mm_bias(v, w_ref, b_ref):
        # (B, K) @ (K, N) on the MXU, bf16 inputs, f32 accumulate + f32 bias.
        y = jnp.dot(v.astype(_MXU_DTYPE), w_ref[...],
                    preferred_element_type=jnp.float32)
        return y + b_ref[...]

    x = next(it)[...].astype(jnp.float32)          # (B, H*W*C) flat activation

    for has_sc in block_has_shortcut:              # statically unrolled
        t1, b1, t2, b2 = next(it), next(it), next(it), next(it)
        h = jnp.maximum(mm_bias(x, t1, b1), 0.0)   # conv1 + bn1 + relu
        h = mm_bias(h, t2, b2)                     # conv2 + bn2
        if has_sc:
            t3, b3 = next(it), next(it)
            sc = mm_bias(x, t3, b3)                # conv3 + bn3 shortcut
        else:
            sc = x
        x = jnp.maximum(sc + h, 0.0)               # residual add + relu

    wd1, bd1, wd2, bd2 = next(it), next(it), next(it), next(it)
    # squeeze(2)/MaxPool1d head: final spatial extent is 1x1 here, so the
    # flattened activation already IS the (B, 4*n_channels) feature vector.
    x = jnp.maximum(mm_bias(x, wd1, bd1), 0.0)     # dense1 + bn1d + relu
    # TODO(synk): Dropout(0.2) has no deterministic Pallas equivalent; applied
    # as eval-mode identity (inference semantics).
    out_ref[...] = jax.nn.sigmoid(mm_bias(x, wd2, bd2))   # dense2 + sigmoid


def fused_forward(x_flat, operands, block_has_shortcut, n_classes):
    B = x_flat.shape[0]
    args = [x_flat] + list(operands)
    kernel = functools.partial(_fused_forward_kernel,
                               block_has_shortcut=tuple(block_has_shortcut))
    return pl.pallas_call(
        kernel,
        out_shape=jax.ShapeDtypeStruct((B, n_classes), jnp.float32),
        grid=(1,),
        in_specs=[pl.BlockSpec(a.shape, lambda i: (0, 0)) for a in args],
        out_specs=pl.BlockSpec((B, n_classes), lambda i: (0, 0)),
        compiler_params=pltpu.CompilerParams(
            dimension_semantics=("arbitrary",)),
    )(*args)


# ------------------- host-side (one-time, weight-only) lowering --------------

def _bn_fold(bn, eps=1e-5):
    # inference-mode BatchNorm folded to y = x * scale + shift  (numpy)
    gamma, beta, mean, var = (np.asarray(t, np.float32) for t in bn)
    scale = gamma / np.sqrt(var + eps)
    shift = beta - mean * scale
    return scale, shift


def _conv_bn_toeplitz(w, b, bn, H, W, stride):
    """Conv2d(3x3, pad=1, stride) + BatchNorm2d (eval) as a dense matrix acting
    on the (h, w, c)-flattened activation.  Returns (T, bias_row, Ho, Wo)."""
    w = np.asarray(w, np.float32)                  # (kh, kw, Cin, Cout)
    b = np.asarray(b, np.float32)
    scale, shift = _bn_fold(bn)
    w = w * scale                                  # fold BN scale into Cout
    bvec = b * scale + shift                       # conv bias folded into BN
    kh, kw, cin, cout = w.shape
    Ho = (H + 2 - kh) // stride + 1
    Wo = (W + 2 - kw) // stride + 1
    T = np.zeros((H * W * cin, Ho * Wo * cout), np.float32)
    for ho in range(Ho):
        for wo in range(Wo):
            c0 = (ho * Wo + wo) * cout
            for di in range(kh):
                hi = stride * ho + di - 1
                if not 0 <= hi < H:
                    continue                       # zero padding row
                for dj in range(kw):
                    wi = stride * wo + dj - 1
                    if not 0 <= wi < W:
                        continue                   # zero padding col
                    r0 = (hi * W + wi) * cin
                    T[r0:r0 + cin, c0:c0 + cout] = w[di, dj]
    bias = np.tile(bvec, Ho * Wo)[None, :]         # (1, Ho*Wo*Cout)
    return T, bias, Ho, Wo


def pack_operands(params, H, W):
    """Pre-lower every layer to (matrix, bias) pairs for the fused kernel."""
    # spec_bn (single channel): y = s*x + t, folded exactly into block-1's
    # conv1/conv3 matrices:  (s*x + t*1) @ T = x @ (s*T) + t*colsum(T)
    # (exact including the zero-padded borders, since the fold acts on the
    #  un-padded flat pixels).
    spec_scale, spec_shift = _bn_fold(params["spec_bn"])
    s, t = float(spec_scale[0]), float(spec_shift[0])

    ops, flags = [], []
    h, w = H, W
    for bi, blk in enumerate(params["blocks"]):
        stride = blk["stride"]
        T1, b1, ho, wo = _conv_bn_toeplitz(blk["w1"], blk["b1"], blk["bn1"],
                                           h, w, stride)
        T2, b2, _, _ = _conv_bn_toeplitz(blk["w2"], blk["b2"], blk["bn2"],
                                         ho, wo, 1)
        if bi == 0:
            b1 = b1 + t * T1.sum(axis=0, keepdims=True)
            T1 = s * T1
        ops += [jnp.asarray(T1, _MXU_DTYPE), jnp.asarray(b1, jnp.float32),
                jnp.asarray(T2, _MXU_DTYPE), jnp.asarray(b2, jnp.float32)]
        if blk["diff"]:
            T3, b3, _, _ = _conv_bn_toeplitz(blk["w3"], blk["b3"], blk["bn3"],
                                             h, w, stride)
            if bi == 0:
                b3 = b3 + t * T3.sum(axis=0, keepdims=True)
                T3 = s * T3
            ops += [jnp.asarray(T3, _MXU_DTYPE), jnp.asarray(b3, jnp.float32)]
        flags.append(bool(blk["diff"]))
        h, w = ho, wo

    # The PyTorch head (squeeze(2) + optional MaxPool1d) is only a reshape when
    # the final spatial extent is 1x1 (true for 16x16 input & 7 stride-2 blocks).
    assert h == 1 and w == 1, (h, w)
    # TODO(synk): for other input resolutions the head would need an in-kernel
    # max over the remaining spatial axis; not implemented here.

    sc1, sh1 = _bn_fold(params["bn1d"])
    w1, b1 = (np.asarray(a, np.float32) for a in params["dense1"])
    ops += [jnp.asarray(w1 * sc1, _MXU_DTYPE),                 # dense1 + bn1d
            jnp.asarray((b1 * sc1 + sh1)[None, :], jnp.float32)]
    w2, b2 = (np.asarray(a, np.float32) for a in params["dense2"])
    ops += [jnp.asarray(w2, _MXU_DTYPE),                       # dense2
            jnp.asarray(b2[None, :], jnp.float32)]
    return ops, flags


def residual_dancer_forward(x_nchw, params):
    B, C, H, W = x_nchw.shape
    ops, flags = pack_operands(params, H, W)
    # NCHW -> (h, w, c)-flattened rows (with C == 1 this is a pure reshape).
    x_flat = jnp.transpose(x_nchw, (0, 2, 3, 1)).reshape(B, H * W * C)
    x_flat = x_flat.astype(jnp.float32)
    n_classes = ops[-1].shape[1]
    return fused_forward(x_flat, ops, flags, n_classes)


# ----------------------------- deterministic init -----------------------------

def init_params(key, n_channels=8, n_classes=10):
    keys = iter(jax.random.split(key, 256))

    def nrm(shape, scale=1.0):
        return scale * jax.random.normal(next(keys), shape, jnp.float32)

    def bn_params(c):
        gamma = 1.0 + 0.1 * nrm((c,))
        beta = 0.1 * nrm((c,))
        mean = 0.1 * nrm((c,))
        var = 1.0 + jnp.abs(0.1 * nrm((c,)))
        return (gamma, beta, mean, var)

    def conv(cin, cout):
        # NOTE: weights stored (kh, kw, Cin, Cout); a real PyTorch checkpoint
        # (Cout, Cin, kh, kw) would need a transpose when loading.
        w = nrm((3, 3, cin, cout), scale=1.0 / math.sqrt(9 * cin))
        b = 0.1 * nrm((cout,))
        return w, b

    nc = n_channels
    cfgs = [(1, nc), (nc, nc), (nc, 2 * nc), (2 * nc, 2 * nc),
            (2 * nc, 2 * nc), (2 * nc, 2 * nc), (2 * nc, 4 * nc)]
    blocks = []
    for cin, cout in cfgs:
        stride = 2
        w1, b1 = conv(cin, cout)
        w2, b2 = conv(cout, cout)
        blk = {"stride": stride, "diff": (stride != 1 or cin != cout),
               "w1": w1, "b1": b1, "bn1": bn_params(cout),
               "w2": w2, "b2": b2, "bn2": bn_params(cout)}
        if blk["diff"]:
            w3, b3 = conv(cin, cout)
            blk.update({"w3": w3, "b3": b3, "bn3": bn_params(cout)})
        blocks.append(blk)

    d = 4 * nc
    return {
        "spec_bn": bn_params(1),
        "blocks": blocks,
        "dense1": (nrm((d, d), scale=1.0 / math.sqrt(d)), 0.1 * nrm((d,))),
        "bn1d": bn_params(d),
        "dense2": (nrm((d, n_classes), scale=1.0 / math.sqrt(d)),
                   0.1 * nrm((n_classes,))),
    }


# ----------------------------- main -------------------------------------------

if __name__ == "__main__":
    key = jax.random.PRNGKey(0)
    pkey, xkey = jax.random.split(key)
    n_channels, n_classes = 8, 10
    params = init_params(pkey, n_channels, n_classes)

    # NCHW input like the PyTorch module: (batch=2, channels=1, 16, 16);
    # 7 stride-2 blocks reduce 16x16 -> 1x1 so the squeeze/maxpool head holds.
    x = jax.random.normal(xkey, (2, 1, 16, 16), jnp.float32)

    out = residual_dancer_forward(x, params)
    out = jax.block_until_ready(out)
    assert out.shape == (2, n_classes)
    assert bool(jnp.all((out >= 0.0) & (out <= 1.0)))
    print("KERNEL_OK")
</pallas_src>

<mosaic_0001>
module attributes {stable_mosaic.version = 11 : i64} {
  func.func @_fused_forward_kernel(%arg0: i32, %arg1: memref<2x256xf32, #tpu.memory_space<vmem>>, %arg2: memref<256x512xbf16, #tpu.memory_space<vmem>>, %arg3: memref<1x512xf32, #tpu.memory_space<vmem>>, %arg4: memref<512x512xbf16, #tpu.memory_space<vmem>>, %arg5: memref<1x512xf32, #tpu.memory_space<vmem>>, %arg6: memref<256x512xbf16, #tpu.memory_space<vmem>>, %arg7: memref<1x512xf32, #tpu.memory_space<vmem>>, %arg8: memref<512x128xbf16, #tpu.memory_space<vmem>>, %arg9: memref<1x128xf32, #tpu.memory_space<vmem>>, %arg10: memref<128x128xbf16, #tpu.memory_space<vmem>>, %arg11: memref<1x128xf32, #tpu.memory_space<vmem>>, %arg12: memref<512x128xbf16, #tpu.memory_space<vmem>>, %arg13: memref<1x128xf32, #tpu.memory_space<vmem>>, %arg14: memref<128x64xbf16, #tpu.memory_space<vmem>>, %arg15: memref<1x64xf32, #tpu.memory_space<vmem>>, %arg16: memref<64x64xbf16, #tpu.memory_space<vmem>>, %arg17: memref<1x64xf32, #tpu.memory_space<vmem>>, %arg18: memref<128x64xbf16, #tpu.memory_space<vmem>>, %arg19: memref<1x64xf32, #tpu.memory_space<vmem>>, %arg20: memref<64x16xbf16, #tpu.memory_space<vmem>>, %arg21: memref<1x16xf32, #tpu.memory_space<vmem>>, %arg22: memref<16x16xbf16, #tpu.memory_space<vmem>>, %arg23: memref<1x16xf32, #tpu.memory_space<vmem>>, %arg24: memref<64x16xbf16, #tpu.memory_space<vmem>>, %arg25: memref<1x16xf32, #tpu.memory_space<vmem>>, %arg26: memref<16x16xbf16, #tpu.memory_space<vmem>>, %arg27: memref<1x16xf32, #tpu.memory_space<vmem>>, %arg28: memref<16x16xbf16, #tpu.memory_space<vmem>>, %arg29: memref<1x16xf32, #tpu.memory_space<vmem>>, %arg30: memref<16x16xbf16, #tpu.memory_space<vmem>>, %arg31: memref<1x16xf32, #tpu.memory_space<vmem>>, %arg32: memref<16x16xbf16, #tpu.memory_space<vmem>>, %arg33: memref<1x16xf32, #tpu.memory_space<vmem>>, %arg34: memref<16x16xbf16, #tpu.memory_space<vmem>>, %arg35: memref<1x16xf32, #tpu.memory_space<vmem>>, %arg36: memref<16x16xbf16, #tpu.memory_space<vmem>>, %arg37: memref<1x16xf32, #tpu.memory_space<vmem>>, %arg38: memref<16x32xbf16, #tpu.memory_space<vmem>>, %arg39: memref<1x32xf32, #tpu.memory_space<vmem>>, %arg40: memref<32x32xbf16, #tpu.memory_space<vmem>>, %arg41: memref<1x32xf32, #tpu.memory_space<vmem>>, %arg42: memref<16x32xbf16, #tpu.memory_space<vmem>>, %arg43: memref<1x32xf32, #tpu.memory_space<vmem>>, %arg44: memref<32x32xbf16, #tpu.memory_space<vmem>>, %arg45: memref<1x32xf32, #tpu.memory_space<vmem>>, %arg46: memref<32x10xbf16, #tpu.memory_space<vmem>>, %arg47: memref<1x10xf32, #tpu.memory_space<vmem>>, %arg48: memref<2x10xf32, #tpu.memory_space<vmem>>) attributes {dimension_semantics = [#tpu.dimension_semantics<arbitrary>], iteration_bounds = array<i64: 1>, scalar_prefetch = 0 : i64, scratch_operands = 0 : i64, tpu.core_type = #tpu.core_type<tc>, window_params = [{pipeline_mode = #tpu.pipeline_mode<synchronous>, transform_indices = @transform_0, window_bounds = array<i64: 2, 256>}, {pipeline_mode = #tpu.pipeline_mode<synchronous>, transform_indices = @transform_1, window_bounds = array<i64: 256, 512>}, {pipeline_mode = #tpu.pipeline_mode<synchronous>, transform_indices = @transform_2, window_bounds = array<i64: 1, 512>}, {pipeline_mode = #tpu.pipeline_mode<synchronous>, transform_indices = @transform_3, window_bounds = array<i64: 512, 512>}, {pipeline_mode = #tpu.pipeline_mode<synchronous>, transform_indices = @transform_4, window_bounds = array<i64: 1, 512>}, {pipeline_mode = #tpu.pipeline_mode<synchronous>, transform_indices = @transform_5, window_bounds = array<i64: 256, 512>}, {pipeline_mode = #tpu.pipeline_mode<synchronous>, transform_indices = @transform_6, window_bounds = array<i64: 1, 512>}, {pipeline_mode = #tpu.pipeline_mode<synchronous>, transform_indices = @transform_7, window_bounds = array<i64: 512, 128>}, {pipeline_mode = #tpu.pipeline_mode<synchronous>, transform_indices = @transform_8, window_bounds = array<i64: 1, 128>}, {pipeline_mode = #tpu.pipeline_mode<synchronous>, transform_indices = @transform_9, window_bounds = array<i64: 128, 128>}, {pipeline_mode = #tpu.pipeline_mode<synchronous>, transform_indices = @transform_10, window_bounds = array<i64: 1, 128>}, {pipeline_mode = #tpu.pipeline_mode<synchronous>, transform_indices = @transform_11, window_bounds = array<i64: 512, 128>}, {pipeline_mode = #tpu.pipeline_mode<synchronous>, transform_indices = @transform_12, window_bounds = array<i64: 1, 128>}, {pipeline_mode = #tpu.pipeline_mode<synchronous>, transform_indices = @transform_13, window_bounds = array<i64: 128, 64>}, {pipeline_mode = #tpu.pipeline_mode<synchronous>, transform_indices = @transform_14, window_bounds = array<i64: 1, 64>}, {pipeline_mode = #tpu.pipeline_mode<synchronous>, transform_indices = @transform_15, window_bounds = array<i64: 64, 64>}, {pipeline_mode = #tpu.pipeline_mode<synchronous>, transform_indices = @transform_16, window_bounds = array<i64: 1, 64>}, {pipeline_mode = #tpu.pipeline_mode<synchronous>, transform_indices = @transform_17, window_bounds = array<i64: 128, 64>}, {pipeline_mode = #tpu.pipeline_mode<synchronous>, transform_indices = @transform_18, window_bounds = array<i64: 1, 64>}, {pipeline_mode = #tpu.pipeline_mode<synchronous>, transform_indices = @transform_19, window_bounds = array<i64: 64, 16>}, {pipeline_mode = #tpu.pipeline_mode<synchronous>, transform_indices = @transform_20, window_bounds = array<i64: 1, 16>}, {pipeline_mode = #tpu.pipeline_mode<synchronous>, transform_indices = @transform_21, window_bounds = array<i64: 16, 16>}, {pipeline_mode = #tpu.pipeline_mode<synchronous>, transform_indices = @transform_22, window_bounds = array<i64: 1, 16>}, {pipeline_mode = #tpu.pipeline_mode<synchronous>, transform_indices = @transform_23, window_bounds = array<i64: 64, 16>}, {pipeline_mode = #tpu.pipeline_mode<synchronous>, transform_indices = @transform_24, window_bounds = array<i64: 1, 16>}, {pipeline_mode = #tpu.pipeline_mode<synchronous>, transform_indices = @transform_25, window_bounds = array<i64: 16, 16>}, {pipeline_mode = #tpu.pipeline_mode<synchronous>, transform_indices = @transform_26, window_bounds = array<i64: 1, 16>}, {pipeline_mode = #tpu.pipeline_mode<synchronous>, transform_indices = @transform_27, window_bounds = array<i64: 16, 16>}, {pipeline_mode = #tpu.pipeline_mode<synchronous>, transform_indices = @transform_28, window_bounds = array<i64: 1, 16>}, {pipeline_mode = #tpu.pipeline_mode<synchronous>, transform_indices = @transform_29, window_bounds = array<i64: 16, 16>}, {pipeline_mode = #tpu.pipeline_mode<synchronous>, transform_indices = @transform_30, window_bounds = array<i64: 1, 16>}, {pipeline_mode = #tpu.pipeline_mode<synchronous>, transform_indices = @transform_31, window_bounds = array<i64: 16, 16>}, {pipeline_mode = #tpu.pipeline_mode<synchronous>, transform_indices = @transform_32, window_bounds = array<i64: 1, 16>}, {pipeline_mode = #tpu.pipeline_mode<synchronous>, transform_indices = @transform_33, window_bounds = array<i64: 16, 16>}, {pipeline_mode = #tpu.pipeline_mode<synchronous>, transform_indices = @transform_34, window_bounds = array<i64: 1, 16>}, {pipeline_mode = #tpu.pipeline_mode<synchronous>, transform_indices = @transform_35, window_bounds = array<i64: 16, 16>}, {pipeline_mode = #tpu.pipeline_mode<synchronous>, transform_indices = @transform_36, window_bounds = array<i64: 1, 16>}, {pipeline_mode = #tpu.pipeline_mode<synchronous>, transform_indices = @transform_37, window_bounds = array<i64: 16, 32>}, {pipeline_mode = #tpu.pipeline_mode<synchronous>, transform_indices = @transform_38, window_bounds = array<i64: 1, 32>}, {pipeline_mode = #tpu.pipeline_mode<synchronous>, transform_indices = @transform_39, window_bounds = array<i64: 32, 32>}, {pipeline_mode = #tpu.pipeline_mode<synchronous>, transform_indices = @transform_40, window_bounds = array<i64: 1, 32>}, {pipeline_mode = #tpu.pipeline_mode<synchronous>, transform_indices = @transform_41, window_bounds = array<i64: 16, 32>}, {pipeline_mode = #tpu.pipeline_mode<synchronous>, transform_indices = @transform_42, window_bounds = array<i64: 1, 32>}, {pipeline_mode = #tpu.pipeline_mode<synchronous>, transform_indices = @transform_43, window_bounds = array<i64: 32, 32>}, {pipeline_mode = #tpu.pipeline_mode<synchronous>, transform_indices = @transform_44, window_bounds = array<i64: 1, 32>}, {pipeline_mode = #tpu.pipeline_mode<synchronous>, transform_indices = @transform_45, window_bounds = array<i64: 32, 10>}, {pipeline_mode = #tpu.pipeline_mode<synchronous>, transform_indices = @transform_46, window_bounds = array<i64: 1, 10>}, {pipeline_mode = #tpu.pipeline_mode<synchronous>, transform_indices = @transform_47, window_bounds = array<i64: 2, 10>}]} {
    %c0 = arith.constant 0 : index
    %c0_0 = arith.constant 0 : index
    %0 = vector.load %arg1[%c0, %c0_0] : memref<2x256xf32, #tpu.memory_space<vmem>>, vector<2x256xf32>
    %1 = arith.truncf %0 : vector<2x256xf32> to vector<2x256xbf16>
    %c0_1 = arith.constant 0 : index
    %c0_2 = arith.constant 0 : index
    %2 = vector.load %arg2[%c0_1, %c0_2] : memref<256x512xbf16, #tpu.memory_space<vmem>>, vector<256x512xbf16>
    %cst = arith.constant dense<0.000000e+00> : vector<2x512xf32>
    %3 = tpu.matmul %1, %2, %cst {dimension_numbers = #tpu.dot_dimension_numbers<[1], [0], [0], [1], [0, 0, 1, 1], [], []>} : vector<2x256xbf16>, vector<256x512xbf16>, vector<2x512xf32> -> vector<2x512xf32>
    %c0_3 = arith.constant 0 : index
    %c0_4 = arith.constant 0 : index
    %4 = vector.load %arg3[%c0_3, %c0_4] : memref<1x512xf32, #tpu.memory_space<vmem>>, vector<1x512xf32>
    %5 = vector.broadcast %4 : vector<1x512xf32> to vector<2x512xf32>
    %6 = arith.addf %3, %5 : vector<2x512xf32>
    %cst_5 = arith.constant 0.000000e+00 : f32
    %7 = vector.broadcast %cst_5 : f32 to vector<2x512xf32>
    %8 = arith.maximumf %6, %7 : vector<2x512xf32>
    %9 = arith.truncf %8 : vector<2x512xf32> to vector<2x512xbf16>
    %c0_6 = arith.constant 0 : index
    %c0_7 = arith.constant 0 : index
    %10 = vector.load %arg4[%c0_6, %c0_7] : memref<512x512xbf16, #tpu.memory_space<vmem>>, vector<512x512xbf16>
    %cst_8 = arith.constant dense<0.000000e+00> : vector<2x512xf32>
    %11 = tpu.matmul %9, %10, %cst_8 {dimension_numbers = #tpu.dot_dimension_numbers<[1], [0], [0], [1], [0, 0, 1, 1], [], []>} : vector<2x512xbf16>, vector<512x512xbf16>, vector<2x512xf32> -> vector<2x512xf32>
    %c0_9 = arith.constant 0 : index
    %c0_10 = arith.constant 0 : index
    %12 = vector.load %arg5[%c0_9, %c0_10] : memref<1x512xf32, #tpu.memory_space<vmem>>, vector<1x512xf32>
    %13 = vector.broadcast %12 : vector<1x512xf32> to vector<2x512xf32>
    %14 = arith.addf %11, %13 : vector<2x512xf32>
    %15 = arith.truncf %0 : vector<2x256xf32> to vector<2x256xbf16>
    %c0_11 = arith.constant 0 : index
    %c0_12 = arith.constant 0 : index
    %16 = vector.load %arg6[%c0_11, %c0_12] : memref<256x512xbf16, #tpu.memory_space<vmem>>, vector<256x512xbf16>
    %cst_13 = arith.constant dense<0.000000e+00> : vector<2x512xf32>
    %17 = tpu.matmul %15, %16, %cst_13 {dimension_numbers = #tpu.dot_dimension_numbers<[1], [0], [0], [1], [0, 0, 1, 1], [], []>} : vector<2x256xbf16>, vector<256x512xbf16>, vector<2x512xf32> -> vector<2x512xf32>
    %c0_14 = arith.constant 0 : index
    %c0_15 = arith.constant 0 : index
    %18 = vector.load %arg7[%c0_14, %c0_15] : memref<1x512xf32, #tpu.memory_space<vmem>>, vector<1x512xf32>
    %19 = vector.broadcast %18 : vector<1x512xf32> to vector<2x512xf32>
    %20 = arith.addf %17, %19 : vector<2x512xf32>
    %21 = arith.addf %20, %14 : vector<2x512xf32>
    %cst_16 = arith.constant 0.000000e+00 : f32
    %22 = vector.broadcast %cst_16 : f32 to vector<2x512xf32>
    %23 = arith.maximumf %21, %22 : vector<2x512xf32>
    %24 = arith.truncf %23 : vector<2x512xf32> to vector<2x512xbf16>
    %c0_17 = arith.constant 0 : index
    %c0_18 = arith.constant 0 : index
    %25 = vector.load %arg8[%c0_17, %c0_18] : memref<512x128xbf16, #tpu.memory_space<vmem>>, vector<512x128xbf16>
    %cst_19 = arith.constant dense<0.000000e+00> : vector<2x128xf32>
    %26 = tpu.matmul %24, %25, %cst_19 {dimension_numbers = #tpu.dot_dimension_numbers<[1], [0], [0], [1], [0, 0, 1, 1], [], []>} : vector<2x512xbf16>, vector<512x128xbf16>, vector<2x128xf32> -> vector<2x128xf32>
    %c0_20 = arith.constant 0 : index
    %c0_21 = arith.constant 0 : index
    %27 = vector.load %arg9[%c0_20, %c0_21] : memref<1x128xf32, #tpu.memory_space<vmem>>, vector<1x128xf32>
    %28 = vector.broadcast %27 : vector<1x128xf32> to vector<2x128xf32>
    %29 = arith.addf %26, %28 : vector<2x128xf32>
    %cst_22 = arith.constant 0.000000e+00 : f32
    %30 = vector.broadcast %cst_22 : f32 to vector<2x128xf32>
    %31 = arith.maximumf %29, %30 : vector<2x128xf32>
    %32 = arith.truncf %31 : vector<2x128xf32> to vector<2x128xbf16>
    %c0_23 = arith.constant 0 : index
    %c0_24 = arith.constant 0 : index
    %33 = vector.load %arg10[%c0_23, %c0_24] : memref<128x128xbf16, #tpu.memory_space<vmem>>, vector<128x128xbf16>
    %cst_25 = arith.constant dense<0.000000e+00> : vector<2x128xf32>
    %34 = tpu.matmul %32, %33, %cst_25 {dimension_numbers = #tpu.dot_dimension_numbers<[1], [0], [0], [1], [0, 0, 1, 1], [], []>} : vector<2x128xbf16>, vector<128x128xbf16>, vector<2x128xf32> -> vector<2x128xf32>
    %c0_26 = arith.constant 0 : index
    %c0_27 = arith.constant 0 : index
    %35 = vector.load %arg11[%c0_26, %c0_27] : memref<1x128xf32, #tpu.memory_space<vmem>>, vector<1x128xf32>
    %36 = vector.broadcast %35 : vector<1x128xf32> to vector<2x128xf32>
    %37 = arith.addf %34, %36 : vector<2x128xf32>
    %38 = arith.truncf %23 : vector<2x512xf32> to vector<2x512xbf16>
    %c0_28 = arith.constant 0 : index
    %c0_29 = arith.constant 0 : index
    %39 = vector.load %arg12[%c0_28, %c0_29] : memref<512x128xbf16, #tpu.memory_space<vmem>>, vector<512x128xbf16>
    %cst_30 = arith.constant dense<0.000000e+00> : vector<2x128xf32>
    %40 = tpu.matmul %38, %39, %cst_30 {dimension_numbers = #tpu.dot_dimension_numbers<[1], [0], [0], [1], [0, 0, 1, 1], [], []>} : vector<2x512xbf16>, vector<512x128xbf16>, vector<2x128xf32> -> vector<2x128xf32>
    %c0_31 = arith.constant 0 : index
    %c0_32 = arith.constant 0 : index
    %41 = vector.load %arg13[%c0_31, %c0_32] : memref<1x128xf32, #tpu.memory_space<vmem>>, vector<1x128xf32>
    %42 = vector.broadcast %41 : vector<1x128xf32> to vector<2x128xf32>
    %43 = arith.addf %40, %42 : vector<2x128xf32>
    %44 = arith.addf %43, %37 : vector<2x128xf32>
    %cst_33 = arith.constant 0.000000e+00 : f32
    %45 = vector.broadcast %cst_33 : f32 to vector<2x128xf32>
    %46 = arith.maximumf %44, %45 : vector<2x128xf32>
    %47 = arith.truncf %46 : vector<2x128xf32> to vector<2x128xbf16>
    %c0_34 = arith.constant 0 : index
    %c0_35 = arith.constant 0 : index
    %48 = vector.load %arg14[%c0_34, %c0_35] : memref<128x64xbf16, #tpu.memory_space<vmem>>, vector<128x64xbf16>
    %cst_36 = arith.constant dense<0.000000e+00> : vector<2x64xf32>
    %49 = tpu.matmul %47, %48, %cst_36 {dimension_numbers = #tpu.dot_dimension_numbers<[1], [0], [0], [1], [0, 0, 1, 1], [], []>} : vector<2x128xbf16>, vector<128x64xbf16>, vector<2x64xf32> -> vector<2x64xf32>
    %c0_37 = arith.constant 0 : index
    %c0_38 = arith.constant 0 : index
    %50 = vector.load %arg15[%c0_37, %c0_38] : memref<1x64xf32, #tpu.memory_space<vmem>>, vector<1x64xf32>
    %51 = vector.broadcast %50 : vector<1x64xf32> to vector<2x64xf32>
    %52 = arith.addf %49, %51 : vector<2x64xf32>
    %cst_39 = arith.constant 0.000000e+00 : f32
    %53 = vector.broadcast %cst_39 : f32 to vector<2x64xf32>
    %54 = arith.maximumf %52, %53 : vector<2x64xf32>
    %55 = arith.truncf %54 : vector<2x64xf32> to vector<2x64xbf16>
    %c0_40 = arith.constant 0 : index
    %c0_41 = arith.constant 0 : index
    %56 = vector.load %arg16[%c0_40, %c0_41] : memref<64x64xbf16, #tpu.memory_space<vmem>>, vector<64x64xbf16>
    %cst_42 = arith.constant dense<0.000000e+00> : vector<2x64xf32>
    %57 = tpu.matmul %55, %56, %cst_42 {dimension_numbers = #tpu.dot_dimension_numbers<[1], [0], [0], [1], [0, 0, 1, 1], [], []>} : vector<2x64xbf16>, vector<64x64xbf16>, vector<2x64xf32> -> vector<2x64xf32>
    %c0_43 = arith.constant 0 : index
    %c0_44 = arith.constant 0 : index
    %58 = vector.load %arg17[%c0_43, %c0_44] : memref<1x64xf32, #tpu.memory_space<vmem>>, vector<1x64xf32>
    %59 = vector.broadcast %58 : vector<1x64xf32> to vector<2x64xf32>
    %60 = arith.addf %57, %59 : vector<2x64xf32>
    %61 = arith.truncf %46 : vector<2x128xf32> to vector<2x128xbf16>
    %c0_45 = arith.constant 0 : index
    %c0_46 = arith.constant 0 : index
    %62 = vector.load %arg18[%c0_45, %c0_46] : memref<128x64xbf16, #tpu.memory_space<vmem>>, vector<128x64xbf16>
    %cst_47 = arith.constant dense<0.000000e+00> : vector<2x64xf32>
    %63 = tpu.matmul %61, %62, %cst_47 {dimension_numbers = #tpu.dot_dimension_numbers<[1], [0], [0], [1], [0, 0, 1, 1], [], []>} : vector<2x128xbf16>, vector<128x64xbf16>, vector<2x64xf32> -> vector<2x64xf32>
    %c0_48 = arith.constant 0 : index
    %c0_49 = arith.constant 0 : index
    %64 = vector.load %arg19[%c0_48, %c0_49] : memref<1x64xf32, #tpu.memory_space<vmem>>, vector<1x64xf32>
    %65 = vector.broadcast %64 : vector<1x64xf32> to vector<2x64xf32>
    %66 = arith.addf %63, %65 : vector<2x64xf32>
    %67 = arith.addf %66, %60 : vector<2x64xf32>
    %cst_50 = arith.constant 0.000000e+00 : f32
    %68 = vector.broadcast %cst_50 : f32 to vector<2x64xf32>
    %69 = arith.maximumf %67, %68 : vector<2x64xf32>
    %70 = arith.truncf %69 : vector<2x64xf32> to vector<2x64xbf16>
    %c0_51 = arith.constant 0 : index
    %c0_52 = arith.constant 0 : index
    %71 = vector.load %arg20[%c0_51, %c0_52] : memref<64x16xbf16, #tpu.memory_space<vmem>>, vector<64x16xbf16>
    %cst_53 = arith.constant dense<0.000000e+00> : vector<2x16xf32>
    %72 = tpu.matmul %70, %71, %cst_53 {dimension_numbers = #tpu.dot_dimension_numbers<[1], [0], [0], [1], [0, 0, 1, 1], [], []>} : vector<2x64xbf16>, vector<64x16xbf16>, vector<2x16xf32> -> vector<2x16xf32>
    %c0_54 = arith.constant 0 : index
    %c0_55 = arith.constant 0 : index
    %73 = vector.load %arg21[%c0_54, %c0_55] : memref<1x16xf32, #tpu.memory_space<vmem>>, vector<1x16xf32>
    %74 = vector.broadcast %73 : vector<1x16xf32> to vector<2x16xf32>
    %75 = arith.addf %72, %74 : vector<2x16xf32>
    %cst_56 = arith.constant 0.000000e+00 : f32
    %76 = vector.broadcast %cst_56 : f32 to vector<2x16xf32>
    %77 = arith.maximumf %75, %76 : vector<2x16xf32>
    %78 = arith.truncf %77 : vector<2x16xf32> to vector<2x16xbf16>
    %c0_57 = arith.constant 0 : index
    %c0_58 = arith.constant 0 : index
    %79 = vector.load %arg22[%c0_57, %c0_58] : memref<16x16xbf16, #tpu.memory_space<vmem>>, vector<16x16xbf16>
    %cst_59 = arith.constant dense<0.000000e+00> : vector<2x16xf32>
    %80 = tpu.matmul %78, %79, %cst_59 {dimension_numbers = #tpu.dot_dimension_numbers<[1], [0], [0], [1], [0, 0, 1, 1], [], []>} : vector<2x16xbf16>, vector<16x16xbf16>, vector<2x16xf32> -> vector<2x16xf32>
    %c0_60 = arith.constant 0 : index
    %c0_61 = arith.constant 0 : index
    %81 = vector.load %arg23[%c0_60, %c0_61] : memref<1x16xf32, #tpu.memory_space<vmem>>, vector<1x16xf32>
    %82 = vector.broadcast %81 : vector<1x16xf32> to vector<2x16xf32>
    %83 = arith.addf %80, %82 : vector<2x16xf32>
    %84 = arith.truncf %69 : vector<2x64xf32> to vector<2x64xbf16>
    %c0_62 = arith.constant 0 : index
    %c0_63 = arith.constant 0 : index
    %85 = vector.load %arg24[%c0_62, %c0_63] : memref<64x16xbf16, #tpu.memory_space<vmem>>, vector<64x16xbf16>
    %cst_64 = arith.constant dense<0.000000e+00> : vector<2x16xf32>
    %86 = tpu.matmul %84, %85, %cst_64 {dimension_numbers = #tpu.dot_dimension_numbers<[1], [0], [0], [1], [0, 0, 1, 1], [], []>} : vector<2x64xbf16>, vector<64x16xbf16>, vector<2x16xf32> -> vector<2x16xf32>
    %c0_65 = arith.constant 0 : index
    %c0_66 = arith.constant 0 : index
    %87 = vector.load %arg25[%c0_65, %c0_66] : memref<1x16xf32, #tpu.memory_space<vmem>>, vector<1x16xf32>
    %88 = vector.broadcast %87 : vector<1x16xf32> to vector<2x16xf32>
    %89 = arith.addf %86, %88 : vector<2x16xf32>
    %90 = arith.addf %89, %83 : vector<2x16xf32>
    %cst_67 = arith.constant 0.000000e+00 : f32
    %91 = vector.broadcast %cst_67 : f32 to vector<2x16xf32>
    %92 = arith.maximumf %90, %91 : vector<2x16xf32>
    %93 = arith.truncf %92 : vector<2x16xf32> to vector<2x16xbf16>
    %c0_68 = arith.constant 0 : index
    %c0_69 = arith.constant 0 : index
    %94 = vector.load %arg26[%c0_68, %c0_69] : memref<16x16xbf16, #tpu.memory_space<vmem>>, vector<16x16xbf16>
    %cst_70 = arith.constant dense<0.000000e+00> : vector<2x16xf32>
    %95 = tpu.matmul %93, %94, %cst_70 {dimension_numbers = #tpu.dot_dimension_numbers<[1], [0], [0], [1], [0, 0, 1, 1], [], []>} : vector<2x16xbf16>, vector<16x16xbf16>, vector<2x16xf32> -> vector<2x16xf32>
    %c0_71 = arith.constant 0 : index
    %c0_72 = arith.constant 0 : index
    %96 = vector.load %arg27[%c0_71, %c0_72] : memref<1x16xf32, #tpu.memory_space<vmem>>, vector<1x16xf32>
    %97 = vector.broadcast %96 : vector<1x16xf32> to vector<2x16xf32>
    %98 = arith.addf %95, %97 : vector<2x16xf32>
    %cst_73 = arith.constant 0.000000e+00 : f32
    %99 = vector.broadcast %cst_73 : f32 to vector<2x16xf32>
    %100 = arith.maximumf %98, %99 : vector<2x16xf32>
    %101 = arith.truncf %100 : vector<2x16xf32> to vector<2x16xbf16>
    %c0_74 = arith.constant 0 : index
    %c0_75 = arith.constant 0 : index
    %102 = vector.load %arg28[%c0_74, %c0_75] : memref<16x16xbf16, #tpu.memory_space<vmem>>, vector<16x16xbf16>
    %cst_76 = arith.constant dense<0.000000e+00> : vector<2x16xf32>
    %103 = tpu.matmul %101, %102, %cst_76 {dimension_numbers = #tpu.dot_dimension_numbers<[1], [0], [0], [1], [0, 0, 1, 1], [], []>} : vector<2x16xbf16>, vector<16x16xbf16>, vector<2x16xf32> -> vector<2x16xf32>
    %c0_77 = arith.constant 0 : index
    %c0_78 = arith.constant 0 : index
    %104 = vector.load %arg29[%c0_77, %c0_78] : memref<1x16xf32, #tpu.memory_space<vmem>>, vector<1x16xf32>
    %105 = vector.broadcast %104 : vector<1x16xf32> to vector<2x16xf32>
    %106 = arith.addf %103, %105 : vector<2x16xf32>
    %107 = arith.truncf %92 : vector<2x16xf32> to vector<2x16xbf16>
    %c0_79 = arith.constant 0 : index
    %c0_80 = arith.constant 0 : index
    %108 = vector.load %arg30[%c0_79, %c0_80] : memref<16x16xbf16, #tpu.memory_space<vmem>>, vector<16x16xbf16>
    %cst_81 = arith.constant dense<0.000000e+00> : vector<2x16xf32>
    %109 = tpu.matmul %107, %108, %cst_81 {dimension_numbers = #tpu.dot_dimension_numbers<[1], [0], [0], [1], [0, 0, 1, 1], [], []>} : vector<2x16xbf16>, vector<16x16xbf16>, vector<2x16xf32> -> vector<2x16xf32>
    %c0_82 = arith.constant 0 : index
    %c0_83 = arith.constant 0 : index
    %110 = vector.load %arg31[%c0_82, %c0_83] : memref<1x16xf32, #tpu.memory_space<vmem>>, vector<1x16xf32>
    %111 = vector.broadcast %110 : vector<1x16xf32> to vector<2x16xf32>
    %112 = arith.addf %109, %111 : vector<2x16xf32>
    %113 = arith.addf %112, %106 : vector<2x16xf32>
    %cst_84 = arith.constant 0.000000e+00 : f32
    %114 = vector.broadcast %cst_84 : f32 to vector<2x16xf32>
    %115 = arith.maximumf %113, %114 : vector<2x16xf32>
    %116 = arith.truncf %115 : vector<2x16xf32> to vector<2x16xbf16>
    %c0_85 = arith.constant 0 : index
    %c0_86 = arith.constant 0 : index
    %117 = vector.load %arg32[%c0_85, %c0_86] : memref<16x16xbf16, #tpu.memory_space<vmem>>, vector<16x16xbf16>
    %cst_87 = arith.constant dense<0.000000e+00> : vector<2x16xf32>
    %118 = tpu.matmul %116, %117, %cst_87 {dimension_numbers = #tpu.dot_dimension_numbers<[1], [0], [0], [1], [0, 0, 1, 1], [], []>} : vector<2x16xbf16>, vector<16x16xbf16>, vector<2x16xf32> -> vector<2x16xf32>
    %c0_88 = arith.constant 0 : index
    %c0_89 = arith.constant 0 : index
    %119 = vector.load %arg33[%c0_88, %c0_89] : memref<1x16xf32, #tpu.memory_space<vmem>>, vector<1x16xf32>
    %120 = vector.broadcast %119 : vector<1x16xf32> to vector<2x16xf32>
    %121 = arith.addf %118, %120 : vector<2x16xf32>
    %cst_90 = arith.constant 0.000000e+00 : f32
    %122 = vector.broadcast %cst_90 : f32 to vector<2x16xf32>
    %123 = arith.maximumf %121, %122 : vector<2x16xf32>
    %124 = arith.truncf %123 : vector<2x16xf32> to vector<2x16xbf16>
    %c0_91 = arith.constant 0 : index
    %c0_92 = arith.constant 0 : index
    %125 = vector.load %arg34[%c0_91, %c0_92] : memref<16x16xbf16, #tpu.memory_space<vmem>>, vector<16x16xbf16>
    %cst_93 = arith.constant dense<0.000000e+00> : vector<2x16xf32>
    %126 = tpu.matmul %124, %125, %cst_93 {dimension_numbers = #tpu.dot_dimension_numbers<[1], [0], [0], [1], [0, 0, 1, 1], [], []>} : vector<2x16xbf16>, vector<16x16xbf16>, vector<2x16xf32> -> vector<2x16xf32>
    %c0_94 = arith.constant 0 : index
    %c0_95 = arith.constant 0 : index
    %127 = vector.load %arg35[%c0_94, %c0_95] : memref<1x16xf32, #tpu.memory_space<vmem>>, vector<1x16xf32>
    %128 = vector.broadcast %127 : vector<1x16xf32> to vector<2x16xf32>
    %129 = arith.addf %126, %128 : vector<2x16xf32>
    %130 = arith.truncf %115 : vector<2x16xf32> to vector<2x16xbf16>
    %c0_96 = arith.constant 0 : index
    %c0_97 = arith.constant 0 : index
    %131 = vector.load %arg36[%c0_96, %c0_97] : memref<16x16xbf16, #tpu.memory_space<vmem>>, vector<16x16xbf16>
    %cst_98 = arith.constant dense<0.000000e+00> : vector<2x16xf32>
    %132 = tpu.matmul %130, %131, %cst_98 {dimension_numbers = #tpu.dot_dimension_numbers<[1], [0], [0], [1], [0, 0, 1, 1], [], []>} : vector<2x16xbf16>, vector<16x16xbf16>, vector<2x16xf32> -> vector<2x16xf32>
    %c0_99 = arith.constant 0 : index
    %c0_100 = arith.constant 0 : index
    %133 = vector.load %arg37[%c0_99, %c0_100] : memref<1x16xf32, #tpu.memory_space<vmem>>, vector<1x16xf32>
    %134 = vector.broadcast %133 : vector<1x16xf32> to vector<2x16xf32>
    %135 = arith.addf %132, %134 : vector<2x16xf32>
    %136 = arith.addf %135, %129 : vector<2x16xf32>
    %cst_101 = arith.constant 0.000000e+00 : f32
    %137 = vector.broadcast %cst_101 : f32 to vector<2x16xf32>
    %138 = arith.maximumf %136, %137 : vector<2x16xf32>
    %139 = arith.truncf %138 : vector<2x16xf32> to vector<2x16xbf16>
    %c0_102 = arith.constant 0 : index
    %c0_103 = arith.constant 0 : index
    %140 = vector.load %arg38[%c0_102, %c0_103] : memref<16x32xbf16, #tpu.memory_space<vmem>>, vector<16x32xbf16>
    %cst_104 = arith.constant dense<0.000000e+00> : vector<2x32xf32>
    %141 = tpu.matmul %139, %140, %cst_104 {dimension_numbers = #tpu.dot_dimension_numbers<[1], [0], [0], [1], [0, 0, 1, 1], [], []>} : vector<2x16xbf16>, vector<16x32xbf16>, vector<2x32xf32> -> vector<2x32xf32>
    %c0_105 = arith.constant 0 : index
    %c0_106 = arith.constant 0 : index
    %142 = vector.load %arg39[%c0_105, %c0_106] : memref<1x32xf32, #tpu.memory_space<vmem>>, vector<1x32xf32>
    %143 = vector.broadcast %142 : vector<1x32xf32> to vector<2x32xf32>
    %144 = arith.addf %141, %143 : vector<2x32xf32>
    %cst_107 = arith.constant 0.000000e+00 : f32
    %145 = vector.broadcast %cst_107 : f32 to vector<2x32xf32>
    %146 = arith.maximumf %144, %145 : vector<2x32xf32>
    %147 = arith.truncf %146 : vector<2x32xf32> to vector<2x32xbf16>
    %c0_108 = arith.constant 0 : index
    %c0_109 = arith.constant 0 : index
    %148 = vector.load %arg40[%c0_108, %c0_109] : memref<32x32xbf16, #tpu.memory_space<vmem>>, vector<32x32xbf16>
    %cst_110 = arith.constant dense<0.000000e+00> : vector<2x32xf32>
    %149 = tpu.matmul %147, %148, %cst_110 {dimension_numbers = #tpu.dot_dimension_numbers<[1], [0], [0], [1], [0, 0, 1, 1], [], []>} : vector<2x32xbf16>, vector<32x32xbf16>, vector<2x32xf32> -> vector<2x32xf32>
    %c0_111 = arith.constant 0 : index
    %c0_112 = arith.constant 0 : index
    %150 = vector.load %arg41[%c0_111, %c0_112] : memref<1x32xf32, #tpu.memory_space<vmem>>, vector<1x32xf32>
    %151 = vector.broadcast %150 : vector<1x32xf32> to vector<2x32xf32>
    %152 = arith.addf %149, %151 : vector<2x32xf32>
    %153 = arith.truncf %138 : vector<2x16xf32> to vector<2x16xbf16>
    %c0_113 = arith.constant 0 : index
    %c0_114 = arith.constant 0 : index
    %154 = vector.load %arg42[%c0_113, %c0_114] : memref<16x32xbf16, #tpu.memory_space<vmem>>, vector<16x32xbf16>
    %cst_115 = arith.constant dense<0.000000e+00> : vector<2x32xf32>
    %155 = tpu.matmul %153, %154, %cst_115 {dimension_numbers = #tpu.dot_dimension_numbers<[1], [0], [0], [1], [0, 0, 1, 1], [], []>} : vector<2x16xbf16>, vector<16x32xbf16>, vector<2x32xf32> -> vector<2x32xf32>
    %c0_116 = arith.constant 0 : index
    %c0_117 = arith.constant 0 : index
    %156 = vector.load %arg43[%c0_116, %c0_117] : memref<1x32xf32, #tpu.memory_space<vmem>>, vector<1x32xf32>
    %157 = vector.broadcast %156 : vector<1x32xf32> to vector<2x32xf32>
    %158 = arith.addf %155, %157 : vector<2x32xf32>
    %159 = arith.addf %158, %152 : vector<2x32xf32>
    %cst_118 = arith.constant 0.000000e+00 : f32
    %160 = vector.broadcast %cst_118 : f32 to vector<2x32xf32>
    %161 = arith.maximumf %159, %160 : vector<2x32xf32>
    %162 = arith.truncf %161 : vector<2x32xf32> to vector<2x32xbf16>
    %c0_119 = arith.constant 0 : index
    %c0_120 = arith.constant 0 : index
    %163 = vector.load %arg44[%c0_119, %c0_120] : memref<32x32xbf16, #tpu.memory_space<vmem>>, vector<32x32xbf16>
    %cst_121 = arith.constant dense<0.000000e+00> : vector<2x32xf32>
    %164 = tpu.matmul %162, %163, %cst_121 {dimension_numbers = #tpu.dot_dimension_numbers<[1], [0], [0], [1], [0, 0, 1, 1], [], []>} : vector<2x32xbf16>, vector<32x32xbf16>, vector<2x32xf32> -> vector<2x32xf32>
    %c0_122 = arith.constant 0 : index
    %c0_123 = arith.constant 0 : index
    %165 = vector.load %arg45[%c0_122, %c0_123] : memref<1x32xf32, #tpu.memory_space<vmem>>, vector<1x32xf32>
    %166 = vector.broadcast %165 : vector<1x32xf32> to vector<2x32xf32>
    %167 = arith.addf %164, %166 : vector<2x32xf32>
    %cst_124 = arith.constant 0.000000e+00 : f32
    %168 = vector.broadcast %cst_124 : f32 to vector<2x32xf32>
    %169 = arith.maximumf %167, %168 : vector<2x32xf32>
    %170 = arith.truncf %169 : vector<2x32xf32> to vector<2x32xbf16>
    %c0_125 = arith.constant 0 : index
    %c0_126 = arith.constant 0 : index
    %171 = vector.load %arg46[%c0_125, %c0_126] : memref<32x10xbf16, #tpu.memory_space<vmem>>, vector<32x10xbf16>
    %cst_127 = arith.constant dense<0.000000e+00> : vector<2x10xf32>
    %172 = tpu.matmul %170, %171, %cst_127 {dimension_numbers = #tpu.dot_dimension_numbers<[1], [0], [0], [1], [0, 0, 1, 1], [], []>} : vector<2x32xbf16>, vector<32x10xbf16>, vector<2x10xf32> -> vector<2x10xf32>
    %c0_128 = arith.constant 0 : index
    %c0_129 = arith.constant 0 : index
    %173 = vector.load %arg47[%c0_128, %c0_129] : memref<1x10xf32, #tpu.memory_space<vmem>>, vector<1x10xf32>
    %174 = vector.broadcast %173 : vector<1x10xf32> to vector<2x10xf32>
    %175 = arith.addf %172, %174 : vector<2x10xf32>
    %176 = arith.negf %175 : vector<2x10xf32>
    %177 = math.exp %176 : vector<2x10xf32>
    %cst_130 = arith.constant 1.000000e+00 : f32
    %178 = vector.broadcast %cst_130 : f32 to vector<2x10xf32>
    %179 = arith.addf %178, %177 : vector<2x10xf32>
    %180 = arith.divf %178, %179 : vector<2x10xf32>
    %c0_131 = arith.constant 0 : index
    %c0_132 = arith.constant 0 : index
    %181 = vector.load %arg48[%c0_131, %c0_132] : memref<2x10xf32, #tpu.memory_space<vmem>>, vector<2x10xf32>
    tpu.vector_store %arg48[%c0_131, %c0_132], %180 {strides = array<i32>} : memref<2x10xf32, #tpu.memory_space<vmem>>, vector<2x10xf32>,
    return
  }
  func.func @transform_0(%arg0: i32) -> (i32, i32) {
    %c0_i32 = arith.constant 0 : i32
    %c0_i32_0 = arith.constant 0 : i32
    %c0_i32_1 = arith.constant 0 : i32
    return %c0_i32, %c0_i32_0 : i32, i32
  }
  func.func @transform_1(%arg0: i32) -> (i32, i32) {
    %c0_i32 = arith.constant 0 : i32
    %c0_i32_0 = arith.constant 0 : i32
    %c0_i32_1 = arith.constant 0 : i32
    return %c0_i32, %c0_i32_0 : i32, i32
  }
  func.func @transform_2(%arg0: i32) -> (i32, i32) {
    %c0_i32 = arith.constant 0 : i32
    %c0_i32_0 = arith.constant 0 : i32
    %c0_i32_1 = arith.constant 0 : i32
    return %c0_i32, %c0_i32_0 : i32, i32
  }
  func.func @transform_3(%arg0: i32) -> (i32, i32) {
    %c0_i32 = arith.constant 0 : i32
    %c0_i32_0 = arith.constant 0 : i32
    %c0_i32_1 = arith.constant 0 : i32
    return %c0_i32, %c0_i32_0 : i32, i32
  }
  func.func @transform_4(%arg0: i32) -> (i32, i32) {
    %c0_i32 = arith.constant 0 : i32
    %c0_i32_0 = arith.constant 0 : i32
    %c0_i32_1 = arith.constant 0 : i32
    return %c0_i32, %c0_i32_0 : i32, i32
  }
  func.func @transform_5(%arg0: i32) -> (i32, i32) {
    %c0_i32 = arith.constant 0 : i32
    %c0_i32_0 = arith.constant 0 : i32
    %c0_i32_1 = arith.constant 0 : i32
    return %c0_i32, %c0_i32_0 : i32, i32
  }
  func.func @transform_6(%arg0: i32) -> (i32, i32) {
    %c0_i32 = arith.constant 0 : i32
    %c0_i32_0 = arith.constant 0 : i32
    %c0_i32_1 = arith.constant 0 : i32
    return %c0_i32, %c0_i32_0 : i32, i32
  }
  func.func @transform_7(%arg0: i32) -> (i32, i32) {
    %c0_i32 = arith.constant 0 : i32
    %c0_i32_0 = arith.constant 0 : i32
    %c0_i32_1 = arith.constant 0 : i32
    return %c0_i32, %c0_i32_0 : i32, i32
  }
  func.func @transform_8(%arg0: i32) -> (i32, i32) {
    %c0_i32 = arith.constant 0 : i32
    %c0_i32_0 = arith.constant 0 : i32
    %c0_i32_1 = arith.constant 0 : i32
    return %c0_i32, %c0_i32_0 : i32, i32
  }
  func.func @transform_9(%arg0: i32) -> (i32, i32) {
    %c0_i32 = arith.constant 0 : i32
    %c0_i32_0 = arith.constant 0 : i32
    %c0_i32_1 = arith.constant 0 : i32
    return %c0_i32, %c0_i32_0 : i32, i32
  }
  func.func @transform_10(%arg0: i32) -> (i32, i32) {
    %c0_i32 = arith.constant 0 : i32
    %c0_i32_0 = arith.constant 0 : i32
    %c0_i32_1 = arith.constant 0 : i32
    return %c0_i32, %c0_i32_0 : i32, i32
  }
  func.func @transform_11(%arg0: i32) -> (i32, i32) {
    %c0_i32 = arith.constant 0 : i32
    %c0_i32_0 = arith.constant 0 : i32
    %c0_i32_1 = arith.constant 0 : i32
    return %c0_i32, %c0_i32_0 : i32, i32
  }
  func.func @transform_12(%arg0: i32) -> (i32, i32) {
    %c0_i32 = arith.constant 0 : i32
    %c0_i32_0 = arith.constant 0 : i32
    %c0_i32_1 = arith.constant 0 : i32
    return %c0_i32, %c0_i32_0 : i32, i32
  }
  func.func @transform_13(%arg0: i32) -> (i32, i32) {
    %c0_i32 = arith.constant 0 : i32
    %c0_i32_0 = arith.constant 0 : i32
    %c0_i32_1 = arith.constant 0 : i32
    return %c0_i32, %c0_i32_0 : i32, i32
  }
  func.func @transform_14(%arg0: i32) -> (i32, i32) {
    %c0_i32 = arith.constant 0 : i32
    %c0_i32_0 = arith.constant 0 : i32
    %c0_i32_1 = arith.constant 0 : i32
    return %c0_i32, %c0_i32_0 : i32, i32
  }
  func.func @transform_15(%arg0: i32) -> (i32, i32) {
    %c0_i32 = arith.constant 0 : i32
    %c0_i32_0 = arith.constant 0 : i32
    %c0_i32_1 = arith.constant 0 : i32
    return %c0_i32, %c0_i32_0 : i32, i32
  }
  func.func @transform_16(%arg0: i32) -> (i32, i32) {
    %c0_i32 = arith.constant 0 : i32
    %c0_i32_0 = arith.constant 0 : i32
    %c0_i32_1 = arith.constant 0 : i32
    return %c0_i32, %c0_i32_0 : i32, i32
  }
  func.func @transform_17(%arg0: i32) -> (i32, i32) {
    %c0_i32 = arith.constant 0 : i32
    %c0_i32_0 = arith.constant 0 : i32
    %c0_i32_1 = arith.constant 0 : i32
    return %c0_i32, %c0_i32_0 : i32, i32
  }
  func.func @transform_18(%arg0: i32) -> (i32, i32) {
    %c0_i32 = arith.constant 0 : i32
    %c0_i32_0 = arith.constant 0 : i32
    %c0_i32_1 = arith.constant 0 : i32
    return %c0_i32, %c0_i32_0 : i32, i32
  }
  func.func @transform_19(%arg0: i32) -> (i32, i32) {
    %c0_i32 = arith.constant 0 : i32
    %c0_i32_0 = arith.constant 0 : i32
    %c0_i32_1 = arith.constant 0 : i32
    return %c0_i32, %c0_i32_0 : i32, i32
  }
  func.func @transform_20(%arg0: i32) -> (i32, i32) {
    %c0_i32 = arith.constant 0 : i32
    %c0_i32_0 = arith.constant 0 : i32
    %c0_i32_1 = arith.constant 0 : i32
    return %c0_i32, %c0_i32_0 : i32, i32
  }
  func.func @transform_21(%arg0: i32) -> (i32, i32) {
    %c0_i32 = arith.constant 0 : i32
    %c0_i32_0 = arith.constant 0 : i32
    %c0_i32_1 = arith.constant 0 : i32
    return %c0_i32, %c0_i32_0 : i32, i32
  }
  func.func @transform_22(%arg0: i32) -> (i32, i32) {
    %c0_i32 = arith.constant 0 : i32
    %c0_i32_0 = arith.constant 0 : i32
    %c0_i32_1 = arith.constant 0 : i32
    return %c0_i32, %c0_i32_0 : i32, i32
  }
  func.func @transform_23(%arg0: i32) -> (i32, i32) {
    %c0_i32 = arith.constant 0 : i32
    %c0_i32_0 = arith.constant 0 : i32
    %c0_i32_1 = arith.constant 0 : i32
    return %c0_i32, %c0_i32_0 : i32, i32
  }
  func.func @transform_24(%arg0: i32) -> (i32, i32) {
    %c0_i32 = arith.constant 0 : i32
    %c0_i32_0 = arith.constant 0 : i32
    %c0_i32_1 = arith.constant 0 : i32
    return %c0_i32, %c0_i32_0 : i32, i32
  }
  func.func @transform_25(%arg0: i32) -> (i32, i32) {
    %c0_i32 = arith.constant 0 : i32
    %c0_i32_0 = arith.constant 0 : i32
    %c0_i32_1 = arith.constant 0 : i32
    return %c0_i32, %c0_i32_0 : i32, i32
  }
  func.func @transform_26(%arg0: i32) -> (i32, i32) {
    %c0_i32 = arith.constant 0 : i32
    %c0_i32_0 = arith.constant 0 : i32
    %c0_i32_1 = arith.constant 0 : i32
    return %c0_i32, %c0_i32_0 : i32, i32
  }
  func.func @transform_27(%arg0: i32) -> (i32, i32) {
    %c0_i32 = arith.constant 0 : i32
    %c0_i32_0 = arith.constant 0 : i32
    %c0_i32_1 = arith.constant 0 : i32
    return %c0_i32, %c0_i32_0 : i32, i32
  }
  func.func @transform_28(%arg0: i32) -> (i32, i32) {
    %c0_i32 = arith.constant 0 : i32
    %c0_i32_0 = arith.constant 0 : i32
    %c0_i32_1 = arith.constant 0 : i32
    return %c0_i32, %c0_i32_0 : i32, i32
  }
  func.func @transform_29(%arg0: i32) -> (i32, i32) {
    %c0_i32 = arith.constant 0 : i32
    %c0_i32_0 = arith.constant 0 : i32
    %c0_i32_1 = arith.constant 0 : i32
    return %c0_i32, %c0_i32_0 : i32, i32
  }
  func.func @transform_30(%arg0: i32) -> (i32, i32) {
    %c0_i32 = arith.constant 0 : i32
    %c0_i32_0 = arith.constant 0 : i32
    %c0_i32_1 = arith.constant 0 : i32
    return %c0_i32, %c0_i32_0 : i32, i32
  }
  func.func @transform_31(%arg0: i32) -> (i32, i32) {
    %c0_i32 = arith.constant 0 : i32
    %c0_i32_0 = arith.constant 0 : i32
    %c0_i32_1 = arith.constant 0 : i32
    return %c0_i32, %c0_i32_0 : i32, i32
  }
  func.func @transform_32(%arg0: i32) -> (i32, i32) {
    %c0_i32 = arith.constant 0 : i32
    %c0_i32_0 = arith.constant 0 : i32
    %c0_i32_1 = arith.constant 0 : i32
    return %c0_i32, %c0_i32_0 : i32, i32
  }
  func.func @transform_33(%arg0: i32) -> (i32, i32) {
    %c0_i32 = arith.constant 0 : i32
    %c0_i32_0 = arith.constant 0 : i32
    %c0_i32_1 = arith.constant 0 : i32
    return %c0_i32, %c0_i32_0 : i32, i32
  }
  func.func @transform_34(%arg0: i32) -> (i32, i32) {
    %c0_i32 = arith.constant 0 : i32
    %c0_i32_0 = arith.constant 0 : i32
    %c0_i32_1 = arith.constant 0 : i32
    return %c0_i32, %c0_i32_0 : i32, i32
  }
  func.func @transform_35(%arg0: i32) -> (i32, i32) {
    %c0_i32 = arith.constant 0 : i32
    %c0_i32_0 = arith.constant 0 : i32
    %c0_i32_1 = arith.constant 0 : i32
    return %c0_i32, %c0_i32_0 : i32, i32
  }
  func.func @transform_36(%arg0: i32) -> (i32, i32) {
    %c0_i32 = arith.constant 0 : i32
    %c0_i32_0 = arith.constant 0 : i32
    %c0_i32_1 = arith.constant 0 : i32
    return %c0_i32, %c0_i32_0 : i32, i32
  }
  func.func @transform_37(%arg0: i32) -> (i32, i32) {
    %c0_i32 = arith.constant 0 : i32
    %c0_i32_0 = arith.constant 0 : i32
    %c0_i32_1 = arith.constant 0 : i32
    return %c0_i32, %c0_i32_0 : i32, i32
  }
  func.func @transform_38(%arg0: i32) -> (i32, i32) {
    %c0_i32 = arith.constant 0 : i32
    %c0_i32_0 = arith.constant 0 : i32
    %c0_i32_1 = arith.constant 0 : i32
    return %c0_i32, %c0_i32_0 : i32, i32
  }
  func.func @transform_39(%arg0: i32) -> (i32, i32) {
    %c0_i32 = arith.constant 0 : i32
    %c0_i32_0 = arith.constant 0 : i32
    %c0_i32_1 = arith.constant 0 : i32
    return %c0_i32, %c0_i32_0 : i32, i32
  }
  func.func @transform_40(%arg0: i32) -> (i32, i32) {
    %c0_i32 = arith.constant 0 : i32
    %c0_i32_0 = arith.constant 0 : i32
    %c0_i32_1 = arith.constant 0 : i32
    return %c0_i32, %c0_i32_0 : i32, i32
  }
  func.func @transform_41(%arg0: i32) -> (i32, i32) {
    %c0_i32 = arith.constant 0 : i32
    %c0_i32_0 = arith.constant 0 : i32
    %c0_i32_1 = arith.constant 0 : i32
    return %c0_i32, %c0_i32_0 : i32, i32
  }
  func.func @transform_42(%arg0: i32) -> (i32, i32) {
    %c0_i32 = arith.constant 0 : i32
    %c0_i32_0 = arith.constant 0 : i32
    %c0_i32_1 = arith.constant 0 : i32
    return %c0_i32, %c0_i32_0 : i32, i32
  }
  func.func @transform_43(%arg0: i32) -> (i32, i32) {
    %c0_i32 = arith.constant 0 : i32
    %c0_i32_0 = arith.constant 0 : i32
    %c0_i32_1 = arith.constant 0 : i32
    return %c0_i32, %c0_i32_0 : i32, i32
  }
  func.func @transform_44(%arg0: i32) -> (i32, i32) {
    %c0_i32 = arith.constant 0 : i32
    %c0_i32_0 = arith.constant 0 : i32
    %c0_i32_1 = arith.constant 0 : i32
    return %c0_i32, %c0_i32_0 : i32, i32
  }
  func.func @transform_45(%arg0: i32) -> (i32, i32) {
    %c0_i32 = arith.constant 0 : i32
    %c0_i32_0 = arith.constant 0 : i32
    %c0_i32_1 = arith.constant 0 : i32
    return %c0_i32, %c0_i32_0 : i32, i32
  }
  func.func @transform_46(%arg0: i32) -> (i32, i32) {
    %c0_i32 = arith.constant 0 : i32
    %c0_i32_0 = arith.constant 0 : i32
    %c0_i32_1 = arith.constant 0 : i32
    return %c0_i32, %c0_i32_0 : i32, i32
  }
  func.func @transform_47(%arg0: i32) -> (i32, i32) {
    %c0_i32 = arith.constant 0 : i32
    %c0_i32_0 = arith.constant 0 : i32
    %c0_i32_1 = arith.constant 0 : i32
    return %c0_i32, %c0_i32_0 : i32, i32
  }
}

</mosaic_0001>

<bundles_post_ra>
// kernel: tpu_custom_call.1
= control target key start
LH: loop header
LB: loop body
LE: loop exit
PB: predicated region body
PF: predicated region fallthrough
CT: control target
= control target key end

     0   :  { %s6709_s6 = smov 1   ;;  %s6710_s10 = smov 2   ;;  %s7329_s0 = inlined_call_operand.smem [shape: u32[48], index: -1, kind: input, shape index: {}] }
   0x1   :  { %s6804_s5 = sld [smem:[%s7329_s0]]   ;;  %s6711_s14 = smov 3  }
   0x2   :  { %s6809_s9 = sld [smem:[%s7329_s0 + %s6709_s6]]   ;;  %s6712_s18 = smov 4  }
   0x3   :  { %s6814_s13 = sld [smem:[%s7329_s0 + %s6710_s10]]   ;;  %s6713_s22 = smov 5  }
   0x4   :  { %s6819_s17 = sld [smem:[%s7329_s0 + %s6711_s14]]   ;;  %s6714_s26 = smov 6  }
   0x5   :  { %s6824_s21 = sld [smem:[%s7329_s0 + %s6712_s18]]   ;;  %s6715_s30 = smov 7  }
   0x6   :  { %s6829_s25 = sld [smem:[%s7329_s0 + %s6713_s22]]   ;;  %s6716_s4 = smov 8  }
   0x7   :  { %7337 = sst [smem:[#allocation72_spill]] %s6804_s5  ;;  %s6717_s10 = smov 9  }
   0x8   :  { %s6834_s29 = sld [smem:[%s7329_s0 + %s6714_s26]]   ;;  %s6718_s15 = smov 10  }
   0x9   :  { %7338 = sst [smem:[#allocation73_spill]] %s6814_s13  ;;  %s6719_s20 = smov 11  }
   0xa   :  { %s6839_s3 = sld [smem:[%s7329_s0 + %s6715_s30]]   ;;  %s6720_s26 = smov 12  }
   0xb   :  { %7339 = sst [smem:[#allocation74_spill]] %s6824_s21  ;;  %s6721_s1 = smov 13  }
   0xc   :  { %s6844_s8 = sld [smem:[%s7329_s0 + %s6716_s4]]   ;;  %s6722_s7 = smov 14  }
   0xd   :  { %s6849_s14 = sld [smem:[%s7329_s0 + %s6717_s10]]   ;;  %s6724_s22 = smov 16  }
   0xe   :  { %7340 = sst [smem:[#allocation75_spill]] %s6834_s29  ;;  %s6725_s28 = smov 17  }
   0xf   :  { %s6854_s19 = sld [smem:[%s7329_s0 + %s6718_s15]]   ;;  %s6723_s15 = smov 15  }
  0x10   :  { %7341 = sst [smem:[#allocation76_spill]] %s6839_s3 }
  0x11   :  { %s6859_s24 = sld [smem:[%s7329_s0 + %s6719_s20]]  }
  0x12   :  { %7342 = sst [smem:[#allocation77_spill]] %s6844_s8 }
  0x13   :  { %s6864_s30 = sld [smem:[%s7329_s0 + %s6720_s26]]  }
  0x14   :  { %s6869_s6 = sld [smem:[%s7329_s0 + %s6721_s1]]  }
  0x15   :  { %7343 = sst [smem:[#allocation78_spill]] %s6854_s19 }
  0x16   :  { %s6874_s12 = sld [smem:[%s7329_s0 + %s6722_s7]]   ;;  %s6726_s7 = smov 18  }
  0x17   :  { %s6879_s20 = sld [smem:[%s7329_s0 + %s6723_s15]]   ;;  %s6727_s15 = smov 19  }
  0x18   :  { %s6884_s27 = sld [smem:[%s7329_s0 + %s6724_s22]]   ;;  %s6728_s22 = smov 20  }
  0x19   :  { %7344 = sst [smem:[#allocation79_spill]] %s6864_s30 }
  0x1a   :  { %7345 = sst [smem:[#allocation80_spill]] %s6869_s6 }
  0x1b   :  { %s6889_s4 = sld [smem:[%s7329_s0 + %s6725_s28]]   ;;  %s6729_s28 = smov 21  }
  0x1c   :  { %s6894_s6 = sld [smem:[%s7329_s0 + %s6726_s7]]   ;;  %s6730_s7 = smov 22  }
  0x1d   :  { %7346 = sst [smem:[#allocation81_spill]] %s6879_s20 }
  0x1e   :  { %s6899_s8 = sld [smem:[%s7329_s0 + %s6727_s15]]   ;;  %s6731_s15 = smov 23  }
  0x1f   :  { %s6904_s3 = sld [smem:[%s7329_s0 + %s6728_s22]]   ;;  %s6732_s22 = smov 24  }
  0x20   :  { %s6924_s20 = sld [smem:[%s7329_s0 + %s6732_s22]]   ;;  %s6736_s22 = smov 28  }
  0x21   :  { %7347 = sst [smem:[#allocation82_spill]] %s6889_s4 }
  0x22   :  { %7348 = sst [smem:[#allocation83_spill]] %s6894_s6 }
  0x23   :  { %s6909_s4 = sld [smem:[%s7329_s0 + %s6729_s28]]   ;;  %s6733_s28 = smov 25  }
  0x24   :  { %7349 = sst [smem:[#allocation84_spill]] %s6899_s8 }
  0x25   :  { %s6914_s6 = sld [smem:[%s7329_s0 + %s6730_s7]]   ;;  %s6734_s7 = smov 26  }
  0x26   :  { %s6919_s8 = sld [smem:[%s7329_s0 + %s6731_s15]]   ;;  %s6735_s15 = smov 27  }
  0x27   :  { %7352 = sst [smem:[#allocation87_spill]] %s6924_s20 }
  0x28   :  { %s6934_s30 = sld [smem:[%s7329_s0 + %s6734_s7]]   ;;  %s6738_s7 = smov 30  }
  0x29   :  { %7350 = sst [smem:[#allocation85_spill]] %s6909_s4 }
  0x2a   :  { %s6929_s4 = sld [smem:[%s7329_s0 + %s6733_s28]]   ;;  %s6737_s28 = smov 29  }
  0x2b   :  { %s6944_s20 = sld [smem:[%s7329_s0 + %s6736_s22]]   ;;  %s6740_s22 = smov 32  }
  0x2c   :  { %7351 = sst [smem:[#allocation86_spill]] %s6919_s8 }
  0x2d   :  { %s6939_s8 = sld [smem:[%s7329_s0 + %s6735_s15]]   ;;  %s6739_s15 = smov 31  }
  0x2e   :  { %7353 = sst [smem:[#allocation88_spill]] %s6934_s30 }
  0x2f   :  { %s6949_s19 = sld [smem:[%s7329_s0 + %s6737_s28]]   ;;  %s6741_s28 = smov 33  }
  0x30   :  { %s6954_s30 = sld [smem:[%s7329_s0 + %s6738_s7]]   ;;  %s6742_s7 = smov 34  }
  0x31   :  { %7354 = sst [smem:[#allocation89_spill]] %s6944_s20 }
  0x32   :  { %s6959_s29 = sld [smem:[%s7329_s0 + %s6739_s15]]   ;;  %s6743_s15 = smov 35  }
  0x33   :  { %s6964_s20 = sld [smem:[%s7329_s0 + %s6740_s22]]   ;;  %s6744_s22 = smov 36  }
  0x34   :  { %s6969_s21 = sld [smem:[%s7329_s0 + %s6741_s28]]   ;;  %s6745_s28 = smov 37  }
  0x35   :  { %s6979_s13 = sld [smem:[%s7329_s0 + %s6743_s15]]   ;;  %s6747_s15 = smov 39  }
  0x36   :  { %7355 = sst [smem:[#allocation90_spill]] %s6954_s30 }
  0x37   :  { %s6974_s30 = sld [smem:[%s7329_s0 + %s6742_s7]]   ;;  %s6746_s7 = smov 38  }
  0x38   :  { %s6989_s5 = sld [smem:[%s7329_s0 + %s6745_s28]]   ;;  %s6749_s28 = smov 41  }
  0x39   :  { %7356 = sst [smem:[#allocation91_spill]] %s6964_s20 }
  0x3a   :  { %s6984_s20 = sld [smem:[%s7329_s0 + %s6744_s22]]   ;;  %s6748_s22 = smov 40  }
  0x3b   :  { %7358 = sst [smem:[#allocation93_spill]] %s6979_s13 }
  0x3c   :  { %s6999_s13 = sld [smem:[%s7329_s0 + %s6747_s15]]   ;;  %s6751_s15 = smov 43  }
  0x3d   :  { %7357 = sst [smem:[#allocation92_spill]] %s6974_s30 }
  0x3e   :  { %7360 = sst [smem:[#allocation95_spill]] %s6989_s5 }
  0x3f   :  { %s6994_s30 = sld [smem:[%s7329_s0 + %s6746_s7]]   ;;  %s6750_s7 = smov 42  }
  0x40   :  { %7359 = sst [smem:[#allocation94_spill]] %s6984_s20 }
  0x41   :  { %s7004_s20 = sld [smem:[%s7329_s0 + %s6748_s22]]   ;;  %s6752_s22 = smov 44  }
  0x42   :  { %7362 = sst [smem:[#allocation97_spill]] %s6999_s13 }
  0x43   :  { %s7009_s5 = sld [smem:[%s7329_s0 + %s6749_s28]]   ;;  %s6753_s28 = smov 45  }
  0x44   :  { %s7019_s13 = sld [smem:[%s7329_s0 + %s6751_s15]]   ;;  %s6755_s15 = smov 47  }
  0x45   :  { %7361 = sst [smem:[#allocation96_spill]] %s6994_s30 }
  0x46   :  { %s7014_s30 = sld [smem:[%s7329_s0 + %s6750_s7]]   ;;  %s6754_s7 = smov 46  }
  0x47   :  { %7363 = sst [smem:[#allocation98_spill]] %s7004_s20 }
  0x48   :  { %s7024_s20 = sld [smem:[%s7329_s0 + %s6752_s22]]  }
  0x49   :  { %7364 = sst [smem:[#allocation99_spill]] %s7009_s5 }
  0x4a   :  { %7366 = sst [smem:[#allocation101_spill]] %s7019_s13 }
  0x4b   :  { %s7029_s5 = sld [smem:[%s7329_s0 + %s6753_s28]]  }
  0x4c   :  { %7365 = sst [smem:[#allocation100_spill]] %s7014_s30 }
  0x4d   :  { %s7034_s30 = sld [smem:[%s7329_s0 + %s6754_s7]]  }
  0x4e   :  { %s7039_s13 = sld [smem:[%s7329_s0 + %s6755_s15]]  }
  0x4f   :  { %100 = vsyncpa [#allocation3], 0 }
  0x50   :  { %101 = vsyncpa [#allocation6], 0 }
  0x51   :  { %102 = vsyncpa [#allocation9], 0 }
  0x52   :  { %103 = vsyncpa [#allocation12], 0 }
  0x53   :  { %104 = vsyncpa [#allocation15], 0 }
  0x54   :  { %105 = vsyncpa [#allocation18], 0 }
  0x55   :  { %106 = vsyncpa [#allocation21], 0 }
  0x56   :  { %107 = vsyncpa [#allocation24], 0 }
  0x57   :  { %108 = vsyncpa [#allocation27], 0 }
  0x58   :  { %109 = vsyncpa [#allocation30], 0 }
  0x59   :  { %110 = vsyncpa [#allocation33], 0 }
  0x5a   :  { %111 = vsyncpa [#allocation36], 0 }
  0x5b   :  { %112 = vsyncpa [#allocation39], 0 }
  0x5c   :  { %113 = vsyncpa [#allocation42], 0 }
  0x5d   :  { %114 = vsyncpa [#allocation45], 0 }
  0x5e   :  { %115 = vsyncpa [#allocation48], 0 }
  0x5f   :  { %116 = vsyncpa [#allocation51], 0 }
  0x60   :  { %117 = vsyncpa [#allocation4], 0  ;;  %s6756_s0 = smov [#allocation5]  }
  0x61   :  { %s133_s22 = sshll.u32 %s6756_s0, 4  ;;  %s134_s22 = int_to_ptr.vmem [resolvable:$true] %s133_s22 }
  0x62   :  { %s6001_s23 = scalar_lea.vmem %s134_s22, 8192  ;;  %p6006_p1 = scmp.lt.s32.totalorder %s134_s22, %s134_s22 }
  0x63   :  { %p6002_p0 = scmp.ne.s32.totalorder %s134_s22, %s6001_s23  ;;  %p6007_p2 = scmp.lt.s32.totalorder %s6001_s23, %s6001_s23 }
  0x65   :  { %p6008_p3 = por %p6007_p2, %p6006_p1 }
  0x67   :  { %p6009_p4 = pnand %p6008_p3, %p6002_p0 }
  0x69   :  { %6012 = shalt.err (!%p6009_p4)
}
  0x6a   :  { %s6757_s26 = smov 256   ;;  %s6758_s28 = smov 16  }
  0x6b   :  { %139 = dma.hbm_to_vmem [thread:$0]  %s6809_s9, 8192, %s134_s22, [#allocation6], %s6757_s26, %s6757_s26, %s6758_s28  }
  0x6c   :  { %s6759_s1 = smov [#allocation8]   ;;  %s6760_s7 = smov [#allocation11]  }
  0x6d   :  { %s155_s2 = sshll.u32 %s6759_s1, 4  ;;  %s177_s10 = sshll.u32 %s6760_s7, 4  ;;  %s156_s2 = int_to_ptr.vmem [resolvable:$true] %s155_s2  ;;  %s178_s10 = int_to_ptr.vmem [resolvable:$true] %s177_s10 }
  0x6e   :  { %s6021_s11 = scalar_lea.vmem %s156_s2, 16384  ;;  %p6026_p6 = scmp.lt.s32.totalorder %s156_s2, %s156_s2 }
  0x6f   :  { %p6022_p5 = scmp.ne.s32.totalorder %s156_s2, %s6021_s11  ;;  %p6027_p7 = scmp.lt.s32.totalorder %s6021_s11, %s6021_s11 }
  0x71   :  { %p6028_p8 = por %p6027_p7, %p6026_p6 }
  0x73   :  { %p6029_p9 = pnand %p6028_p8, %p6022_p5 }
  0x75   :  { %6032 = shalt.err (!%p6029_p9)
}
  0x76   :  { %161 = dma.hbm_to_vmem [thread:$0]  %s6819_s17, 16384, %s156_s2, [#allocation9], %s6757_s26, %s6757_s26, %s6758_s28  }
  0x77   :  { %s6041_s15 = scalar_lea.vmem %s178_s10, 8192  ;;  %p6046_p11 = scmp.lt.s32.totalorder %s178_s10, %s178_s10 }
  0x78   :  { %p6042_p10 = scmp.ne.s32.totalorder %s178_s10, %s6041_s15  ;;  %p6047_p12 = scmp.lt.s32.totalorder %s6041_s15, %s6041_s15 }
  0x7a   :  { %p6048_p13 = por %p6047_p12, %p6046_p11 }
  0x7c   :  { %p6049_p0 = pnand %p6048_p13, %p6042_p10 }
  0x7e   :  { %6052 = shalt.err (!%p6049_p0)
}
  0x7f   :  { %183 = dma.hbm_to_vmem [thread:$0]  %s6829_s25, 8192, %s178_s10, [#allocation12], %s6757_s26, %s6757_s26, %s6758_s28  }
  0x80   :  { %s6761_s9 = smov [#allocation14]  }
  0x81   :  { %s203_s16 = sshll.u32 %s6761_s9, 4  ;;  %s204_s16 = int_to_ptr.vmem [resolvable:$true] %s203_s16 }
  0x82   :  { %s6061_s18 = scalar_lea.vmem %s204_s16, 1024  ;;  %p6066_p2 = scmp.lt.s32.totalorder %s204_s16, %s204_s16 }
  0x83   :  { %p6062_p1 = scmp.ne.s32.totalorder %s204_s16, %s6061_s18  ;;  %p6067_p3 = scmp.lt.s32.totalorder %s6061_s18, %s6061_s18 }
  0x85   :  { %p6068_p4 = por %p6067_p3, %p6066_p2 }
  0x87   :  { %p6069_p5 = pnand %p6068_p4, %p6062_p1 }
  0x89   :  { %6072 = shalt.err (!%p6069_p5)
}
  0x8a   :  { %s6762_s17 = smov 64   ;;  %s6763_s0 = smov 4  }
  0x8b   :  { %209 = dma.hbm_to_vmem [thread:$0]  %s6849_s14, 1024, %s204_s16, [#allocation15], %s6762_s17, %s6762_s17, %s6763_s0  }
  0x8c   :  { %s6764_s22 = smov [#allocation17]   ;;  %s6765_s25 = smov [#allocation20]  }
  0x8d   :  { %s225_s23 = sshll.u32 %s6764_s22, 4  ;;  %s250_s26 = sshll.u32 %s6765_s25, 4  ;;  %s226_s23 = int_to_ptr.vmem [resolvable:$true] %s225_s23  ;;  %s251_s26 = int_to_ptr.vmem [resolvable:$true] %s250_s26 }
  0x8e   :  { %s6081_s28 = scalar_lea.vmem %s226_s23, 4096  ;;  %p6086_p7 = scmp.lt.s32.totalorder %s226_s23, %s226_s23 }
  0x8f   :  { %p6082_p6 = scmp.ne.s32.totalorder %s226_s23, %s6081_s28  ;;  %p6087_p8 = scmp.lt.s32.totalorder %s6081_s28, %s6081_s28 }
  0x91   :  { %p6088_p9 = por %p6087_p8, %p6086_p7 }
  0x93   :  { %p6089_p10 = pnand %p6088_p9, %p6082_p6 }
  0x95   :  { %6092 = shalt.err (!%p6089_p10)
}
  0x96   :  { %231 = dma.hbm_to_vmem [thread:$0]  %s6859_s24, 4096, %s226_s23, [#allocation18], %s6762_s17, %s6762_s17, %s6763_s0  }
  0x97   :  { %s6101_s1 = scalar_lea.vmem %s251_s26, 16  ;;  %s6105_s14 = scalar_lea.vmem %s251_s26, 32 }
  0x98   :  { %p6102_p11 = scmp.ne.s32.totalorder %s251_s26, %s6101_s1  ;;  %p6106_p12 = scmp.lt.s32.totalorder %s251_s26, %s251_s26 }
  0x99   :  { %p6107_p13 = scmp.lt.s32.totalorder %s6105_s14, %s6101_s1 }
  0x9b   :  { %p6108_p0 = por %p6107_p13, %p6106_p12 }
  0x9d   :  { %p6109_p1 = pnand %p6108_p0, %p6102_p11 }
  0x9f   :  { %6112 = shalt.err (!%p6109_p1)
}
  0xa0   :  { %253 = dma.hbm_to_vmem [thread:$0]  %s6874_s12, 16, %s251_s26, [#allocation21]  }
  0xa1   :  { %s6766_s2 = smov [#allocation23]   ;;  %s6767_s10 = smov [#allocation26]  }
  0xa2   :  { %s272_s7 = sshll.u32 %s6766_s2, 4  ;;  %s296_s11 = sshll.u32 %s6767_s10, 4  ;;  %s273_s7 = int_to_ptr.vmem [resolvable:$true] %s272_s7  ;;  %s297_s11 = int_to_ptr.vmem [resolvable:$true] %s296_s11 }
  0xa3   :  { %s6121_s15 = scalar_lea.vmem %s273_s7, 16  ;;  %s6125_s9 = scalar_lea.vmem %s273_s7, 32 }
  0xa4   :  { %p6122_p2 = scmp.ne.s32.totalorder %s273_s7, %s6121_s15  ;;  %p6126_p3 = scmp.lt.s32.totalorder %s273_s7, %s273_s7 }
  0xa5   :  { %p6127_p4 = scmp.lt.s32.totalorder %s6125_s9, %s6121_s15 }
  0xa7   :  { %p6128_p5 = por %p6127_p4, %p6126_p3 }
  0xa9   :  { %p6129_p6 = pnand %p6128_p5, %p6122_p2 }
  0xab   :  { %6132 = shalt.err (!%p6129_p6)
}
  0xac   :  { %275 = dma.hbm_to_vmem [thread:$0]  %s6884_s27, 16, %s273_s7, [#allocation24]  }
  0xad   :  { %s6141_s24 = scalar_lea.vmem %s297_s11, 16  ;;  %s6145_s16 = scalar_lea.vmem %s297_s11, 32 }
  0xae   :  { %p6142_p7 = scmp.ne.s32.totalorder %s297_s11, %s6141_s24  ;;  %p6146_p8 = scmp.lt.s32.totalorder %s297_s11, %s297_s11 }
  0xaf   :  { %p6147_p9 = scmp.lt.s32.totalorder %s6145_s16, %s6141_s24 }
  0xb1   :  { %p6148_p10 = por %p6147_p9, %p6146_p8 }
  0xb3   :  { %p6149_p11 = pnand %p6148_p10, %p6142_p7 }
  0xb5   :  { %6152 = shalt.err (!%p6149_p11)
}
  0xb6   :  { %299 = dma.hbm_to_vmem [thread:$0]  %s6904_s3, 16, %s297_s11, [#allocation27]  }
  0xb7   :  { %s6768_s12 = smov [#allocation29]   ;;  %s6769_s22 = smov [#allocation32]  }
  0xb8   :  { %s318_s18 = sshll.u32 %s6768_s12, 4  ;;  %s339_s23 = sshll.u32 %s6769_s22, 4  ;;  %s319_s18 = int_to_ptr.vmem [resolvable:$true] %s318_s18  ;;  %s340_s23 = int_to_ptr.vmem [resolvable:$true] %s339_s23 }
  0xb9   :  { %s6161_s25 = scalar_lea.vmem %s319_s18, 16  ;;  %s6165_s26 = scalar_lea.vmem %s319_s18, 32 }
  0xba   :  { %p6162_p12 = scmp.ne.s32.totalorder %s319_s18, %s6161_s25  ;;  %p6166_p13 = scmp.lt.s32.totalorder %s319_s18, %s319_s18 }
  0xbb   :  { %p6167_p0 = scmp.lt.s32.totalorder %s6165_s26, %s6161_s25 }
  0xbd   :  { %p6168_p1 = por %p6167_p0, %p6166_p13 }
  0xbf   :  { %p6169_p2 = pnand %p6168_p1, %p6162_p12 }
  0xc1   :  { %6172 = shalt.err (!%p6169_p2)
}
  0xc2   :  { %321 = dma.hbm_to_vmem [thread:$0]  %s6914_s6, 16, %s319_s18, [#allocation30]  }
  0xc3   :  { %s6181_s27 = scalar_lea.vmem %s340_s23, 128  ;;  %p6186_p4 = scmp.lt.s32.totalorder %s340_s23, %s340_s23 }
  0xc4   :  { %p6182_p3 = scmp.ne.s32.totalorder %s340_s23, %s6181_s27  ;;  %p6187_p5 = scmp.lt.s32.totalorder %s6181_s27, %s6181_s27 }
  0xc6   :  { %p6188_p6 = por %p6187_p5, %p6186_p4 }
  0xc8   :  { %p6189_p7 = pnand %p6188_p6, %p6182_p3 }
  0xca   :  { %6192 = shalt.err (!%p6189_p7)
}
  0xcb   :  { %345 = dma.hbm_to_vmem [thread:$0]  %s6929_s4, 128, %s340_s23, [#allocation33], %s6762_s17, %s6762_s17, %s6763_s0  }
  0xcc   :  { %s6770_s3 = smov [#allocation35]   ;;  %s6771_s1 = smov [#allocation38]  }
  0xcd   :  { %s361_s28 = sshll.u32 %s6770_s3, 4  ;;  %s383_s14 = sshll.u32 %s6771_s1, 4  ;;  %s362_s28 = int_to_ptr.vmem [resolvable:$true] %s361_s28  ;;  %s384_s14 = int_to_ptr.vmem [resolvable:$true] %s383_s14 }
  0xce   :  { %s6201_s2 = scalar_lea.vmem %s362_s28, 128  ;;  %p6206_p9 = scmp.lt.s32.totalorder %s362_s28, %s362_s28 }
  0xcf   :  { %p6202_p8 = scmp.ne.s32.totalorder %s362_s28, %s6201_s2  ;;  %p6207_p10 = scmp.lt.s32.totalorder %s6201_s2, %s6201_s2 }
  0xd1   :  { %p6208_p11 = por %p6207_p10, %p6206_p9 }
  0xd3   :  { %p6209_p12 = pnand %p6208_p11, %p6202_p8 }
  0xd5   :  { %6212 = shalt.err (!%p6209_p12)
}
  0xd6   :  { %367 = dma.hbm_to_vmem [thread:$0]  %s6939_s8, 128, %s362_s28, [#allocation36], %s6762_s17, %s6762_s17, %s6763_s0  }
  0xd7   :  { %s6221_s6 = scalar_lea.vmem %s384_s14, 128  ;;  %p6226_p0 = scmp.lt.s32.totalorder %s384_s14, %s384_s14 }
  0xd8   :  { %p6222_p13 = scmp.ne.s32.totalorder %s384_s14, %s6221_s6  ;;  %p6227_p1 = scmp.lt.s32.totalorder %s6221_s6, %s6221_s6 }
  0xda   :  { %p6228_p2 = por %p6227_p1, %p6226_p0 }
  0xdc   :  { %p6229_p3 = pnand %p6228_p2, %p6222_p13 }
  0xde   :  { %6232 = shalt.err (!%p6229_p3)
}
  0xdf   :  { %389 = dma.hbm_to_vmem [thread:$0]  %s6949_s19, 128, %s384_s14, [#allocation39], %s6762_s17, %s6762_s17, %s6763_s0  }
  0xe0   :  { %s6772_s4 = smov [#allocation41]   ;;  %s6773_s10 = smov [#allocation44]  }
  0xe1   :  { %s405_s7 = sshll.u32 %s6772_s4, 4  ;;  %s427_s11 = sshll.u32 %s6773_s10, 4  ;;  %s406_s7 = int_to_ptr.vmem [resolvable:$true] %s405_s7  ;;  %s428_s11 = int_to_ptr.vmem [resolvable:$true] %s427_s11 }
  0xe2   :  { %s6241_s15 = scalar_lea.vmem %s406_s7, 128  ;;  %p6246_p5 = scmp.lt.s32.totalorder %s406_s7, %s406_s7 }
  0xe3   :  { %p6242_p4 = scmp.ne.s32.totalorder %s406_s7, %s6241_s15  ;;  %p6247_p6 = scmp.lt.s32.totalorder %s6241_s15, %s6241_s15 }
  0xe5   :  { %p6248_p7 = por %p6247_p6, %p6246_p5 }
  0xe7   :  { %p6249_p8 = pnand %p6248_p7, %p6242_p4 }
  0xe9   :  { %6252 = shalt.err (!%p6249_p8)
}
  0xea   :  { %411 = dma.hbm_to_vmem [thread:$0]  %s6959_s29, 128, %s406_s7, [#allocation42], %s6762_s17, %s6762_s17, %s6763_s0  }
  0xeb   :  { %s6261_s8 = scalar_lea.vmem %s428_s11, 128  ;;  %p6266_p10 = scmp.lt.s32.totalorder %s428_s11, %s428_s11 }
  0xec   :  { %p6262_p9 = scmp.ne.s32.totalorder %s428_s11, %s6261_s8  ;;  %p6267_p11 = scmp.lt.s32.totalorder %s6261_s8, %s6261_s8 }
  0xee   :  { %p6268_p12 = por %p6267_p11, %p6266_p10 }
  0xf0   :  { %p6269_p13 = pnand %p6268_p12, %p6262_p9 }
  0xf2   :  { %6272 = shalt.err (!%p6269_p13)
}
  0xf3   :  { %433 = dma.hbm_to_vmem [thread:$0]  %s6969_s21, 128, %s428_s11, [#allocation45], %s6762_s17, %s6762_s17, %s6763_s0  }
  0xf4   :  { %s6774_s19 = smov [#allocation47]   ;;  %s6775_s24 = smov [#allocation50]  }
  0xf5   :  { %s449_s9 = sshll.u32 %s6774_s19, 4  ;;  %s471_s16 = sshll.u32 %s6775_s24, 4  ;;  %s450_s9 = int_to_ptr.vmem [resolvable:$true] %s449_s9  ;;  %s472_s16 = int_to_ptr.vmem [resolvable:$true] %s471_s16 }
  0xf6   :  { %s6281_s12 = scalar_lea.vmem %s450_s9, 128  ;;  %p6286_p1 = scmp.lt.s32.totalorder %s450_s9, %s450_s9 }
  0xf7   :  { %p6282_p0 = scmp.ne.s32.totalorder %s450_s9, %s6281_s12  ;;  %p6287_p2 = scmp.lt.s32.totalorder %s6281_s12, %s6281_s12 }
  0xf9   :  { %p6288_p3 = por %p6287_p2, %p6286_p1 }
  0xfb   :  { %p6289_p4 = pnand %p6288_p3, %p6282_p0 }
  0xfd   :  { %6292 = shalt.err (!%p6289_p4)
}
  0xfe   :  { %s7367_s29 = sld [smem:[#allocation93_spill]]  ;;  %s6301_s18 = scalar_lea.vmem %s472_s16, 128 }
  0xff   :  { %p6302_p5 = scmp.ne.s32.totalorder %s472_s16, %s6301_s18  ;;  %p6306_p6 = scmp.lt.s32.totalorder %s472_s16, %s472_s16 }
 0x100   :  { %p6307_p7 = scmp.lt.s32.totalorder %s6301_s18, %s6301_s18 }
 0x102   :  { %p6308_p8 = por %p6307_p7, %p6306_p6 }
 0x104   :  { %455 = dma.hbm_to_vmem [thread:$0]  %s7367_s29, 128, %s450_s9, [#allocation48], %s6762_s17, %s6762_s17, %s6763_s0  }
 0x105   :  { %p6309_p9 = pnand %p6308_p8, %p6302_p5 }
 0x107   :  { %6312 = shalt.err (!%p6309_p9)
}
 0x108   :  { %s7368_s21 = sld [smem:[#allocation95_spill]]  ;;  %s6776_s22 = smov [#allocation2]  }
 0x109   :  { %s124_s23 = sshll.u32 %s6776_s22, 4  ;;  %s6777_s25 = smov [#allocation7]   ;;  %s125_s23 = int_to_ptr.vmem [resolvable:$true] %s124_s23 }
 0x10a   :  { %s146_s26 = sshll.u32 %s6777_s25, 4  ;;  %s6321_s27 = scalar_lea.vmem %s125_s23, 64  ;;  %s147_s26 = int_to_ptr.vmem [resolvable:$true] %s146_s26 }
 0x10b   :  { %p6322_p10 = scmp.ne.s32.totalorder %s125_s23, %s6321_s27  ;;  %p6326_p11 = scmp.lt.s32.totalorder %s125_s23, %s125_s23 }
 0x10c   :  { %p6327_p12 = scmp.lt.s32.totalorder %s6321_s27, %s6321_s27 }
 0x10e   :  { %477 = dma.hbm_to_vmem [thread:$0]  %s7368_s21, 128, %s472_s16, [#allocation51], %s6762_s17, %s6762_s17, %s6763_s0  }
 0x10f   :  { %p6328_p13 = por %p6327_p12, %p6326_p11 }
 0x111   :  { %p6329_p0 = pnand %p6328_p13, %p6322_p10 }
 0x113   :  { %6332 = shalt.err (!%p6329_p0)
}
 0x114   :  { %s7369_s3 = sld [smem:[#allocation72_spill]]  ;;  %s6341_s28 = scalar_lea.vmem %s147_s26, 64 }
 0x115   :  { %p6342_p1 = scmp.ne.s32.totalorder %s147_s26, %s6341_s28  ;;  %p6346_p2 = scmp.lt.s32.totalorder %s147_s26, %s147_s26 }
 0x116   :  { %p6347_p3 = scmp.lt.s32.totalorder %s6341_s28, %s6341_s28 }
 0x118   :  { %p6348_p4 = por %p6347_p3, %p6346_p2 }
 0x11a   :  { %127 = dma.hbm_to_vmem [thread:$0]  %s7369_s3, 64, %s125_s23, [#allocation3]  }
 0x11b   :  { %p6349_p5 = pnand %p6348_p4, %p6342_p1 }
 0x11d   :  { %6352 = shalt.err (!%p6349_p5)
}
 0x11e   :  { %s7370_s1 = sld [smem:[#allocation73_spill]]  ;;  %s6778_s14 = smov [#allocation10]  }
 0x11f   :  { %s168_s2 = sshll.u32 %s6778_s14, 4  ;;  %s6779_s6 = smov [#allocation13]   ;;  %s169_s2 = int_to_ptr.vmem [resolvable:$true] %s168_s2 }
 0x120   :  { %s190_s4 = sshll.u32 %s6779_s6, 4  ;;  %s6361_s7 = scalar_lea.vmem %s169_s2, 64  ;;  %s191_s4 = int_to_ptr.vmem [resolvable:$true] %s190_s4 }
 0x121   :  { %p6362_p6 = scmp.ne.s32.totalorder %s169_s2, %s6361_s7  ;;  %p6366_p7 = scmp.lt.s32.totalorder %s169_s2, %s169_s2 }
 0x122   :  { %p6367_p8 = scmp.lt.s32.totalorder %s6361_s7, %s6361_s7 }
 0x124   :  { %149 = dma.hbm_to_vmem [thread:$0]  %s7370_s1, 64, %s147_s26, [#allocation6]  }
 0x125   :  { %p6368_p9 = por %p6367_p8, %p6366_p7 }
 0x127   :  { %p6369_p10 = pnand %p6368_p9, %p6362_p6 }
 0x129   :  { %6372 = shalt.err (!%p6369_p10)
}
 0x12a   :  { %s7371_s10 = sld [smem:[#allocation74_spill]]  ;;  %s6381_s11 = scalar_lea.vmem %s191_s4, 64 }
 0x12b   :  { %p6382_p11 = scmp.ne.s32.totalorder %s191_s4, %s6381_s11  ;;  %p6386_p12 = scmp.lt.s32.totalorder %s191_s4, %s191_s4 }
 0x12c   :  { %p6387_p13 = scmp.lt.s32.totalorder %s6381_s11, %s6381_s11 }
 0x12e   :  { %p6388_p0 = por %p6387_p13, %p6386_p12 }
 0x130   :  { %171 = dma.hbm_to_vmem [thread:$0]  %s7371_s10, 64, %s169_s2, [#allocation9]  }
 0x131   :  { %p6389_p1 = pnand %p6388_p0, %p6382_p11 }
 0x133   :  { %6392 = shalt.err (!%p6389_p1)
}
 0x134   :  { %s7372_s15 = sld [smem:[#allocation75_spill]]  ;;  %s6780_s8 = smov [#allocation16]  }
 0x135   :  { %s216_s19 = sshll.u32 %s6780_s8, 4  ;;  %s6781_s9 = smov [#allocation19]   ;;  %s217_s19 = int_to_ptr.vmem [resolvable:$true] %s216_s19 }
 0x136   :  { %s238_s24 = sshll.u32 %s6781_s9, 4  ;;  %s6401_s16 = scalar_lea.vmem %s217_s19, 16  ;;  %s239_s24 = int_to_ptr.vmem [resolvable:$true] %s238_s24 }
 0x137   :  { %p6402_p2 = scmp.ne.s32.totalorder %s217_s19, %s6401_s16  ;;  %s6405_s12 = scalar_lea.vmem %s217_s19, 32 }
 0x138   :  { %p6406_p3 = scmp.lt.s32.totalorder %s217_s19, %s217_s19  ;;  %p6407_p4 = scmp.lt.s32.totalorder %s6405_s12, %s6401_s16 }
 0x13a   :  { %193 = dma.hbm_to_vmem [thread:$0]  %s7372_s15, 64, %s191_s4, [#allocation12]  }
 0x13b   :  { %p6408_p5 = por %p6407_p4, %p6406_p3 }
 0x13d   :  { %p6409_p6 = pnand %p6408_p5, %p6402_p2 }
 0x13f   :  { %6412 = shalt.err (!%p6409_p6)
}
 0x140   :  { %s7373_s29 = sld [smem:[#allocation78_spill]]  ;;  %s6421_s18 = scalar_lea.vmem %s239_s24, 16 }
 0x141   :  { %p6422_p7 = scmp.ne.s32.totalorder %s239_s24, %s6421_s18  ;;  %s6425_s21 = scalar_lea.vmem %s239_s24, 32 }
 0x142   :  { %p6426_p8 = scmp.lt.s32.totalorder %s239_s24, %s239_s24  ;;  %p6427_p9 = scmp.lt.s32.totalorder %s6425_s21, %s6421_s18 }
 0x144   :  { %p6428_p10 = por %p6427_p9, %p6426_p8 }
 0x146   :  { %219 = dma.hbm_to_vmem [thread:$0]  %s7373_s29, 16, %s217_s19, [#allocation15]  }
 0x147   :  { %p6429_p11 = pnand %p6428_p10, %p6422_p7 }
 0x149   :  { %6432 = shalt.err (!%p6429_p11)
}
 0x14a   :  { %s7374_s22 = sld [smem:[#allocation79_spill]]  ;;  %s6782_s23 = smov [#allocation22]  }
 0x14b   :  { %s259_s25 = sshll.u32 %s6782_s23, 4  ;;  %s6783_s26 = smov [#allocation25]   ;;  %s260_s25 = int_to_ptr.vmem [resolvable:$true] %s259_s25 }
 0x14c   :  { %s284_s27 = sshll.u32 %s6783_s26, 4  ;;  %s6441_s3 = scalar_lea.vmem %s260_s25, 512  ;;  %s285_s27 = int_to_ptr.vmem [resolvable:$true] %s284_s27 }
 0x14d   :  { %p6442_p12 = scmp.ne.s32.totalorder %s260_s25, %s6441_s3  ;;  %p6446_p13 = scmp.lt.s32.totalorder %s260_s25, %s260_s25 }
 0x14e   :  { %p6447_p0 = scmp.lt.s32.totalorder %s6441_s3, %s6441_s3 }
 0x150   :  { %241 = dma.hbm_to_vmem [thread:$0]  %s7374_s22, 16, %s239_s24, [#allocation18]  }
 0x151   :  { %p6448_p1 = por %p6447_p0, %p6446_p13 }
 0x153   :  { %p6449_p2 = pnand %p6448_p1, %p6442_p12 }
 0x155   :  { %6452 = shalt.err (!%p6449_p2)
}
 0x156   :  { %s7375_s28 = sld [smem:[#allocation81_spill]]  ;;  %s6461_s1 = scalar_lea.vmem %s285_s27, 16 }
 0x157   :  { %p6462_p3 = scmp.ne.s32.totalorder %s285_s27, %s6461_s1  ;;  %s6465_s14 = scalar_lea.vmem %s285_s27, 32 }
 0x158   :  { %p6466_p4 = scmp.lt.s32.totalorder %s285_s27, %s285_s27  ;;  %p6467_p5 = scmp.lt.s32.totalorder %s6465_s14, %s6461_s1 }
 0x15a   :  { %p6468_p6 = por %p6467_p5, %p6466_p4 }
 0x15c   :  { %265 = dma.hbm_to_vmem [thread:$0]  %s7375_s28, 512, %s260_s25, [#allocation21], %s6762_s17, %s6762_s17, %s6763_s0  }
 0x15d   :  { %p6469_p7 = pnand %p6468_p6, %p6462_p3 }
 0x15f   :  { %6472 = shalt.err (!%p6469_p7)
}
 0x160   :  { %s7376_s2 = sld [smem:[#allocation83_spill]]  ;;  %s6784_s6 = smov [#allocation28]  }
 0x161   :  { %s305_s4 = sshll.u32 %s6784_s6, 4  ;;  %s6785_s7 = smov [#allocation31]   ;;  %s306_s4 = int_to_ptr.vmem [resolvable:$true] %s305_s4 }
 0x162   :  { %s330_s10 = sshll.u32 %s6785_s7, 4  ;;  %s6481_s11 = scalar_lea.vmem %s306_s4, 128  ;;  %s331_s10 = int_to_ptr.vmem [resolvable:$true] %s330_s10 }
 0x163   :  { %p6482_p8 = scmp.ne.s32.totalorder %s306_s4, %s6481_s11  ;;  %p6486_p9 = scmp.lt.s32.totalorder %s306_s4, %s306_s4 }
 0x164   :  { %p6487_p10 = scmp.lt.s32.totalorder %s6481_s11, %s6481_s11 }
 0x166   :  { %287 = dma.hbm_to_vmem [thread:$0]  %s7376_s2, 16, %s285_s27, [#allocation24]  }
 0x167   :  { %p6488_p11 = por %p6487_p10, %p6486_p9 }
 0x169   :  { %p6489_p12 = pnand %p6488_p11, %p6482_p8 }
 0x16b   :  { %6492 = shalt.err (!%p6489_p12)
}
 0x16c   :  { %s7377_s15 = sld [smem:[#allocation85_spill]]  ;;  %s6501_s8 = scalar_lea.vmem %s331_s10, 16 }
 0x16d   :  { %p6502_p13 = scmp.ne.s32.totalorder %s331_s10, %s6501_s8  ;;  %s6505_s19 = scalar_lea.vmem %s331_s10, 32 }
 0x16e   :  { %p6506_p0 = scmp.lt.s32.totalorder %s331_s10, %s331_s10  ;;  %p6507_p1 = scmp.lt.s32.totalorder %s6505_s19, %s6501_s8 }
 0x170   :  { %p6508_p2 = por %p6507_p1, %p6506_p0 }
 0x172   :  { %311 = dma.hbm_to_vmem [thread:$0]  %s7377_s15, 128, %s306_s4, [#allocation27], %s6762_s17, %s6762_s17, %s6763_s0  }
 0x173   :  { %p6509_p3 = pnand %p6508_p2, %p6502_p13 }
 0x175   :  { %6512 = shalt.err (!%p6509_p3)
}
 0x176   :  { %s7378_s9 = sld [smem:[#allocation87_spill]]  ;;  %s6786_s24 = smov [#allocation34]  }
 0x177   :  { %s352_s16 = sshll.u32 %s6786_s24, 4  ;;  %s6787_s12 = smov [#allocation37]   ;;  %s353_s16 = int_to_ptr.vmem [resolvable:$true] %s352_s16 }
 0x178   :  { %s374_s29 = sshll.u32 %s6787_s12, 4  ;;  %s6521_s18 = scalar_lea.vmem %s353_s16, 16  ;;  %s375_s29 = int_to_ptr.vmem [resolvable:$true] %s374_s29 }
 0x179   :  { %p6522_p4 = scmp.ne.s32.totalorder %s353_s16, %s6521_s18  ;;  %s6525_s21 = scalar_lea.vmem %s353_s16, 32 }
 0x17a   :  { %p6526_p5 = scmp.lt.s32.totalorder %s353_s16, %s353_s16  ;;  %p6527_p6 = scmp.lt.s32.totalorder %s6525_s21, %s6521_s18 }
 0x17c   :  { %333 = dma.hbm_to_vmem [thread:$0]  %s7378_s9, 16, %s331_s10, [#allocation30]  }
 0x17d   :  { %p6528_p7 = por %p6527_p6, %p6526_p5 }
 0x17f   :  { %p6529_p8 = pnand %p6528_p7, %p6522_p4 }
 0x181   :  { %6532 = shalt.err (!%p6529_p8)
}
 0x182   :  { %s7379_s22 = sld [smem:[#allocation88_spill]]  ;;  %s6541_s23 = scalar_lea.vmem %s375_s29, 16 }
 0x183   :  { %p6542_p9 = scmp.ne.s32.totalorder %s375_s29, %s6541_s23  ;;  %s6545_s25 = scalar_lea.vmem %s375_s29, 32 }
 0x184   :  { %p6546_p10 = scmp.lt.s32.totalorder %s375_s29, %s375_s29  ;;  %p6547_p11 = scmp.lt.s32.totalorder %s6545_s25, %s6541_s23 }
 0x186   :  { %p6548_p12 = por %p6547_p11, %p6546_p10 }
 0x188   :  { %355 = dma.hbm_to_vmem [thread:$0]  %s7379_s22, 16, %s353_s16, [#allocation33]  }
 0x189   :  { %p6549_p13 = pnand %p6548_p12, %p6542_p9 }
 0x18b   :  { %6552 = shalt.err (!%p6549_p13)
}
 0x18c   :  { %s7380_s26 = sld [smem:[#allocation89_spill]]  ;;  %s6788_s27 = smov [#allocation40]  }
 0x18d   :  { %s396_s3 = sshll.u32 %s6788_s27, 4  ;;  %s6789_s28 = smov [#allocation43]   ;;  %s397_s3 = int_to_ptr.vmem [resolvable:$true] %s396_s3 }
 0x18e   :  { %s418_s1 = sshll.u32 %s6789_s28, 4  ;;  %s6561_s14 = scalar_lea.vmem %s397_s3, 16  ;;  %s419_s1 = int_to_ptr.vmem [resolvable:$true] %s418_s1 }
 0x18f   :  { %p6562_p0 = scmp.ne.s32.totalorder %s397_s3, %s6561_s14  ;;  %s6565_s2 = scalar_lea.vmem %s397_s3, 32 }
 0x190   :  { %p6566_p1 = scmp.lt.s32.totalorder %s397_s3, %s397_s3  ;;  %p6567_p2 = scmp.lt.s32.totalorder %s6565_s2, %s6561_s14 }
 0x192   :  { %377 = dma.hbm_to_vmem [thread:$0]  %s7380_s26, 16, %s375_s29, [#allocation36]  }
 0x193   :  { %p6568_p3 = por %p6567_p2, %p6566_p1 }
 0x195   :  { %p6569_p4 = pnand %p6568_p3, %p6562_p0 }
 0x197   :  { %6572 = shalt.err (!%p6569_p4)
}
 0x198   :  { %s7381_s6 = sld [smem:[#allocation90_spill]]  ;;  %s6581_s4 = scalar_lea.vmem %s419_s1, 16 }
 0x199   :  { %p6582_p5 = scmp.ne.s32.totalorder %s419_s1, %s6581_s4  ;;  %s6585_s7 = scalar_lea.vmem %s419_s1, 32 }
 0x19a   :  { %p6586_p6 = scmp.lt.s32.totalorder %s419_s1, %s419_s1  ;;  %p6587_p7 = scmp.lt.s32.totalorder %s6585_s7, %s6581_s4 }
 0x19c   :  { %p6588_p8 = por %p6587_p7, %p6586_p6 }
 0x19e   :  { %399 = dma.hbm_to_vmem [thread:$0]  %s7381_s6, 16, %s397_s3, [#allocation39]  }
 0x19f   :  { %p6589_p9 = pnand %p6588_p8, %p6582_p5 }
 0x1a1   :  { %6592 = shalt.err (!%p6589_p9)
}
 0x1a2   :  { %s7382_s10 = sld [smem:[#allocation91_spill]]  ;;  %s6790_s11 = smov [#allocation46]  }
 0x1a3   :  { %s440_s15 = sshll.u32 %s6790_s11, 4  ;;  %s6791_s8 = smov [#allocation49]   ;;  %s441_s15 = int_to_ptr.vmem [resolvable:$true] %s440_s15 }
 0x1a4   :  { %s462_s19 = sshll.u32 %s6791_s8, 4  ;;  %s6601_s9 = scalar_lea.vmem %s441_s15, 16  ;;  %s463_s19 = int_to_ptr.vmem [resolvable:$true] %s462_s19 }
 0x1a5   :  { %p6602_p10 = scmp.ne.s32.totalorder %s441_s15, %s6601_s9  ;;  %s6605_s24 = scalar_lea.vmem %s441_s15, 32 }
 0x1a6   :  { %p6606_p11 = scmp.lt.s32.totalorder %s441_s15, %s441_s15  ;;  %p6607_p12 = scmp.lt.s32.totalorder %s6605_s24, %s6601_s9 }
 0x1a8   :  { %421 = dma.hbm_to_vmem [thread:$0]  %s7382_s10, 16, %s419_s1, [#allocation42]  }
 0x1a9   :  { %p6608_p13 = por %p6607_p12, %p6606_p11 }
 0x1ab   :  { %p6609_p0 = pnand %p6608_p13, %p6602_p10 }
 0x1ad   :  { %6612 = shalt.err (!%p6609_p0)
}
 0x1ae   :  { %s7383_s16 = sld [smem:[#allocation92_spill]]  ;;  %s6621_s12 = scalar_lea.vmem %s463_s19, 16 }
 0x1af   :  { %p6622_p1 = scmp.ne.s32.totalorder %s463_s19, %s6621_s12  ;;  %s6625_s29 = scalar_lea.vmem %s463_s19, 32 }
 0x1b0   :  { %p6626_p2 = scmp.lt.s32.totalorder %s463_s19, %s463_s19  ;;  %p6627_p3 = scmp.lt.s32.totalorder %s6625_s29, %s6621_s12 }
 0x1b2   :  { %p6628_p4 = por %p6627_p3, %p6626_p2 }
 0x1b4   :  { %443 = dma.hbm_to_vmem [thread:$0]  %s7383_s16, 16, %s441_s15, [#allocation45]  }
 0x1b5   :  { %p6629_p5 = pnand %p6628_p4, %p6622_p1 }
 0x1b7   :  { %6632 = shalt.err (!%p6629_p5)
}
 0x1b8   :  { %s7384_s18 = sld [smem:[#allocation94_spill]]  ;;  %s6792_s21 = smov [#allocation52]  }
 0x1b9   :  { %s489_s22 = sshll.u32 %s6792_s21, 4  ;;  %s490_s22 = int_to_ptr.vmem [resolvable:$true] %s489_s22 }
 0x1ba   :  { %s6641_s23 = scalar_lea.vmem %s490_s22, 128  ;;  %p6646_p7 = scmp.lt.s32.totalorder %s490_s22, %s490_s22 }
 0x1bb   :  { %p6642_p6 = scmp.ne.s32.totalorder %s490_s22, %s6641_s23  ;;  %p6647_p8 = scmp.lt.s32.totalorder %s6641_s23, %s6641_s23 }
 0x1bd   :  { %p6648_p9 = por %p6647_p8, %p6646_p7 }
 0x1be   :  { %465 = dma.hbm_to_vmem [thread:$0]  %s7384_s18, 16, %s463_s19, [#allocation48]  }
 0x1bf   :  { %p6649_p10 = pnand %p6648_p9, %p6642_p6 }
 0x1c1   :  { %6652 = shalt.err (!%p6649_p10)
}
 0x1c2   :  { %s7385_s25 = sld [smem:[#allocation99_spill]] }
 0x1c8   :  { %495 = dma.hbm_to_vmem [thread:$0]  %s7385_s25, 128, %s490_s22, [#allocation51], %s6762_s17, %s6762_s17, %s6763_s0  }
 0x1c9   :  { %6673 = dma.done.wait [#allocation3], 64  }
 0x1ca   :  { %6674 = vsyncadd [#allocation3], 4294967232 }
 0x1cb   :  { %6675 = dma.done.wait [#allocation6], 8256  }
 0x1cc   :  { %6676 = vsyncadd [#allocation6], 4294959040 }
 0x1cd   :  { %6677 = dma.done.wait [#allocation9], 16448  }
 0x1ce   :  { %6678 = vsyncadd [#allocation9], 4294950848 }
 0x1cf   :  { %6679 = dma.done.wait [#allocation12], 8256  }
 0x1d0   :  { %6680 = vsyncadd [#allocation12], 4294959040 }
 0x1d1   :  { %6681 = dma.done.wait [#allocation15], 1040  }
 0x1d2   :  { %6682 = vsyncadd [#allocation15], 4294966256 }
 0x1d3   :  { %6683 = dma.done.wait [#allocation18], 4112  }
 0x1d4   :  { %6684 = vsyncadd [#allocation18], 4294963184 }
 0x1d5   :  { %6685 = dma.done.wait [#allocation21], 528  }
 0x1d6   :  { %6686 = vsyncadd [#allocation21], 4294966768 }
 0x1d7   :  { %6687 = dma.done.wait [#allocation24], 32  }
 0x1d8   :  { %6688 = vsyncadd [#allocation24], 4294967264 }
 0x1d9   :  { %6689 = dma.done.wait [#allocation27], 144  }
 0x1da   :  { %6690 = vsyncadd [#allocation27], 4294967152 }
 0x1db   :  { %6691 = dma.done.wait [#allocation30], 32  }
 0x1dc   :  { %6692 = vsyncadd [#allocation30], 4294967264 }
 0x1dd   :  { %6693 = dma.done.wait [#allocation33], 144  }
 0x1de   :  { %6694 = vsyncadd [#allocation33], 4294967152 }
 0x1df   :  { %6695 = dma.done.wait [#allocation36], 144  }
 0x1e0   :  { %6696 = vsyncadd [#allocation36], 4294967152 }
 0x1e1   :  { %6697 = dma.done.wait [#allocation39], 144  }
 0x1e2   :  { %6698 = vsyncadd [#allocation39], 4294967152 }
 0x1e3   :  { %6699 = dma.done.wait [#allocation42], 144  }
 0x1e4   :  { %6700 = vsyncadd [#allocation42], 4294967152 }
 0x1e5   :  { %6701 = dma.done.wait [#allocation45], 144  }
 0x1e6   :  { %6702 = vsyncadd [#allocation45], 4294967152 }
 0x1e7   :  { %6703 = dma.done.wait [#allocation48], 144  }
 0x1e8   :  { %6704 = vsyncadd [#allocation48], 4294967152 }
 0x1e9   :  { %6705 = dma.done.wait [#allocation51], 256  }
 0x1ea   :  { %6706 = vsyncadd [#allocation51], 4294967040  ;;  %v5490_v0 = vld [vmem:[#allocation5 + $0xe4] ss:$16 sps:$4 sm:$0xff]   ;;  %v5492_v1 = vld [vmem:[#allocation5 + $0xec] ss:$16 sps:$4 sm:$0xff]  }
 0x1eb   :  { %1026 = vmatprep.subr.bf16.mxu0 %v5490_v0  ;;  %v5494_v2 = vld [vmem:[#allocation5 + $0xe0] ss:$16 sps:$4 sm:$0xff]   ;;  %v5495_v3 = vld [vmem:[#allocation5 + $0xe8] ss:$16 sps:$4 sm:$0xff]   ;;  %1067 = vmatprep.subr.bf16.mxu1 %v5492_v1  ;;  %v5496_v4 = vld [vmem:[#allocation5 + $0xc4] ss:$16 sps:$4 sm:$0xff]  }
 0x1ec   :  { %1027 = vmatpush1.bf16.msra.mxu0 %v5494_v2  ;;  %1068 = vmatpush1.bf16.msra.mxu1 %v5495_v3  ;;  %v5498_v5 = vld [vmem:[#allocation5 + $0xcc] ss:$16 sps:$4 sm:$0xff]   ;;  %v5500_v6 = vld [vmem:[#allocation5 + $0xc0] ss:$16 sps:$4 sm:$0xff]   ;;  %v5501_v7 = vld [vmem:[#allocation5 + $0xc8] ss:$16 sps:$4 sm:$0xff]  }
 0x1ed   :  { %1028 = vmatprep.subr.bf16.mxu0 %v5496_v4  ;;  %1069 = vmatprep.subr.bf16.mxu1 %v5498_v5  ;;  %v5502_v8 = vld [vmem:[#allocation5 + $0xa4] ss:$16 sps:$4 sm:$0xff]   ;;  %v5504_v9 = vld [vmem:[#allocation5 + $0xac] ss:$16 sps:$4 sm:$0xff]   ;;  %v5506_v10 = vld [vmem:[#allocation5 + $0xa0] ss:$16 sps:$4 sm:$0xff]  }
 0x1ee   :  { %v5507_v11 = vld [vmem:[#allocation5 + $0xa8] ss:$16 sps:$4 sm:$0xff]   ;;  %v5508_v12 = vld [vmem:[#allocation5 + $0x84] ss:$16 sps:$4 sm:$0xff]   ;;  %v5510_v13 = vld [vmem:[#allocation5 + $0x8c] ss:$16 sps:$4 sm:$0xff]  }
 0x1ef   :  { %v5512_v14 = vld [vmem:[#allocation5 + $0x80] ss:$16 sps:$4 sm:$0xff]   ;;  %v5513_v15 = vld [vmem:[#allocation5 + $0x88] ss:$16 sps:$4 sm:$0xff]   ;;  %v5514_v16 = vld [vmem:[#allocation5 + $0x64] ss:$16 sps:$4 sm:$0xff]  }
 0x1f0   :  { %1029 = vmatpush1.bf16.msra.mxu0 %v5500_v6  ;;  %1070 = vmatpush1.bf16.msra.mxu1 %v5501_v7  ;;  %v5516_v17 = vld [vmem:[#allocation5 + $0x6c] ss:$16 sps:$4 sm:$0xff]   ;;  %v5518_v18 = vld [vmem:[#allocation5 + $0x60] ss:$16 sps:$4 sm:$0xff]   ;;  %v5519_v19 = vld [vmem:[#allocation5 + $0x68] ss:$16 sps:$4 sm:$0xff]  }
 0x1f1   :  { %1030 = vmatprep.subr.bf16.mxu0 %v5502_v8  ;;  %1071 = vmatprep.subr.bf16.mxu1 %v5504_v9  ;;  %v5520_v20 = vld [vmem:[#allocation5 + $0x44] ss:$16 sps:$4 sm:$0xff]   ;;  %v5522_v21 = vld [vmem:[#allocation5 + $0x4c] ss:$16 sps:$4 sm:$0xff]   ;;  %v5524_v22 = vld [vmem:[#allocation5 + $0x40] ss:$16 sps:$4 sm:$0xff]  }
 0x1f2   :  { %v5525_v23 = vld [vmem:[#allocation5 + $0x48] ss:$16 sps:$4 sm:$0xff]   ;;  %v5526_v24 = vld [vmem:[#allocation5 + $0x24] ss:$16 sps:$4 sm:$0xff]   ;;  %v5528_v25 = vld [vmem:[#allocation5 + $0x2c] ss:$16 sps:$4 sm:$0xff]  }
 0x1f3   :  { %v5530_v26 = vld [vmem:[#allocation5 + $0x20] ss:$16 sps:$4 sm:$0xff]   ;;  %v5531_v27 = vld [vmem:[#allocation5 + $0x28] ss:$16 sps:$4 sm:$0xff]   ;;  %v5532_v28 = vld [vmem:[#allocation5 + $0x4] ss:$16 sps:$4 sm:$0xff]  }
 0x1f4   :  { %1031 = vmatpush1.bf16.msra.mxu0 %v5506_v10  ;;  %1072 = vmatpush1.bf16.msra.mxu1 %v5507_v11  ;;  %v5534_v29 = vld [vmem:[#allocation5 + $0xc] ss:$16 sps:$4 sm:$0xff]   ;;  %v5536_v30 = vld [vmem:[#allocation5] ss:$16 sps:$4 sm:$0xff]   ;;  %v5537_v31 = vld [vmem:[#allocation5 + $0x8] ss:$16 sps:$4 sm:$0xff]  }
 0x1f5   :  { %1032 = vmatprep.subr.bf16.mxu0 %v5508_v12  ;;  %1073 = vmatprep.subr.bf16.mxu1 %v5510_v13  ;;  %v5538_v32 = vld [vmem:[#allocation5 + $0x1e4] ss:$16 sps:$4 sm:$0xff]   ;;  %v5540_v33 = vld [vmem:[#allocation5 + $0x1ec] ss:$16 sps:$4 sm:$0xff]   ;;  %v5542_v34 = vld [vmem:[#allocation5 + $0x1e0] ss:$16 sps:$4 sm:$0xff]  }
 0x1f6   :  { %v5543_v35 = vld [vmem:[#allocation5 + $0x1e8] ss:$16 sps:$4 sm:$0xff]   ;;  %v5544_v36 = vld [vmem:[#allocation5 + $0x1c4] ss:$16 sps:$4 sm:$0xff]   ;;  %v5546_v37 = vld [vmem:[#allocation5 + $0x1cc] ss:$16 sps:$4 sm:$0xff]  }
 0x1f7   :  { %v5548_v38 = vld [vmem:[#allocation5 + $0x1c0] ss:$16 sps:$4 sm:$0xff]   ;;  %v5549_v39 = vld [vmem:[#allocation5 + $0x1c8] ss:$16 sps:$4 sm:$0xff]   ;;  %v5550_v40 = vld [vmem:[#allocation5 + $0x1a4] ss:$16 sps:$4 sm:$0xff]  }
 0x1f8   :  { %1033 = vmatpush1.bf16.msra.mxu0 %v5512_v14  ;;  %1074 = vmatpush1.bf16.msra.mxu1 %v5513_v15  ;;  %v5552_v41 = vld [vmem:[#allocation5 + $0x1ac] ss:$16 sps:$4 sm:$0xff]   ;;  %v5554_v42 = vld [vmem:[#allocation5 + $0x1a0] ss:$16 sps:$4 sm:$0xff]   ;;  %v5555_v43 = vld [vmem:[#allocation5 + $0x1a8] ss:$16 sps:$4 sm:$0xff]  }
 0x1f9   :  { %1034 = vmatprep.subr.bf16.mxu0 %v5514_v16  ;;  %1075 = vmatprep.subr.bf16.mxu1 %v5516_v17  ;;  %v5556_v44 = vld [vmem:[#allocation5 + $0x184] ss:$16 sps:$4 sm:$0xff]   ;;  %v5558_v45 = vld [vmem:[#allocation5 + $0x18c] ss:$16 sps:$4 sm:$0xff]   ;;  %v5560_v47 = vld [vmem:[#allocation5 + $0x180] ss:$16 sps:$4 sm:$0xff]  }
 0x1fa   :  { %v4664_v46 = vld.sshfl [vmem:[#allocation2] sm:$0x33 pattern:$0x76325410]  ;;  %v5561_v48 = vld [vmem:[#allocation5 + $0x188] ss:$16 sps:$4 sm:$0xff]  }
 0x1fb   :  { %v615_v49 = vcombine.high %v4664_v46, %v4664_v46  ;;  %v5562_v50 = vld [vmem:[#allocation5 + $0x164] ss:$16 sps:$4 sm:$0xff]   ;;  %v5564_v51 = vld [vmem:[#allocation5 + $0x16c] ss:$16 sps:$4 sm:$0xff]   ;;  %v5566_v53 = vld [vmem:[#allocation5 + $0x160] ss:$16 sps:$4 sm:$0xff]   ;;  %v7114_v5 = vpack.c.bf16 %v4664_v46, %v4664_v46 }
 0x1fc   :  { %1035 = vmatpush1.bf16.msra.mxu0 %v5518_v18  ;;  %1076 = vmatpush1.bf16.msra.mxu1 %v5519_v19  ;;  %v5567_v54 = vld [vmem:[#allocation5 + $0x168] ss:$16 sps:$4 sm:$0xff]   ;;  %v5568_v55 = vld [vmem:[#allocation5 + $0x144] ss:$16 sps:$4 sm:$0xff]   ;;  %v5570_v56 = vld [vmem:[#allocation5 + $0x14c] ss:$16 sps:$4 sm:$0xff]  }
 0x1fd   :  { %1036 = vmatprep.subr.bf16.mxu0 %v5520_v20  ;;  %1077 = vmatprep.subr.bf16.mxu1 %v5522_v21  ;;  %v7110_v52 = vpack.c.bf16 %v615_v49, %v615_v49  ;;  %v5572_v57 = vld [vmem:[#allocation5 + $0x140] ss:$16 sps:$4 sm:$0xff]   ;;  %v5573_v58 = vld [vmem:[#allocation5 + $0x148] ss:$16 sps:$4 sm:$0xff]   ;;  %v5574_v59 = vld [vmem:[#allocation5 + $0x124] ss:$16 sps:$4 sm:$0xff]  }
 0x1fe   :  { %v5576_v60 = vld [vmem:[#allocation5 + $0x12c] ss:$16 sps:$4 sm:$0xff]   ;;  %v5578_v61 = vld [vmem:[#allocation5 + $0x120] ss:$16 sps:$4 sm:$0xff]   ;;  %v5579_v62 = vld [vmem:[#allocation5 + $0x128] ss:$16 sps:$4 sm:$0xff]  }
 0x1ff   :  { %1058 = vmatprep.mubr.bf16.mxu0 %v7110_v52  ;;  %1099 = vmatprep.mubr.bf16.mxu1 %v7110_v52  ;;  %v5580_v63 = vld [vmem:[#allocation5 + $0x104] ss:$16 sps:$4 sm:$0xff]   ;;  %v5582_v0 = vld [vmem:[#allocation5 + $0x10c] ss:$16 sps:$4 sm:$0xff]   ;;  %v5584_v1 = vld [vmem:[#allocation5 + $0x100] ss:$16 sps:$4 sm:$0xff]  }
 0x200   :  { %1037 = vmatpush1.bf16.msra.mxu0 %v5524_v22  ;;  %1078 = vmatpush1.bf16.msra.mxu1 %v5525_v23  ;;  %v5585_v2 = vld [vmem:[#allocation5 + $0x108] ss:$16 sps:$4 sm:$0xff]   ;;  %v5586_v6 = vld [vmem:[#allocation8 + $0xe0] ss:$16 sps:$4 sm:$0xff]   ;;  %s7386_s17 = sld [smem:[#allocation76_spill]]  ;;  %vm6794_vm0 = vmmov 0  }
 0x201   :  { %1038 = vmatprep.subr.bf16.mxu0 %v5526_v24  ;;  %1079 = vmatprep.subr.bf16.mxu1 %v5528_v25  ;;  %v5588_v3 = vld [vmem:[#allocation8 + $0xe4] ss:$16 sps:$4 sm:$0xff]   ;;  %v5589_v7 = vld [vmem:[#allocation8 + $0x2e0] ss:$16 sps:$4 sm:$0xff]   ;;  %s7387_s0 = sld [smem:[#allocation77_spill]]  ;;  %vm3524_vm1 = vcmask 523264  }
 0x202   :  { %v5591_v4 = vld [vmem:[#allocation8 + $0x2e4] ss:$16 sps:$4 sm:$0xff]   ;;  %v5592_v10 = vld [vmem:[#allocation8 + $0xc0] ss:$16 sps:$4 sm:$0xff]   ;;  %s7388_s26 = sld [smem:[#allocation80_spill]]  ;;  %vm3781_vm2 = vcmask 130048  }
 0x203   :  { %v5594_v8 = vld [vmem:[#allocation8 + $0xc4] ss:$16 sps:$4 sm:$0xff]   ;;  %v5595_v11 = vld [vmem:[#allocation8 + $0x2c0] ss:$16 sps:$4 sm:$0xff]   ;;  %s7389_s27 = sld [smem:[#allocation82_spill]]  ;;  %vm4342_vm3 = vcmask 261120  }
 0x204   :  { %1039 = vmatpush1.bf16.msra.mxu0 %v5530_v26  ;;  %1080 = vmatpush1.bf16.msra.mxu1 %v5531_v27  ;;  %v5597_v9 = vld [vmem:[#allocation8 + $0x2c4] ss:$16 sps:$4 sm:$0xff]   ;;  %v5598_v14 = vld [vmem:[#allocation8 + $0xa0] ss:$16 sps:$4 sm:$0xff]   ;;  %s7390_s3 = sld [smem:[#allocation86_spill]]  ;;  %vm4584_vm4 = vcmask 74752  }
 0x205   :  { %1040 = vmatprep.subr.bf16.mxu0 %v5532_v28  ;;  %1081 = vmatprep.subr.bf16.mxu1 %v5534_v29  ;;  %v5600_v12 = vld [vmem:[#allocation8 + $0xa4] ss:$16 sps:$4 sm:$0xff]   ;;  %v5601_v15 = vld [vmem:[#allocation8 + $0x2a0] ss:$16 sps:$4 sm:$0xff]   ;;  %s7391_s28 = sld [smem:[#allocation84_spill]] }
 0x206   :  { %v5603_v13 = vld [vmem:[#allocation8 + $0x2a4] ss:$16 sps:$4 sm:$0xff]   ;;  %v5604_v18 = vld [vmem:[#allocation8 + $0x80] ss:$16 sps:$4 sm:$0xff]   ;;  %s7392_s1 = sld [smem:[#allocation97_spill]] }
 0x207   :  { %v5606_v16 = vld [vmem:[#allocation8 + $0x84] ss:$16 sps:$4 sm:$0xff]   ;;  %v5607_v19 = vld [vmem:[#allocation8 + $0x280] ss:$16 sps:$4 sm:$0xff]   ;;  %s7393_s14 = sld [smem:[#allocation96_spill]] }
 0x208   :  { %1041 = vmatpush1.bf16.msra.mxu0 %v5536_v30  ;;  %1082 = vmatpush1.bf16.msra.mxu1 %v5537_v31  ;;  %v5609_v17 = vld [vmem:[#allocation8 + $0x284] ss:$16 sps:$4 sm:$0xff]   ;;  %v5610_v22 = vld [vmem:[#allocation8 + $0x60] ss:$16 sps:$4 sm:$0xff]   ;;  %s7394_s2 = sld [smem:[#allocation101_spill]] }
 0x209   :  { %1042 = vmatprep.subr.bf16.mxu0 %v5538_v32  ;;  %1083 = vmatprep.subr.bf16.mxu1 %v5540_v33  ;;  %v5612_v20 = vld [vmem:[#allocation8 + $0x64] ss:$16 sps:$4 sm:$0xff]   ;;  %v5613_v23 = vld [vmem:[#allocation8 + $0x260] ss:$16 sps:$4 sm:$0xff]   ;;  %s7395_s6 = sld [smem:[#allocation100_spill]] }
 0x20a   :  { %v5615_v21 = vld [vmem:[#allocation8 + $0x264] ss:$16 sps:$4 sm:$0xff]   ;;  %v5616_v26 = vld [vmem:[#allocation8 + $0x40] ss:$16 sps:$4 sm:$0xff]   ;;  %s7396_s4 = sld [smem:[#allocation98_spill]] }
 0x20b   :  { %v5618_v24 = vld [vmem:[#allocation8 + $0x44] ss:$16 sps:$4 sm:$0xff]   ;;  %v5619_v27 = vld [vmem:[#allocation8 + $0x240] ss:$16 sps:$4 sm:$0xff]  }
 0x20c   :  { %1043 = vmatpush2.bf16.msra.mxu0 %v5542_v34  ;;  %1084 = vmatpush2.bf16.msra.mxu1 %v5543_v35  ;;  %v5621_v25 = vld [vmem:[#allocation8 + $0x244] ss:$16 sps:$4 sm:$0xff]   ;;  %v5622_v30 = vld [vmem:[#allocation8 + $0x20] ss:$16 sps:$4 sm:$0xff]  }
 0x20d   :  { %1044 = vmatprep.subr.bf16.mxu0 %v5544_v36  ;;  %1085 = vmatprep.subr.bf16.mxu1 %v5546_v37  ;;  %v5624_v28 = vld [vmem:[#allocation8 + $0x24] ss:$16 sps:$4 sm:$0xff]   ;;  %v5625_v31 = vld [vmem:[#allocation8 + $0x220] ss:$16 sps:$4 sm:$0xff]  }
 0x20e   :  { %v5627_v29 = vld [vmem:[#allocation8 + $0x224] ss:$16 sps:$4 sm:$0xff]   ;;  %v5628_v34 = vld [vmem:[#allocation8] ss:$16 sps:$4 sm:$0xff]  }
 0x20f   :  { %v5630_v32 = vld [vmem:[#allocation8 + $0x4] ss:$16 sps:$4 sm:$0xff]   ;;  %v5631_v35 = vld [vmem:[#allocation8 + $0x200] ss:$16 sps:$4 sm:$0xff]  }
 0x210   :  { %1045 = vmatpush2.bf16.msra.mxu0 %v5548_v38  ;;  %1086 = vmatpush2.bf16.msra.mxu1 %v5549_v39  ;;  %v5633_v33 = vld [vmem:[#allocation8 + $0x204] ss:$16 sps:$4 sm:$0xff]   ;;  %v5634_v38 = vld [vmem:[#allocation8 + $0x1e0] ss:$16 sps:$4 sm:$0xff]  }
 0x211   :  { %1046 = vmatprep.subr.bf16.mxu0 %v5550_v40  ;;  %1087 = vmatprep.subr.bf16.mxu1 %v5552_v41  ;;  %v5636_v36 = vld [vmem:[#allocation8 + $0x1e4] ss:$16 sps:$4 sm:$0xff]   ;;  %v5637_v39 = vld [vmem:[#allocation8 + $0x3e0] ss:$16 sps:$4 sm:$0xff]  }
 0x212   :  { %v5639_v37 = vld [vmem:[#allocation8 + $0x3e4] ss:$16 sps:$4 sm:$0xff]   ;;  %v5646_v46 = vld [vmem:[#allocation8 + $0x1a0] ss:$16 sps:$4 sm:$0xff]  }
 0x213   :  { %v5642_v40 = vld [vmem:[#allocation8 + $0x1c4] ss:$16 sps:$4 sm:$0xff]  }
 0x214   :  { %1047 = vmatpush2.bf16.msra.mxu0 %v5554_v42  ;;  %1088 = vmatpush2.bf16.msra.mxu1 %v5555_v43  ;;  %v5645_v41 = vld [vmem:[#allocation8 + $0x3c4] ss:$16 sps:$4 sm:$0xff]   ;;  %v5640_v42 = vld [vmem:[#allocation8 + $0x1c0] ss:$16 sps:$4 sm:$0xff]  }
 0x215   :  { %1048 = vmatprep.subr.bf16.mxu0 %v5556_v44  ;;  %1089 = vmatprep.subr.bf16.mxu1 %v5558_v45  ;;  %v5643_v43 = vld [vmem:[#allocation8 + $0x3c0] ss:$16 sps:$4 sm:$0xff]   ;;  %v5648_v44 = vld [vmem:[#allocation8 + $0x1a4] ss:$16 sps:$4 sm:$0xff]  }
 0x216   :  { %v5651_v45 = vld [vmem:[#allocation8 + $0x3a4] ss:$16 sps:$4 sm:$0xff]  }
 0x217   :  { %v5657_v49 = vld [vmem:[#allocation8 + $0x384] ss:$16 sps:$4 sm:$0xff]  }
 0x218   :  { %1049 = vmatpush2.bf16.msra.mxu0 %v5560_v47  ;;  %1090 = vmatpush2.bf16.msra.mxu1 %v5561_v48  ;;  %v5649_v47 = vld [vmem:[#allocation8 + $0x3a0] ss:$16 sps:$4 sm:$0xff]   ;;  %v5654_v48 = vld [vmem:[#allocation8 + $0x184] ss:$16 sps:$4 sm:$0xff]  }
 0x219   :  { %1050 = vmatprep.subr.bf16.mxu0 %v5562_v50  ;;  %1091 = vmatprep.subr.bf16.mxu1 %v5564_v51  ;;  %v5652_v50 = vld [vmem:[#allocation8 + $0x180] ss:$16 sps:$4 sm:$0xff]  }
 0x21a   :  { %v5655_v51 = vld [vmem:[#allocation8 + $0x380] ss:$16 sps:$4 sm:$0xff]  }
 0x21c   :  { %1051 = vmatpush2.bf16.msra.mxu0 %v5566_v53  ;;  %1092 = vmatpush2.bf16.msra.mxu1 %v5567_v54  ;;  %v5660_v53 = vld [vmem:[#allocation8 + $0x164] ss:$16 sps:$4 sm:$0xff]  }
 0x21d   :  { %1052 = vmatprep.subr.bf16.mxu0 %v5568_v55  ;;  %1093 = vmatprep.subr.bf16.mxu1 %v5570_v56  ;;  %v5663_v54 = vld [vmem:[#allocation8 + $0x364] ss:$16 sps:$4 sm:$0xff]   ;;  %v5658_v55 = vld [vmem:[#allocation8 + $0x160] ss:$16 sps:$4 sm:$0xff]  }
 0x21e   :  { %v5661_v56 = vld [vmem:[#allocation8 + $0x360] ss:$16 sps:$4 sm:$0xff]  }
 0x220   :  { %1053 = vmatpush2.bf16.msra.mxu0 %v5572_v57  ;;  %1094 = vmatpush2.bf16.msra.mxu1 %v5573_v58  ;;  %v5666_v57 = vld [vmem:[#allocation8 + $0x144] ss:$16 sps:$4 sm:$0xff]  }
 0x221   :  { %1054 = vmatprep.subr.bf16.mxu0 %v5574_v59  ;;  %1095 = vmatprep.subr.bf16.mxu1 %v5576_v60  ;;  %v5669_v58 = vld [vmem:[#allocation8 + $0x344] ss:$16 sps:$4 sm:$0xff]   ;;  %v5664_v59 = vld [vmem:[#allocation8 + $0x140] ss:$16 sps:$4 sm:$0xff]  }
 0x222   :  { %v5667_v60 = vld [vmem:[#allocation8 + $0x340] ss:$16 sps:$4 sm:$0xff]  }
 0x224   :  { %1055 = vmatpush2.bf16.msra.mxu0 %v5578_v61  ;;  %1096 = vmatpush2.bf16.msra.mxu1 %v5579_v62  ;;  %v5672_v61 = vld [vmem:[#allocation8 + $0x124] ss:$16 sps:$4 sm:$0xff]  }
 0x225   :  { %1056 = vmatprep.subr.bf16.mxu0 %v5580_v63  ;;  %1097 = vmatprep.subr.bf16.mxu1 %v5582_v0  ;;  %v5675_v62 = vld [vmem:[#allocation8 + $0x324] ss:$16 sps:$4 sm:$0xff]   ;;  %v5670_v63 = vld [vmem:[#allocation8 + $0x120] ss:$16 sps:$4 sm:$0xff]  }
 0x226   :  { %v5673_v0 = vld [vmem:[#allocation8 + $0x320] ss:$16 sps:$4 sm:$0xff]  }
 0x228   :  { %1057 = vmatpush2.bf16.msra.mxu0 %v5584_v1  ;;  %1098 = vmatpush2.bf16.msra.mxu1 %v5585_v2  ;;  %v5678_v1 = vld [vmem:[#allocation8 + $0x104] ss:$16 sps:$4 sm:$0xff]  }
 0x229   :  { %1906 = vmatprep.subr.bf16.mxu0 %v5588_v3  ;;  %1947 = vmatprep.subr.bf16.mxu1 %v5591_v4  ;;  %v5681_v2 = vld [vmem:[#allocation8 + $0x304] ss:$16 sps:$4 sm:$0xff]   ;;  %v5676_v3 = vld [vmem:[#allocation8 + $0x100] ss:$16 sps:$4 sm:$0xff]  }
 0x22a   :  { %v5679_v4 = vld [vmem:[#allocation8 + $0x300] ss:$16 sps:$4 sm:$0xff]  }
 0x22b   :  { %1059 = vmatmul.mubr.bf16.vlgmr.msra.gmra.mxu0 %v7114_v5  ;;  %1100 = vmatmul.mubr.bf16.vlgmr.msra.gmra.mxu1 %v7114_v5 }
 0x22c   :  { %1907 = vmatpush1.bf16.msra.mxu0 %v5586_v6  ;;  %1948 = vmatpush1.bf16.msra.mxu1 %v5589_v7  ;;  %v5684_v6 = vld [vmem:[#allocation8 + $0xec] ss:$16 sps:$4 sm:$0xff]  }
 0x22d   :  { %1908 = vmatprep.subr.bf16.mxu0 %v5594_v8  ;;  %1949 = vmatprep.subr.bf16.mxu1 %v5597_v9  ;;  %v5687_v7 = vld [vmem:[#allocation8 + $0x2ec] ss:$16 sps:$4 sm:$0xff]   ;;  %v686_v8 = vlaneseq }
 0x22f   :  { %v687_v9 = vshrl.u32 %v686_v8, 7  ;;  %v5735_v8 = vld [vmem:[#allocation8 + $0x3ec] ss:$16 sps:$4 sm:$0xff]  }
 0x230   :  { %1909 = vmatpush1.bf16.msra.mxu0 %v5592_v10  ;;  %1950 = vmatpush1.bf16.msra.mxu1 %v5595_v11 }
 0x231   :  { %1910 = vmatprep.subr.bf16.mxu0 %v5600_v12  ;;  %1951 = vmatprep.subr.bf16.mxu1 %v5603_v13  ;;  %v7118_v10 = vsub.s32 0, %v687_v9  ;;  %v7120_v11 = vsub.s32 2, %v687_v9  ;;  %v684_v12 = vld [vmem:[#allocation7] sm:$0xf]  ;;  %v7122_v13 = vsub.s32 1, %v687_v9 }
 0x234   :  { %1911 = vmatpush1.bf16.msra.mxu0 %v5598_v14  ;;  %1952 = vmatpush1.bf16.msra.mxu1 %v5601_v15  ;;  %v7124_v14 = vsub.s32 3, %v687_v9  ;;  %v689_v15 = vrot.slane %v684_v12, %v7118_v10  ;;  %v5730_v9 = vld [vmem:[#allocation8 + $0x1e8] ss:$16 sps:$4 sm:$0xff]  }
 0x235   :  { %1912 = vmatprep.subr.bf16.mxu0 %v5606_v16  ;;  %1953 = vmatprep.subr.bf16.mxu1 %v5609_v17  ;;  %v697_v16 = vrot.slane %v684_v12, %v7120_v11  ;;  %v693_v17 = vrot.slane %v684_v12, %v7122_v13 }
 0x238   :  { %1913 = vmatpush1.bf16.msra.mxu0 %v5604_v18  ;;  %1954 = vmatpush1.bf16.msra.mxu1 %v5607_v19  ;;  %v701_v18 = vrot.slane %v684_v12, %v7124_v14  ;;  %v5733_v12 = vld [vmem:[#allocation8 + $0x3e8] ss:$16 sps:$4 sm:$0xff]  }
 0x239   :  { %1914 = vmatprep.subr.bf16.mxu0 %v5612_v20  ;;  %1955 = vmatprep.subr.bf16.mxu1 %v5615_v21 }
 0x23c   :  { %1915 = vmatpush1.bf16.msra.mxu0 %v5610_v22  ;;  %1956 = vmatpush1.bf16.msra.mxu1 %v5613_v23 }
 0x23d   :  { %1916 = vmatprep.subr.bf16.mxu0 %v5618_v24  ;;  %1957 = vmatprep.subr.bf16.mxu1 %v5621_v25 }
 0x240   :  { %1917 = vmatpush1.bf16.msra.mxu0 %v5616_v26  ;;  %1958 = vmatpush1.bf16.msra.mxu1 %v5619_v27 }
 0x241   :  { %1918 = vmatprep.subr.bf16.mxu0 %v5624_v28  ;;  %1959 = vmatprep.subr.bf16.mxu1 %v5627_v29 }
 0x244   :  { %1919 = vmatpush1.bf16.msra.mxu0 %v5622_v30  ;;  %1960 = vmatpush1.bf16.msra.mxu1 %v5625_v31 }
 0x245   :  { %1920 = vmatprep.subr.bf16.mxu0 %v5630_v32  ;;  %1961 = vmatprep.subr.bf16.mxu1 %v5633_v33 }
 0x248   :  { %1921 = vmatpush1.bf16.msra.mxu0 %v5628_v34  ;;  %1962 = vmatpush1.bf16.msra.mxu1 %v5631_v35 }
 0x249   :  { %1922 = vmatprep.subr.bf16.mxu0 %v5636_v36  ;;  %1963 = vmatprep.subr.bf16.mxu1 %v5639_v37 }
 0x24c   :  { %1923 = vmatpush2.bf16.msra.mxu0 %v5634_v38  ;;  %1964 = vmatpush2.bf16.msra.mxu1 %v5637_v39  ;;  %v5682_v38 = vld [vmem:[#allocation8 + $0xe8] ss:$16 sps:$4 sm:$0xff]  }
 0x24d   :  { %1924 = vmatprep.subr.bf16.mxu0 %v5642_v40  ;;  %1965 = vmatprep.subr.bf16.mxu1 %v5645_v41  ;;  %v5685_v39 = vld [vmem:[#allocation8 + $0x2e8] ss:$16 sps:$4 sm:$0xff]   ;;  %v5690_v41 = vld [vmem:[#allocation8 + $0xcc] ss:$16 sps:$4 sm:$0xff]  }
 0x250   :  { %1925 = vmatpush2.bf16.msra.mxu0 %v5640_v42  ;;  %1966 = vmatpush2.bf16.msra.mxu1 %v5643_v43  ;;  %v5693_v42 = vld [vmem:[#allocation8 + $0x2cc] ss:$16 sps:$4 sm:$0xff]   ;;  %v5688_v43 = vld [vmem:[#allocation8 + $0xc8] ss:$16 sps:$4 sm:$0xff]  }
 0x251   :  { %1926 = vmatprep.subr.bf16.mxu0 %v5648_v44  ;;  %1967 = vmatprep.subr.bf16.mxu1 %v5651_v45  ;;  %v5691_v44 = vld [vmem:[#allocation8 + $0x2c8] ss:$16 sps:$4 sm:$0xff]   ;;  %v5696_v45 = vld [vmem:[#allocation8 + $0xac] ss:$16 sps:$4 sm:$0xff]  }
 0x254   :  { %1927 = vmatpush2.bf16.msra.mxu0 %v5646_v46  ;;  %1968 = vmatpush2.bf16.msra.mxu1 %v5649_v47  ;;  %v5699_v46 = vld [vmem:[#allocation8 + $0x2ac] ss:$16 sps:$4 sm:$0xff]   ;;  %v5694_v47 = vld [vmem:[#allocation8 + $0xa8] ss:$16 sps:$4 sm:$0xff]  }
 0x255   :  { %1928 = vmatprep.subr.bf16.mxu0 %v5654_v48  ;;  %1969 = vmatprep.subr.bf16.mxu1 %v5657_v49  ;;  %v5697_v48 = vld [vmem:[#allocation8 + $0x2a8] ss:$16 sps:$4 sm:$0xff]   ;;  %v5702_v49 = vld [vmem:[#allocation8 + $0x8c] ss:$16 sps:$4 sm:$0xff]  }
 0x258   :  { %1929 = vmatpush2.bf16.msra.mxu0 %v5652_v50  ;;  %1970 = vmatpush2.bf16.msra.mxu1 %v5655_v51  ;;  %v5705_v50 = vld [vmem:[#allocation8 + $0x28c] ss:$16 sps:$4 sm:$0xff]   ;;  %v5700_v51 = vld [vmem:[#allocation8 + $0x88] ss:$16 sps:$4 sm:$0xff]  }
 0x259   :  { %1930 = vmatprep.subr.bf16.mxu0 %v5660_v53  ;;  %1971 = vmatprep.subr.bf16.mxu1 %v5663_v54  ;;  %v5703_v53 = vld [vmem:[#allocation8 + $0x288] ss:$16 sps:$4 sm:$0xff]   ;;  %v5708_v54 = vld [vmem:[#allocation8 + $0x6c] ss:$16 sps:$4 sm:$0xff]  }
 0x25c   :  { %1931 = vmatpush2.bf16.msra.mxu0 %v5658_v55  ;;  %1972 = vmatpush2.bf16.msra.mxu1 %v5661_v56  ;;  %v5711_v55 = vld [vmem:[#allocation8 + $0x26c] ss:$16 sps:$4 sm:$0xff]   ;;  %v5706_v56 = vld [vmem:[#allocation8 + $0x68] ss:$16 sps:$4 sm:$0xff]  }
 0x25d   :  { %1932 = vmatprep.subr.bf16.mxu0 %v5666_v57  ;;  %1973 = vmatprep.subr.bf16.mxu1 %v5669_v58  ;;  %v5709_v57 = vld [vmem:[#allocation8 + $0x268] ss:$16 sps:$4 sm:$0xff]   ;;  %v5714_v58 = vld [vmem:[#allocation8 + $0x4c] ss:$16 sps:$4 sm:$0xff]  }
 0x260   :  { %1933 = vmatpush2.bf16.msra.mxu0 %v5664_v59  ;;  %1974 = vmatpush2.bf16.msra.mxu1 %v5667_v60  ;;  %v5717_v59 = vld [vmem:[#allocation8 + $0x24c] ss:$16 sps:$4 sm:$0xff]   ;;  %v5712_v60 = vld [vmem:[#allocation8 + $0x48] ss:$16 sps:$4 sm:$0xff]  }
 0x261   :  { %1934 = vmatprep.subr.bf16.mxu0 %v5672_v61  ;;  %1975 = vmatprep.subr.bf16.mxu1 %v5675_v62  ;;  %v5715_v61 = vld [vmem:[#allocation8 + $0x248] ss:$16 sps:$4 sm:$0xff]   ;;  %v5720_v62 = vld [vmem:[#allocation8 + $0x2c] ss:$16 sps:$4 sm:$0xff]  }
 0x264   :  { %1935 = vmatpush2.bf16.msra.mxu0 %v5670_v63  ;;  %1976 = vmatpush2.bf16.msra.mxu1 %v5673_v0  ;;  %v5723_v63 = vld [vmem:[#allocation8 + $0x22c] ss:$16 sps:$4 sm:$0xff]   ;;  %v5718_v0 = vld [vmem:[#allocation8 + $0x28] ss:$16 sps:$4 sm:$0xff]  }
 0x265   :  { %1936 = vmatprep.subr.bf16.mxu0 %v5678_v1  ;;  %1977 = vmatprep.subr.bf16.mxu1 %v5681_v2  ;;  %v5721_v1 = vld [vmem:[#allocation8 + $0x228] ss:$16 sps:$4 sm:$0xff]   ;;  %v5726_v2 = vld [vmem:[#allocation8 + $0xc] ss:$16 sps:$4 sm:$0xff]  }
 0x268   :  { %1937 = vmatpush2.bf16.msra.mxu0 %v5676_v3  ;;  %1978 = vmatpush2.bf16.msra.mxu1 %v5679_v4  ;;  %v5729_v3 = vld [vmem:[#allocation8 + $0x20c] ss:$16 sps:$4 sm:$0xff]   ;;  %v5724_v4 = vld [vmem:[#allocation8 + $0x8] ss:$16 sps:$4 sm:$0xff]  }
 0x269   :  { %1988 = vmatprep.subr.bf16.mxu0 %v5684_v6  ;;  %2029 = vmatprep.subr.bf16.mxu1 %v5687_v7  ;;  %v5727_v6 = vld [vmem:[#allocation8 + $0x208] ss:$16 sps:$4 sm:$0xff]   ;;  %v5732_v7 = vld [vmem:[#allocation8 + $0x1ec] ss:$16 sps:$4 sm:$0xff]  }
 0x2eb   :  { %v1060_v19 = vpop.f32.mrf.mxu0  ;;  %v1101_v20 = vpop.f32.mrf.mxu1 }
 0x2ec   :  { %v1061_v21 = vadd.f32 %v1060_v19, %v689_v15  ;;  %v1102_v22 = vadd.f32 %v1101_v20, %v697_v16  ;;  %v5738_v15 = vld [vmem:[#allocation8 + $0x1cc] ss:$16 sps:$4 sm:$0xff]  }
 0x2ed   :  { %v1062_v23 = vpop.f32.mrf.mxu0  ;;  %v1103_v24 = vpop.f32.mrf.mxu1  ;;  %v5741_v16 = vld [vmem:[#allocation8 + $0x3cc] ss:$16 sps:$4 sm:$0xff]  }
 0x2ee   :  { %v1110_v25 = vmax.f32 %v1102_v22, 0.0  ;;  %v1063_v26 = vadd.f32 %v1062_v23, %v693_v17  ;;  %v1104_v27 = vadd.f32 %v1103_v24, %v701_v18  ;;  %v1108_v28 = vmax.f32 %v1061_v21, 0.0  ;;  %v5736_v17 = vld [vmem:[#allocation8 + $0x1c8] ss:$16 sps:$4 sm:$0xff]   ;;  %v5744_v19 = vld [vmem:[#allocation8 + $0x1ac] ss:$16 sps:$4 sm:$0xff]  }
 0x2ef   :  { %v1064_v29 = vpop.f32.mrf.mxu0  ;;  %v1105_v30 = vpop.f32.mrf.mxu1  ;;  %v5739_v18 = vld [vmem:[#allocation8 + $0x3c8] ss:$16 sps:$4 sm:$0xff]   ;;  %v5747_v20 = vld [vmem:[#allocation8 + $0x3ac] ss:$16 sps:$4 sm:$0xff]  }
 0x2f0   :  { %v1109_v31 = vmax.f32 %v1063_v26, 0.0  ;;  %v1111_v32 = vmax.f32 %v1104_v27, 0.0  ;;  %v7130_v33 = vpack.c.bf16 %v1110_v25, %v1110_v25  ;;  %v7132_v40 = vpack.c.bf16 %v1108_v28, %v1108_v28  ;;  %v5742_v21 = vld [vmem:[#allocation8 + $0x1a8] ss:$16 sps:$4 sm:$0xff]   ;;  %v5750_v23 = vld [vmem:[#allocation8 + $0x18c] ss:$16 sps:$4 sm:$0xff]  }
 0x2f1   :  { %v1065_v34 = vpop.f32.mrf.mxu0  ;;  %v1106_v35 = vpop.f32.mrf.mxu1  ;;  %v5745_v22 = vld [vmem:[#allocation8 + $0x3a8] ss:$16 sps:$4 sm:$0xff]   ;;  %v5753_v24 = vld [vmem:[#allocation8 + $0x38c] ss:$16 sps:$4 sm:$0xff]  }
 0x2f2   :  { %v1113_v36 = vpack.c.bf16 %v1109_v31, %v1109_v31  ;;  %v1115_v37 = vpack.c.bf16 %v1111_v32, %v1111_v32  ;;  %v5748_v25 = vld [vmem:[#allocation8 + $0x188] ss:$16 sps:$4 sm:$0xff]   ;;  %v5756_v27 = vld [vmem:[#allocation8 + $0x16c] ss:$16 sps:$4 sm:$0xff]  }
 0x2f3   :  { %v5751_v26 = vld [vmem:[#allocation8 + $0x388] ss:$16 sps:$4 sm:$0xff]   ;;  %v5759_v28 = vld [vmem:[#allocation8 + $0x36c] ss:$16 sps:$4 sm:$0xff]  }
 0x2f4   :  { %1938 = vmatprep.mubr.bf16.mxu0 %v1113_v36  ;;  %1979 = vmatprep.mubr.bf16.mxu1 %v1115_v37  ;;  %v5754_v29 = vld [vmem:[#allocation8 + $0x168] ss:$16 sps:$4 sm:$0xff]   ;;  %v5762_v31 = vld [vmem:[#allocation8 + $0x14c] ss:$16 sps:$4 sm:$0xff]  }
 0x2f5   :  { %1939 = vmatmul.mubr.bf16.vlgmr.msra.gmra.mxu0 %v7132_v40  ;;  %1980 = vmatmul.mubr.bf16.vlgmr.msra.gmra.mxu1 %v7130_v33  ;;  %v5757_v30 = vld [vmem:[#allocation8 + $0x368] ss:$16 sps:$4 sm:$0xff]   ;;  %v5765_v32 = vld [vmem:[#allocation8 + $0x34c] ss:$16 sps:$4 sm:$0xff]  }
 0x2f6   :  { %1989 = vmatpush1.bf16.msra.mxu0 %v5682_v38  ;;  %2030 = vmatpush1.bf16.msra.mxu1 %v5685_v39  ;;  %v5760_v34 = vld [vmem:[#allocation8 + $0x148] ss:$16 sps:$4 sm:$0xff]  }
 0x2f7   :  { %2020 = vmatprep.mubr.bf16.mxu0 %v1113_v36  ;;  %2061 = vmatprep.mubr.bf16.mxu1 %v1115_v37  ;;  %v5763_v35 = vld [vmem:[#allocation8 + $0x348] ss:$16 sps:$4 sm:$0xff]   ;;  %v5768_v36 = vld [vmem:[#allocation8 + $0x12c] ss:$16 sps:$4 sm:$0xff]  }
 0x2f8   :  { %1990 = vmatprep.subr.bf16.mxu0 %v5690_v41  ;;  %2031 = vmatprep.subr.bf16.mxu1 %v5693_v42  ;;  %v5771_v37 = vld [vmem:[#allocation8 + $0x32c] ss:$16 sps:$4 sm:$0xff]   ;;  %v5766_v38 = vld [vmem:[#allocation8 + $0x128] ss:$16 sps:$4 sm:$0xff]  }
 0x2f9   :  { %v5769_v39 = vld [vmem:[#allocation8 + $0x328] ss:$16 sps:$4 sm:$0xff]   ;;  %v5774_v41 = vld [vmem:[#allocation8 + $0x10c] ss:$16 sps:$4 sm:$0xff]  }
 0x2fa   :  { %1991 = vmatpush1.bf16.msra.mxu0 %v5688_v43  ;;  %2032 = vmatpush1.bf16.msra.mxu1 %v5691_v44  ;;  %v5777_v42 = vld [vmem:[#allocation8 + $0x30c] ss:$16 sps:$4 sm:$0xff]   ;;  %v5772_v43 = vld [vmem:[#allocation8 + $0x108] ss:$16 sps:$4 sm:$0xff]  }
 0x2fb   :  { %1992 = vmatprep.subr.bf16.mxu0 %v5696_v45  ;;  %2033 = vmatprep.subr.bf16.mxu1 %v5699_v46  ;;  %v5775_v44 = vld [vmem:[#allocation8 + $0x308] ss:$16 sps:$4 sm:$0xff]   ;;  %v5783_v46 = vld [vmem:[#allocation11 + $0xec] ss:$16 sps:$4 sm:$0xff]  }
 0x2fc   :  { %v5780_v45 = vld [vmem:[#allocation11 + $0xe4] ss:$16 sps:$4 sm:$0xff]  }
 0x2fe   :  { %1993 = vmatpush1.bf16.msra.mxu0 %v5694_v47  ;;  %2034 = vmatpush1.bf16.msra.mxu1 %v5697_v48  ;;  %v5778_v47 = vld [vmem:[#allocation11 + $0xe0] ss:$16 sps:$4 sm:$0xff]   ;;  %v5781_v48 = vld [vmem:[#allocation11 + $0xe8] ss:$16 sps:$4 sm:$0xff]  }
 0x2ff   :  { %1994 = vmatprep.subr.bf16.mxu0 %v5702_v49  ;;  %2035 = vmatprep.subr.bf16.mxu1 %v5705_v50  ;;  %v5786_v49 = vld [vmem:[#allocation11 + $0xc4] ss:$16 sps:$4 sm:$0xff]   ;;  %v5789_v50 = vld [vmem:[#allocation11 + $0xcc] ss:$16 sps:$4 sm:$0xff]  }
 0x302   :  { %1995 = vmatpush1.bf16.msra.mxu0 %v5700_v51  ;;  %2036 = vmatpush1.bf16.msra.mxu1 %v5703_v53  ;;  %v5784_v51 = vld [vmem:[#allocation11 + $0xc0] ss:$16 sps:$4 sm:$0xff]   ;;  %v5787_v53 = vld [vmem:[#allocation11 + $0xc8] ss:$16 sps:$4 sm:$0xff]  }
 0x303   :  { %1996 = vmatprep.subr.bf16.mxu0 %v5708_v54  ;;  %2037 = vmatprep.subr.bf16.mxu1 %v5711_v55  ;;  %v5792_v54 = vld [vmem:[#allocation11 + $0xa4] ss:$16 sps:$4 sm:$0xff]   ;;  %v5795_v55 = vld [vmem:[#allocation11 + $0xac] ss:$16 sps:$4 sm:$0xff]  }
 0x306   :  { %1997 = vmatpush1.bf16.msra.mxu0 %v5706_v56  ;;  %2038 = vmatpush1.bf16.msra.mxu1 %v5709_v57  ;;  %v5790_v56 = vld [vmem:[#allocation11 + $0xa0] ss:$16 sps:$4 sm:$0xff]   ;;  %v5793_v57 = vld [vmem:[#allocation11 + $0xa8] ss:$16 sps:$4 sm:$0xff]  }
 0x307   :  { %1998 = vmatprep.subr.bf16.mxu0 %v5714_v58  ;;  %2039 = vmatprep.subr.bf16.mxu1 %v5717_v59  ;;  %v5796_v58 = vld [vmem:[#allocation11 + $0x80] ss:$16 sps:$4 sm:$0xff]   ;;  %v5799_v59 = vld [vmem:[#allocation11 + $0x88] ss:$16 sps:$4 sm:$0xff]  }
 0x30a   :  { %1999 = vmatpush1.bf16.msra.mxu0 %v5712_v60  ;;  %2040 = vmatpush1.bf16.msra.mxu1 %v5715_v61  ;;  %v5804_v60 = vld [vmem:[#allocation11 + $0x64] ss:$16 sps:$4 sm:$0xff]   ;;  %v5807_v61 = vld [vmem:[#allocation11 + $0x6c] ss:$16 sps:$4 sm:$0xff]  }
 0x30b   :  { %2000 = vmatprep.subr.bf16.mxu0 %v5720_v62  ;;  %2041 = vmatprep.subr.bf16.mxu1 %v5723_v63  ;;  %v5802_v62 = vld [vmem:[#allocation11 + $0x60] ss:$16 sps:$4 sm:$0xff]   ;;  %v5810_v63 = vld [vmem:[#allocation11 + $0x44] ss:$16 sps:$4 sm:$0xff]  }
 0x30e   :  { %2001 = vmatpush1.bf16.msra.mxu0 %v5718_v0  ;;  %2042 = vmatpush1.bf16.msra.mxu1 %v5721_v1  ;;  %v5813_v0 = vld [vmem:[#allocation11 + $0x4c] ss:$16 sps:$4 sm:$0xff]   ;;  %v5808_v1 = vld [vmem:[#allocation11 + $0x40] ss:$16 sps:$4 sm:$0xff]  }
 0x30f   :  { %2002 = vmatprep.subr.bf16.mxu0 %v5726_v2  ;;  %2043 = vmatprep.subr.bf16.mxu1 %v5729_v3  ;;  %v5811_v2 = vld [vmem:[#allocation11 + $0x48] ss:$16 sps:$4 sm:$0xff]   ;;  %v5816_v3 = vld [vmem:[#allocation11 + $0x24] ss:$16 sps:$4 sm:$0xff]  }
 0x312   :  { %2003 = vmatpush1.bf16.msra.mxu0 %v5724_v4  ;;  %2044 = vmatpush1.bf16.msra.mxu1 %v5727_v6  ;;  %v5819_v4 = vld [vmem:[#allocation11 + $0x2c] ss:$16 sps:$4 sm:$0xff]   ;;  %v5814_v6 = vld [vmem:[#allocation11 + $0x20] ss:$16 sps:$4 sm:$0xff]  }
 0x313   :  { %2004 = vmatprep.subr.bf16.mxu0 %v5732_v7  ;;  %2045 = vmatprep.subr.bf16.mxu1 %v5735_v8  ;;  %v5817_v7 = vld [vmem:[#allocation11 + $0x28] ss:$16 sps:$4 sm:$0xff]   ;;  %v5822_v8 = vld [vmem:[#allocation11 + $0x4] ss:$16 sps:$4 sm:$0xff]  }
 0x316   :  { %2005 = vmatpush2.bf16.msra.mxu0 %v5730_v9  ;;  %2046 = vmatpush2.bf16.msra.mxu1 %v5733_v12  ;;  %v5825_v9 = vld [vmem:[#allocation11 + $0xc] ss:$16 sps:$4 sm:$0xff]   ;;  %v5820_v12 = vld [vmem:[#allocation11] ss:$16 sps:$4 sm:$0xff]  }
 0x317   :  { %2006 = vmatprep.subr.bf16.mxu0 %v5738_v15  ;;  %2047 = vmatprep.subr.bf16.mxu1 %v5741_v16  ;;  %v5823_v15 = vld [vmem:[#allocation11 + $0x8] ss:$16 sps:$4 sm:$0xff]   ;;  %v5828_v16 = vld [vmem:[#allocation11 + $0x1e4] ss:$16 sps:$4 sm:$0xff]  }
 0x31a   :  { %2007 = vmatpush2.bf16.msra.mxu0 %v5736_v17  ;;  %2048 = vmatpush2.bf16.msra.mxu1 %v5739_v18  ;;  %v5831_v17 = vld [vmem:[#allocation11 + $0x1ec] ss:$16 sps:$4 sm:$0xff]   ;;  %v5826_v18 = vld [vmem:[#allocation11 + $0x1e0] ss:$16 sps:$4 sm:$0xff]  }
 0x31b   :  { %2008 = vmatprep.subr.bf16.mxu0 %v5744_v19  ;;  %2049 = vmatprep.subr.bf16.mxu1 %v5747_v20  ;;  %v5829_v19 = vld [vmem:[#allocation11 + $0x1e8] ss:$16 sps:$4 sm:$0xff]   ;;  %v5834_v20 = vld [vmem:[#allocation11 + $0x1c4] ss:$16 sps:$4 sm:$0xff]  }
 0x31e   :  { %2009 = vmatpush2.bf16.msra.mxu0 %v5742_v21  ;;  %2050 = vmatpush2.bf16.msra.mxu1 %v5745_v22  ;;  %v5837_v21 = vld [vmem:[#allocation11 + $0x1cc] ss:$16 sps:$4 sm:$0xff]   ;;  %v5832_v22 = vld [vmem:[#allocation11 + $0x1c0] ss:$16 sps:$4 sm:$0xff]  }
 0x31f   :  { %2010 = vmatprep.subr.bf16.mxu0 %v5750_v23  ;;  %2051 = vmatprep.subr.bf16.mxu1 %v5753_v24  ;;  %v5835_v23 = vld [vmem:[#allocation11 + $0x1c8] ss:$16 sps:$4 sm:$0xff]   ;;  %v5840_v24 = vld [vmem:[#allocation11 + $0x1a4] ss:$16 sps:$4 sm:$0xff]  }
 0x322   :  { %2011 = vmatpush2.bf16.msra.mxu0 %v5748_v25  ;;  %2052 = vmatpush2.bf16.msra.mxu1 %v5751_v26  ;;  %v5843_v25 = vld [vmem:[#allocation11 + $0x1ac] ss:$16 sps:$4 sm:$0xff]   ;;  %v5838_v26 = vld [vmem:[#allocation11 + $0x1a0] ss:$16 sps:$4 sm:$0xff]  }
 0x323   :  { %2012 = vmatprep.subr.bf16.mxu0 %v5756_v27  ;;  %2053 = vmatprep.subr.bf16.mxu1 %v5759_v28  ;;  %v5841_v27 = vld [vmem:[#allocation11 + $0x1a8] ss:$16 sps:$4 sm:$0xff]   ;;  %v5846_v28 = vld [vmem:[#allocation11 + $0x184] ss:$16 sps:$4 sm:$0xff]  }
 0x326   :  { %2013 = vmatpush2.bf16.msra.mxu0 %v5754_v29  ;;  %2054 = vmatpush2.bf16.msra.mxu1 %v5757_v30  ;;  %v5849_v29 = vld [vmem:[#allocation11 + $0x18c] ss:$16 sps:$4 sm:$0xff]   ;;  %v5844_v30 = vld [vmem:[#allocation11 + $0x180] ss:$16 sps:$4 sm:$0xff]  }
 0x327   :  { %2014 = vmatprep.subr.bf16.mxu0 %v5762_v31  ;;  %2055 = vmatprep.subr.bf16.mxu1 %v5765_v32  ;;  %v5847_v31 = vld [vmem:[#allocation11 + $0x188] ss:$16 sps:$4 sm:$0xff]   ;;  %v5852_v32 = vld [vmem:[#allocation11 + $0x164] ss:$16 sps:$4 sm:$0xff]  }
 0x32a   :  { %2015 = vmatpush2.bf16.msra.mxu0 %v5760_v34  ;;  %2056 = vmatpush2.bf16.msra.mxu1 %v5763_v35  ;;  %v5855_v34 = vld [vmem:[#allocation11 + $0x16c] ss:$16 sps:$4 sm:$0xff]   ;;  %v5850_v35 = vld [vmem:[#allocation11 + $0x160] ss:$16 sps:$4 sm:$0xff]  }
 0x32b   :  { %2016 = vmatprep.subr.bf16.mxu0 %v5768_v36  ;;  %2057 = vmatprep.subr.bf16.mxu1 %v5771_v37  ;;  %v5853_v36 = vld [vmem:[#allocation11 + $0x168] ss:$16 sps:$4 sm:$0xff]   ;;  %v5858_v37 = vld [vmem:[#allocation11 + $0x144] ss:$16 sps:$4 sm:$0xff]  }
 0x32e   :  { %2017 = vmatpush2.bf16.msra.mxu0 %v5766_v38  ;;  %2058 = vmatpush2.bf16.msra.mxu1 %v5769_v39  ;;  %v5861_v38 = vld [vmem:[#allocation11 + $0x14c] ss:$16 sps:$4 sm:$0xff]   ;;  %v5856_v39 = vld [vmem:[#allocation11 + $0x140] ss:$16 sps:$4 sm:$0xff]  }
 0x32f   :  { %2018 = vmatprep.subr.bf16.mxu0 %v5774_v41  ;;  %2059 = vmatprep.subr.bf16.mxu1 %v5777_v42  ;;  %v5859_v41 = vld [vmem:[#allocation11 + $0x148] ss:$16 sps:$4 sm:$0xff]   ;;  %v5864_v42 = vld [vmem:[#allocation11 + $0x124] ss:$16 sps:$4 sm:$0xff]  }
 0x332   :  { %2019 = vmatpush2.bf16.msra.mxu0 %v5772_v43  ;;  %2060 = vmatpush2.bf16.msra.mxu1 %v5775_v44  ;;  %v5867_v43 = vld [vmem:[#allocation11 + $0x12c] ss:$16 sps:$4 sm:$0xff]   ;;  %v5862_v44 = vld [vmem:[#allocation11 + $0x120] ss:$16 sps:$4 sm:$0xff]  }
 0x333   :  { %2476 = vmatprep.subr.bf16.mxu0 %v5780_v45  ;;  %2517 = vmatprep.subr.bf16.mxu1 %v5783_v46  ;;  %v5865_v45 = vld [vmem:[#allocation11 + $0x128] ss:$16 sps:$4 sm:$0xff]   ;;  %v5870_v46 = vld [vmem:[#allocation11 + $0x104] ss:$16 sps:$4 sm:$0xff]  }
 0x335   :  { %2021 = vmatmul.mubr.bf16.vlgmr.msra.gmra.mxu0 %v7132_v40  ;;  %2062 = vmatmul.mubr.bf16.vlgmr.msra.gmra.mxu1 %v7130_v33  ;;  %v5798_v40 = vld [vmem:[#allocation11 + $0x84] ss:$16 sps:$4 sm:$0xff]   ;;  %v5801_v33 = vld [vmem:[#allocation11 + $0x8c] ss:$16 sps:$4 sm:$0xff]  }
 0x336   :  { %2477 = vmatpush1.bf16.msra.mxu0 %v5778_v47  ;;  %2518 = vmatpush1.bf16.msra.mxu1 %v5781_v48  ;;  %v5873_v47 = vld [vmem:[#allocation11 + $0x10c] ss:$16 sps:$4 sm:$0xff]   ;;  %v5868_v48 = vld [vmem:[#allocation11 + $0x100] ss:$16 sps:$4 sm:$0xff]  }
 0x337   :  { %2478 = vmatprep.subr.bf16.mxu0 %v5786_v49  ;;  %2519 = vmatprep.subr.bf16.mxu1 %v5789_v50  ;;  %v5871_v49 = vld [vmem:[#allocation11 + $0x108] ss:$16 sps:$4 sm:$0xff]   ;;  %v5874_v50 = vld [vmem:[%s7386_s17 + $0xf8] sm:$0xff]  }
 0x338   :  { %2508 = vmatprep.mubr.bf16.mxu0 %v7110_v52  ;;  %2549 = vmatprep.mubr.bf16.mxu1 %v7110_v52  ;;  %v5805_v52 = vld [vmem:[#allocation11 + $0x68] ss:$16 sps:$4 sm:$0xff]  }
 0x33a   :  { %2479 = vmatpush1.bf16.msra.mxu0 %v5784_v51  ;;  %2520 = vmatpush1.bf16.msra.mxu1 %v5787_v53  ;;  %v5875_v51 = vld [vmem:[%s7386_s17 + $0x78] sm:$0xff]  }
 0x33b   :  { %2480 = vmatprep.subr.bf16.mxu0 %v5792_v54  ;;  %2521 = vmatprep.subr.bf16.mxu1 %v5795_v55  ;;  %v5876_v53 = vld [vmem:[%s7386_s17 + $0xb8] sm:$0xff]   ;;  %v5878_v55 = vld [vmem:[%s7386_s17 + $0xf0] sm:$0xff]  }
 0x33c   :  { %v5877_v54 = vld [vmem:[%s7386_s17 + $0x38] sm:$0xff]  }
 0x33e   :  { %2481 = vmatpush1.bf16.msra.mxu0 %v5790_v56  ;;  %2522 = vmatpush1.bf16.msra.mxu1 %v5793_v57  ;;  %v5879_v56 = vld [vmem:[%s7386_s17 + $0x70] sm:$0xff]  }
 0x33f   :  { %2482 = vmatprep.subr.bf16.mxu0 %v5798_v40  ;;  %2523 = vmatprep.subr.bf16.mxu1 %v5801_v33  ;;  %v5880_v57 = vld [vmem:[%s7386_s17 + $0xb0] sm:$0xff]   ;;  %v5883_v33 = vld [vmem:[%s7386_s17 + $0x68] sm:$0xff]  }
 0x340   :  { %v5881_v40 = vld [vmem:[%s7386_s17 + $0x30] sm:$0xff]  }
 0x342   :  { %2483 = vmatpush1.bf16.msra.mxu0 %v5796_v58  ;;  %2524 = vmatpush1.bf16.msra.mxu1 %v5799_v59  ;;  %v5884_v58 = vld [vmem:[%s7386_s17 + $0xa8] sm:$0xff]  }
 0x343   :  { %2484 = vmatprep.subr.bf16.mxu0 %v5804_v60  ;;  %2525 = vmatprep.subr.bf16.mxu1 %v5807_v61  ;;  %v5885_v59 = vld [vmem:[%s7386_s17 + $0x28] sm:$0xff]   ;;  %v5886_v60 = vld [vmem:[%s7386_s17 + $0xe0] sm:$0xff]  }
 0x344   :  { %v5887_v61 = vld [vmem:[%s7386_s17 + $0x60] sm:$0xff]  }
 0x346   :  { %2485 = vmatpush1.bf16.msra.mxu0 %v5802_v62  ;;  %2526 = vmatpush1.bf16.msra.mxu1 %v5805_v52  ;;  %v5888_v62 = vld [vmem:[%s7386_s17 + $0xa0] sm:$0xff]  }
 0x347   :  { %2486 = vmatprep.subr.bf16.mxu0 %v5810_v63  ;;  %2527 = vmatprep.subr.bf16.mxu1 %v5813_v0  ;;  %v5889_v52 = vld [vmem:[%s7386_s17 + $0x20] sm:$0xff]   ;;  %v5890_v63 = vld [vmem:[%s7386_s17 + $0xd8] sm:$0xff]  }
 0x348   :  { %v5891_v0 = vld [vmem:[%s7386_s17 + $0x58] sm:$0xff]  }
 0x34a   :  { %2487 = vmatpush1.bf16.msra.mxu0 %v5808_v1  ;;  %2528 = vmatpush1.bf16.msra.mxu1 %v5811_v2  ;;  %v5892_v1 = vld [vmem:[%s7386_s17 + $0x98] sm:$0xff]  }
 0x34b   :  { %2488 = vmatprep.subr.bf16.mxu0 %v5816_v3  ;;  %2529 = vmatprep.subr.bf16.mxu1 %v5819_v4  ;;  %v5893_v2 = vld [vmem:[%s7386_s17 + $0x18] sm:$0xff]   ;;  %v5894_v3 = vld [vmem:[%s7386_s17 + $0xd0] sm:$0xff]   ;;  %v1244_v4 = vld [vmem:[#allocation10] sm:$0xf] }
 0x34e   :  { %2489 = vmatpush1.bf16.msra.mxu0 %v5814_v6  ;;  %2530 = vmatpush1.bf16.msra.mxu1 %v5817_v7  ;;  %v1249_v6 = vrot.slane %v1244_v4, %v7118_v10  ;;  %v5895_v7 = vld [vmem:[%s7386_s17 + $0x50] sm:$0xff]  }
 0x34f   :  { %2490 = vmatprep.subr.bf16.mxu0 %v5822_v8  ;;  %2531 = vmatprep.subr.bf16.mxu1 %v5825_v9  ;;  %v5896_v8 = vld [vmem:[%s7386_s17 + $0x90] sm:$0xff]   ;;  %v1253_v9 = vrot.slane %v1244_v4, %v7122_v13 }
 0x352   :  { %2491 = vmatpush1.bf16.msra.mxu0 %v5820_v12  ;;  %2532 = vmatpush1.bf16.msra.mxu1 %v5823_v15  ;;  %v5897_v12 = vld [vmem:[%s7386_s17 + $0x10] sm:$0xff]  }
 0x353   :  { %2492 = vmatprep.subr.bf16.mxu0 %v5828_v16  ;;  %2533 = vmatprep.subr.bf16.mxu1 %v5831_v17 }
 0x356   :  { %2493 = vmatpush2.bf16.msra.mxu0 %v5826_v18  ;;  %2534 = vmatpush2.bf16.msra.mxu1 %v5829_v19  ;;  %v5898_v18 = vld [vmem:[%s7386_s17 + $0xc8] sm:$0xff]  }
 0x357   :  { %2494 = vmatprep.subr.bf16.mxu0 %v5834_v20  ;;  %2535 = vmatprep.subr.bf16.mxu1 %v5837_v21  ;;  %v5899_v21 = vld [vmem:[%s7386_s17 + $0x48] sm:$0xff]  }
 0x35a   :  { %2495 = vmatpush2.bf16.msra.mxu0 %v5832_v22  ;;  %2536 = vmatpush2.bf16.msra.mxu1 %v5835_v23  ;;  %v5900_v22 = vld [vmem:[%s7386_s17 + $0x88] sm:$0xff]  }
 0x35b   :  { %2496 = vmatprep.subr.bf16.mxu0 %v5840_v24  ;;  %2537 = vmatprep.subr.bf16.mxu1 %v5843_v25  ;;  %v5901_v25 = vld [vmem:[%s7386_s17 + $0x8] sm:$0xff]  }
 0x35e   :  { %2497 = vmatpush2.bf16.msra.mxu0 %v5838_v26  ;;  %2538 = vmatpush2.bf16.msra.mxu1 %v5841_v27 }
 0x35f   :  { %2498 = vmatprep.subr.bf16.mxu0 %v5846_v28  ;;  %2539 = vmatprep.subr.bf16.mxu1 %v5849_v29  ;;  %v5902_v29 = vld [vmem:[%s7386_s17 + $0xc0] sm:$0xff]  }
 0x362   :  { %2499 = vmatpush2.bf16.msra.mxu0 %v5844_v30  ;;  %2540 = vmatpush2.bf16.msra.mxu1 %v5847_v31 }
 0x363   :  { %2500 = vmatprep.subr.bf16.mxu0 %v5852_v32  ;;  %2541 = vmatprep.subr.bf16.mxu1 %v5855_v34  ;;  %v5903_v32 = vld [vmem:[%s7386_s17 + $0x40] sm:$0xff]  }
 0x364   :  { %v5904_v34 = vld [vmem:[%s7386_s17 + $0x80] sm:$0xff]  }
 0x366   :  { %2501 = vmatpush2.bf16.msra.mxu0 %v5850_v35  ;;  %2542 = vmatpush2.bf16.msra.mxu1 %v5853_v36  ;;  %v5905_v35 = vld [vmem:[%s7386_s17] sm:$0xff]   ;;  %v5906_v36 = vld [vmem:[#allocation17 + $0x78] sm:$0xff]  }
 0x367   :  { %2502 = vmatprep.subr.bf16.mxu0 %v5858_v37  ;;  %2543 = vmatprep.subr.bf16.mxu1 %v5861_v38  ;;  %v6793_v37 = vmov 0.0   ;;  %v1257_v38 = vrot.slane %v1244_v4, %v7120_v11 }
 0x36a   :  { %2503 = vmatpush2.bf16.msra.mxu0 %v5856_v39  ;;  %2544 = vmatpush2.bf16.msra.mxu1 %v5859_v41 }
 0x36b   :  { %2504 = vmatprep.subr.bf16.mxu0 %v5864_v42  ;;  %2545 = vmatprep.subr.bf16.mxu1 %v5867_v43 }
 0x36e   :  { %2505 = vmatpush2.bf16.msra.mxu0 %v5862_v44  ;;  %2546 = vmatpush2.bf16.msra.mxu1 %v5865_v45 }
 0x36f   :  { %2506 = vmatprep.subr.bf16.mxu0 %v5870_v46  ;;  %2547 = vmatprep.subr.bf16.mxu1 %v5873_v47 }
 0x372   :  { %2507 = vmatpush2.bf16.msra.mxu0 %v5868_v48  ;;  %2548 = vmatpush2.bf16.msra.mxu1 %v5871_v49 }
 0x373   :  { %5094 = vmatprep.subr.bf16.mxu1 %v5874_v50  ;;  %5072 = vmatprep.subr.bf16.mxu0 %v5875_v51  ;;  %v1261_v50 = vrot.slane %v1244_v4, %v7124_v14  ;;  %v2134_v51 = vld [vmem:[#allocation13] sm:$0xf] }
 0x375   :  { %2509 = vmatmul.mubr.bf16.vlgmr.msra.gmra.mxu0 %v7114_v5  ;;  %2550 = vmatmul.mubr.bf16.vlgmr.msra.gmra.mxu1 %v7114_v5  ;;  %v5882_v5 = vld [vmem:[%s7386_s17 + $0xe8] sm:$0xff]  }
 0x376   :  { %5095 = vmatpush3.bf16.msra.mxu1 %v5876_v53  ;;  %5073 = vmatpush3.bf16.msra.mxu0 %v5877_v54  ;;  %v2139_v53 = vrot.slane %v2134_v51, %v7118_v10  ;;  %v2147_v54 = vrot.slane %v2134_v51, %v7120_v11 }
 0x377   :  { %5096 = vmatprep.subr.bf16.mxu1 %v5878_v55  ;;  %5074 = vmatprep.subr.bf16.mxu0 %v5879_v56  ;;  %v2143_v56 = vrot.slane %v2134_v51, %v7122_v13 }
 0x37a   :  { %5097 = vmatpush3.bf16.msra.mxu1 %v5880_v57  ;;  %5075 = vmatpush3.bf16.msra.mxu0 %v5881_v40  ;;  %v2151_v57 = vrot.slane %v2134_v51, %v7124_v14 }
 0x37b   :  { %5098 = vmatprep.subr.bf16.mxu1 %v5882_v5  ;;  %5076 = vmatprep.subr.bf16.mxu0 %v5883_v33 }
 0x37e   :  { %5099 = vmatpush3.bf16.msra.mxu1 %v5884_v58  ;;  %5077 = vmatpush3.bf16.msra.mxu0 %v5885_v59 }
 0x37f   :  { %5100 = vmatprep.subr.bf16.mxu1 %v5886_v60  ;;  %5078 = vmatprep.subr.bf16.mxu0 %v5887_v61 }
 0x382   :  { %5101 = vmatpush3.bf16.msra.mxu1 %v5888_v62  ;;  %5079 = vmatpush3.bf16.msra.mxu0 %v5889_v52 }
 0x383   :  { %5102 = vmatprep.subr.bf16.mxu1 %v5890_v63  ;;  %5080 = vmatprep.subr.bf16.mxu0 %v5891_v0 }
 0x386   :  { %5103 = vmatpush3.bf16.msra.mxu1 %v5892_v1  ;;  %5081 = vmatpush3.bf16.msra.mxu0 %v5893_v2 }
 0x387   :  { %5104 = vmatprep.subr.bf16.mxu1 %v5894_v3  ;;  %5082 = vmatprep.subr.bf16.mxu0 %v5895_v7 }
 0x38a   :  { %5105 = vmatpush3.bf16.msra.mxu1 %v5896_v8  ;;  %5083 = vmatpush3.bf16.msra.mxu0 %v5897_v12  ;;  %v5907_v12 = vld [vmem:[#allocation17 + $0x38] sm:$0xff]  }
 0x38b   :  { %5106 = vmatprep.subr.bf16.mxu1 %v5898_v18  ;;  %5084 = vmatprep.subr.bf16.mxu0 %v5899_v21  ;;  %v5922_v18 = vld [vmem:[#allocation14 + $0x38] sm:$0xff]   ;;  %v5923_v21 = vld [vmem:[#allocation14 + $0x30] sm:$0xff]  }
 0x38e   :  { %5107 = vmatpush3.bf16.msra.mxu1 %v5900_v22  ;;  %5085 = vmatpush3.bf16.msra.mxu0 %v5901_v25  ;;  %v5911_v22 = vld [vmem:[#allocation17 + $0x28] sm:$0xff]   ;;  %v5913_v25 = vld [vmem:[#allocation17 + $0x20] sm:$0xff]  }
 0x38f   :  { %5108 = vmatprep.subr.bf16.mxu1 %v5902_v29  ;;  %5086 = vmatprep.subr.bf16.mxu0 %v5903_v32  ;;  %v5916_v29 = vld [vmem:[#allocation17 + $0x50] sm:$0xff]   ;;  %v5918_v32 = vld [vmem:[#allocation17 + $0x48] sm:$0xff]  }
 0x392   :  { %5109 = vmatpush3.bf16.msra.mxu1 %v5904_v34  ;;  %5087 = vmatpush3.bf16.msra.mxu0 %v5905_v35  ;;  %v5919_v34 = vld [vmem:[#allocation17 + $0x8] sm:$0xff]   ;;  %v5920_v35 = vld [vmem:[#allocation17 + $0x40] sm:$0xff]  }
 0x393   :  { %5125 = vmatprep.subr.bf16.mxu1 %v5906_v36  ;;  %5229 = vmatprep.subr.bf16.mxu0 %v6793_v37  ;;  %v5921_v36 = vld [vmem:[#allocation17] sm:$0xff]  }
 0x3b5   :  { %v1940_v15 = vpop.f32.mrf.mxu0  ;;  %v1981_v16 = vpop.f32.mrf.mxu1 }
 0x3b6   :  { %v1941_v17 = vadd.f32 %v1940_v15, %v1249_v6 }
 0x3b7   :  { %v1942_v19 = vpop.f32.mrf.mxu0  ;;  %v1983_v20 = vpop.f32.mrf.mxu1 }
 0x3b8   :  { %v1982_v23 = vadd.f32 %v1981_v16, %v1941_v17  ;;  %v1943_v24 = vadd.f32 %v1942_v19, %v1253_v9  ;;  %v5908_v17 = vld [vmem:[#allocation17 + $0x70] sm:$0xff]  }
 0x3b9   :  { %v1944_v26 = vpop.f32.mrf.mxu0  ;;  %v1985_v27 = vpop.f32.mrf.mxu1  ;;  %v5909_v19 = vld [vmem:[#allocation17 + $0x30] sm:$0xff]  }
 0x3ba   :  { %v1984_v28 = vadd.f32 %v1983_v20, %v1943_v24  ;;  %v5910_v20 = vld [vmem:[#allocation17 + $0x68] sm:$0xff]   ;;  %v5914_v26 = vld [vmem:[#allocation17 + $0x58] sm:$0xff]  }
 0x3bb   :  { %v1945_v30 = vpop.f32.mrf.mxu0  ;;  %v1986_v31 = vpop.f32.mrf.mxu1  ;;  %v5924_v24 = vld [vmem:[#allocation14 + $0x28] sm:$0xff]   ;;  %v5925_v27 = vld [vmem:[#allocation14 + $0x20] sm:$0xff]  }
 0x3bc   :  { %v5926_v30 = vld [vmem:[#allocation14 + $0x18] sm:$0xff]  }
 0x3bd   :  { %v5917_v31 = vld [vmem:[#allocation17 + $0x10] sm:$0xff]  }
 0x3f5   :  { %v2022_v39 = vpop.f32.mrf.mxu0  ;;  %v2063_v41 = vpop.f32.mrf.mxu1 }
 0x3f6   :  { %v2023_v42 = vadd.f32 %v2022_v39, %v1257_v38  ;;  %v5927_v38 = vld [vmem:[#allocation14 + $0x10] sm:$0xff]   ;;  %v5928_v39 = vld [vmem:[#allocation14 + $0x8] sm:$0xff]  }
 0x3f7   :  { %v2024_v43 = vpop.f32.mrf.mxu0  ;;  %v2065_v44 = vpop.f32.mrf.mxu1 }
 0x3f8   :  { %v2064_v45 = vadd.f32 %v2063_v41, %v2023_v42  ;;  %v2025_v55 = vadd.f32 %v2024_v43, %v1261_v50  ;;  %v5929_v41 = vld [vmem:[#allocation14] sm:$0xff]  }
 0x3f9   :  { %v2026_v46 = vpop.f32.mrf.mxu0  ;;  %v2067_v47 = vpop.f32.mrf.mxu1  ;;  %v5930_v42 = vld [vmem:[#allocation17 + $0xf8] sm:$0xff]  }
 0x3fa   :  { %v2066_v59 = vadd.f32 %v2065_v44, %v2025_v55 }
 0x3fb   :  { %v2027_v48 = vpop.f32.mrf.mxu0  ;;  %v2068_v49 = vpop.f32.mrf.mxu1 }
 0x435   :  { %v2510_v40 = vpop.f32.mrf.mxu0  ;;  %v2551_v5 = vpop.f32.mrf.mxu1 }
 0x436   :  { %v2511_v33 = vadd.f32 %v2510_v40, %v2139_v53  ;;  %v2552_v58 = vadd.f32 %v2551_v5, %v2147_v54  ;;  %v5931_v40 = vld [vmem:[#allocation17 + $0xb8] sm:$0xff]  }
 0x437   :  { %v2512_v60 = vpop.f32.mrf.mxu0  ;;  %v2553_v61 = vpop.f32.mrf.mxu1 }
 0x438   :  { %v2558_v62 = vadd.f32 %v2511_v33, %v1982_v23  ;;  %v2560_v52 = vadd.f32 %v2552_v58, %v2064_v45  ;;  %v2513_v63 = vadd.f32 %v2512_v60, %v2143_v56  ;;  %v2554_v0 = vadd.f32 %v2553_v61, %v2151_v57  ;;  %v5912_v23 = vld [vmem:[#allocation17 + $0x60] sm:$0xff]   ;;  %v4921_v45 = vld [vmem:[%s7387_s0] ss:$0 sm:$0xff]  ;;  %v5932_v33 = vld [vmem:[#allocation17 + $0xf0] sm:$0xff]  }
 0x439   :  { %v2514_v1 = vpop.f32.mrf.mxu0  ;;  %v2555_v10 = vpop.f32.mrf.mxu1  ;;  %v5933_v58 = vld [vmem:[#allocation17 + $0xb0] sm:$0xff]   ;;  %v5935_v60 = vld [vmem:[#allocation17 + $0xa8] sm:$0xff]   ;;  %v5936_v61 = vld [vmem:[#allocation17 + $0xe0] sm:$0xff]  }
 0x43a   :  { %v2559_v2 = vadd.f32 %v2513_v63, %v1984_v28  ;;  %v2561_v11 = vadd.f32 %v2554_v0, %v2066_v59  ;;  %v2562_v3 = vmax.f32 %v2558_v62, 0.0  ;;  %v2564_v4 = vmax.f32 %v2560_v52, 0.0  ;;  %v5915_v28 = vld [vmem:[#allocation17 + $0x18] sm:$0xff]   ;;  %v5934_v59 = vld [vmem:[#allocation17 + $0xe8] sm:$0xff]   ;;  %v5937_v62 = vld [vmem:[#allocation17 + $0xa0] sm:$0xff]  }
 0x43b   :  { %v2515_v13 = vpop.f32.mrf.mxu0  ;;  %v2556_v6 = vpop.f32.mrf.mxu1  ;;  %v5938_v52 = vld [vmem:[#allocation17 + $0xd8] sm:$0xff]   ;;  %v5940_v0 = vld [vmem:[#allocation17 + $0xd0] sm:$0xff]   ;;  %v5942_v10 = vld [vmem:[#allocation17 + $0xc8] sm:$0xff]  }
 0x43c   :  { %v2563_v14 = vmax.f32 %v2559_v2, 0.0  ;;  %v2565_v7 = vmax.f32 %v2561_v11, 0.0  ;;  %v2566_v15 = vpack.c.bf16 %v2562_v3, %v2562_v3  ;;  %v7185_v16 = vpack.c.bf16 %v2564_v4, %v2564_v4  ;;  %v5939_v63 = vld [vmem:[#allocation17 + $0x98] sm:$0xff]   ;;  %v5941_v1 = vld [vmem:[#allocation17 + $0x90] sm:$0xff]   ;;  %v5943_v3 = vld [vmem:[#allocation17 + $0x88] sm:$0xff]  }
 0x43d   :  { %v5944_v13 = vld [vmem:[#allocation17 + $0xc0] sm:$0xff]  }
 0x43e   :  { %v2567_v8 = vpack.c.bf16 %v2563_v14, %v2563_v14  ;;  %v7183_v9 = vpack.c.bf16 %v2565_v7, %v2565_v7  ;;  %v5945_v7 = vld [vmem:[#allocation17 + $0x80] sm:$0xff]  }
 0x440   :  { %2865 = vmatprep.mubr.bf16.mxu0 %v2567_v8  ;;  %2905 = vmatprep.mubr.bf16.mxu1 %v7183_v9 }
 0x441   :  { %2866 = vmatmul.mubr.bf16.vlgmr.msra.gmra.mxu0 %v2566_v15  ;;  %2906 = vmatmul.mubr.bf16.vlgmr.msra.gmra.mxu1 %v7185_v16 }
 0x442   :  { %5126 = vmatpush3.bf16.msra.mxu1 %v5907_v12  ;;  %3321 = vmatprep.mubr.bf16.mxu1 %v2567_v8  ;;  %v5946_v8 = vld [vmem:[%s7388_s26 + $0x38] sm:$0xff]   ;;  %v5948_v12 = vld [vmem:[%s7388_s26 + $0x28] sm:$0xff]  }
 0x443   :  { %5127 = vmatprep.subr.bf16.mxu1 %v5908_v17  ;;  %5230 = vmatpush3.bf16.msra.mxu0 %v5922_v18  ;;  %v5951_v17 = vld [vmem:[%s7388_s26 + $0x10] sm:$0xff]   ;;  %v5952_v18 = vld [vmem:[%s7388_s26 + $0x8] sm:$0xff]  }
 0x444   :  { %5231 = vmatprep.subr.bf16.mxu0 %v6793_v37  ;;  %5245 = vmatprep.mubr.msk.bf16.mxu0 %vm6794_vm0, %v6793_v37 }
 0x446   :  { %5128 = vmatpush3.bf16.msra.mxu1 %v5909_v19  ;;  %v5953_v19 = vld [vmem:[%s7388_s26] sm:$0xff]  }
 0x447   :  { %5129 = vmatprep.subr.bf16.mxu1 %v5910_v20  ;;  %5232 = vmatpush3.bf16.msra.mxu0 %v5923_v21  ;;  %v5962_v20 = vld [vmem:[#allocation22 + $0x18] sm:$0xff]   ;;  %v5963_v21 = vld [vmem:[#allocation22 + $0x10] sm:$0xff]  }
 0x448   :  { %5233 = vmatprep.subr.bf16.mxu0 %v6793_v37 }
 0x44a   :  { %5130 = vmatpush3.bf16.msra.mxu1 %v5911_v22 }
 0x44b   :  { %5131 = vmatprep.subr.bf16.mxu1 %v5912_v23  ;;  %5234 = vmatpush3.bf16.msra.mxu0 %v5924_v24 }
 0x44c   :  { %5235 = vmatprep.subr.bf16.mxu0 %v6793_v37 }
 0x44e   :  { %5132 = vmatpush3.bf16.msra.mxu1 %v5913_v25 }
 0x44f   :  { %5133 = vmatprep.subr.bf16.mxu1 %v5914_v26  ;;  %5236 = vmatpush3.bf16.msra.mxu0 %v5925_v27  ;;  %v4963_v26 = vld [vmem:[#allocation19] ss:$0 sm:$0xff] }
 0x450   :  { %5237 = vmatprep.subr.bf16.mxu0 %v6793_v37 }
 0x452   :  { %5134 = vmatpush3.bf16.msra.mxu1 %v5915_v28  ;;  %v4954_v28 = vld [vmem:[#allocation16] ss:$0 sm:$0xff] }
 0x453   :  { %5135 = vmatprep.subr.bf16.mxu1 %v5916_v29  ;;  %5238 = vmatpush3.bf16.msra.mxu0 %v5926_v30 }
 0x454   :  { %5239 = vmatprep.subr.bf16.mxu0 %v6793_v37 }
 0x456   :  { %5136 = vmatpush3.bf16.msra.mxu1 %v5917_v31 }
 0x457   :  { %5137 = vmatprep.subr.bf16.mxu1 %v5918_v32  ;;  %5240 = vmatpush3.bf16.msra.mxu0 %v5927_v38 }
 0x458   :  { %5241 = vmatprep.subr.bf16.mxu0 %v6793_v37 }
 0x45a   :  { %5138 = vmatpush3.bf16.msra.mxu1 %v5919_v34 }
 0x45b   :  { %5139 = vmatprep.subr.bf16.mxu1 %v5920_v35  ;;  %5242 = vmatpush3.bf16.msra.mxu0 %v5928_v39 }
 0x45c   :  { %5243 = vmatprep.subr.bf16.mxu0 %v6793_v37 }
 0x45e   :  { %5140 = vmatpush3.bf16.msra.mxu1 %v5921_v36 }
 0x45f   :  { %5249 = vmatprep.subr.bf16.mxu1 %v6793_v37  ;;  %5244 = vmatpush3.bf16.msra.mxu0 %v5929_v41  ;;  %v5954_v41 = vld [vmem:[%s7389_s27 + $0x38] sm:$0xff]  }
 0x460   :  { %5147 = vmatprep.subr.bf16.mxu0 %v5930_v42 }
 0x461   :  { %3322 = vmatmul.mubr.bf16.vlgmr.msra.gmra.mxu1 %v2566_v15  ;;  %v5949_v15 = vld [vmem:[%s7388_s26 + $0x20] sm:$0xff]  }
 0x462   :  { %5265 = vmatprep.mubr.msk.bf16.mxu1 %vm6794_vm0, %v6793_v37  ;;  %5250 = vmatpush3.bf16.msra.mxu1 %v5946_v8 }
 0x463   :  { %5251 = vmatprep.subr.bf16.mxu1 %v6793_v37 }
 0x501   :  { %v5088_v43 = vpop.f32.mrf.mxu0  ;;  %v5110_v44 = vpop.f32.mrf.mxu1 }
 0x503   :  { %v5089_v46 = vpop.f32.mrf.mxu0  ;;  %v5111_v47 = vpop.f32.mrf.mxu1 }
 0x504   :  { %v5090_v48 = vadd.f32 %v5089_v46, %v5088_v43  ;;  %v5112_v53 = vadd.f32 %v5111_v47, %v5110_v44  ;;  %v5955_v43 = vld [vmem:[%s7389_s27 + $0x30] sm:$0xff]   ;;  %v5956_v44 = vld [vmem:[%s7389_s27 + $0x28] sm:$0xff]   ;;  %v5958_v46 = vld [vmem:[%s7389_s27 + $0x18] sm:$0xff]  }
 0x505   :  { %v5091_v49 = vpop.f32.mrf.mxu0  ;;  %v5113_v50 = vpop.f32.mrf.mxu1  ;;  %v5959_v47 = vld [vmem:[%s7389_s27 + $0x10] sm:$0xff]  }
 0x506   :  { %v2868_v51 = vadd.f32 %v5090_v48, %v4921_v45  ;;  %v5957_v45 = vld [vmem:[%s7389_s27 + $0x20] sm:$0xff]   ;;  %v5960_v48 = vld [vmem:[%s7389_s27 + $0x8] sm:$0xff]  }
 0x507   :  { %v5092_v54 = vpop.f32.mrf.mxu0  ;;  %v5114_v55 = vpop.f32.mrf.mxu1  ;;  %v5961_v49 = vld [vmem:[%s7389_s27] sm:$0xff]  }
 0x508   :  { %v2908_v56 = vadd.f32 %v5112_v53, %v2868_v51  ;;  %v5964_v50 = vld [vmem:[#allocation22 + $0x8] sm:$0xff]   ;;  %v5965_v51 = vld [vmem:[#allocation22] sm:$0xff]   ;;  %v4996_v55 = vld [vmem:[#allocation20] ss:$0 sm:$0xff] }
 0x509   :  { %v5967_v53 = vld [vmem:[%s7390_s3 + $0x18] sm:$0xff]   ;;  %v5969_v54 = vld [vmem:[%s7390_s3 + $0x10] sm:$0xff]  }
 0x50a   :  { %v2913_v57 = vmax.f32 %v2908_v56, 0.0 }
 0x50c   :  { %v2914_v5 = vpack.c.bf16 %v2913_v57, %v2913_v57 }
 0x50e   :  { %5246 = vmatmul.mubr.bf16.vlgmr.msra.gmra.mxu0 %v2914_v5 }
 0x50f   :  { %5148 = vmatpush3.bf16.msra.mxu0 %v5931_v40  ;;  %3361 = vmatprep.mubr.bf16.mxu0 %v7183_v9  ;;  %v5947_v9 = vld [vmem:[%s7388_s26 + $0x30] sm:$0xff]  }
 0x510   :  { %5149 = vmatprep.subr.bf16.mxu0 %v5932_v33  ;;  %5252 = vmatpush3.bf16.msra.mxu1 %v5947_v9 }
 0x511   :  { %5253 = vmatprep.subr.bf16.mxu1 %v6793_v37 }
 0x513   :  { %5150 = vmatpush3.bf16.msra.mxu0 %v5933_v58  ;;  %v5966_v58 = vld [vmem:[%s7391_s28 + $0x18] sm:$0xff]  }
 0x514   :  { %5151 = vmatprep.subr.bf16.mxu0 %v5934_v59  ;;  %5254 = vmatpush3.bf16.msra.mxu1 %v5948_v12 }
 0x515   :  { %5255 = vmatprep.subr.bf16.mxu1 %v6793_v37 }
 0x517   :  { %5152 = vmatpush3.bf16.msra.mxu0 %v5935_v60 }
 0x518   :  { %5153 = vmatprep.subr.bf16.mxu0 %v5936_v61  ;;  %5256 = vmatpush3.bf16.msra.mxu1 %v5949_v15  ;;  %v5968_v61 = vld [vmem:[%s7391_s28 + $0x10] sm:$0xff]  }
 0x519   :  { %5257 = vmatprep.subr.bf16.mxu1 %v6793_v37 }
 0x51b   :  { %5154 = vmatpush3.bf16.msra.mxu0 %v5937_v62 }
 0x51c   :  { %5155 = vmatprep.subr.bf16.mxu0 %v5938_v52 }
 0x51f   :  { %5156 = vmatpush3.bf16.msra.mxu0 %v5939_v63 }
 0x520   :  { %5157 = vmatprep.subr.bf16.mxu0 %v5940_v0 }
 0x521   :  { %v5141_v2 = vpop.f32.mrf.mxu1 }
 0x523   :  { %v5142_v11 = vpop.f32.mrf.mxu1  ;;  %5158 = vmatpush3.bf16.msra.mxu0 %v5941_v1  ;;  %v5970_v1 = vld [vmem:[%s7391_s28 + $0x8] sm:$0xff]  }
 0x524   :  { %v5143_v4 = vadd.f32 %v5142_v11, %v5141_v2  ;;  %5159 = vmatprep.subr.bf16.mxu0 %v5942_v10  ;;  %v5971_v10 = vld [vmem:[%s7390_s3 + $0x8] sm:$0xff]   ;;  %v5972_v2 = vld [vmem:[%s7391_s28] sm:$0xff]  }
 0x525   :  { %v5144_v6 = vpop.f32.mrf.mxu1  ;;  %v5973_v11 = vld [vmem:[%s7390_s3] sm:$0xff]  }
 0x526   :  { %v3324_v30 = vadd.f32 %v5143_v4, %v4963_v26  ;;  %v5005_v4 = vld [vmem:[#allocation23] ss:$0 sm:$0xff] }
 0x527   :  { %v5145_v14 = vpop.f32.mrf.mxu1  ;;  %5160 = vmatpush3.bf16.msra.mxu0 %v5943_v3  ;;  %v5011_v3 = vld [vmem:[#allocation25] ss:$0 sm:$0xff] }
 0x528   :  { %5161 = vmatprep.subr.bf16.mxu0 %v5944_v13 }
 0x52b   :  { %5162 = vmatpush3.bf16.msra.mxu0 %v5945_v7 }
 0x52c   :  { %5269 = vmatprep.subr.bf16.mxu0 %v6793_v37 }
 0x52e   :  { %3362 = vmatmul.mubr.bf16.vlgmr.msra.gmra.mxu0 %v7185_v16  ;;  %v5950_v16 = vld [vmem:[%s7388_s26 + $0x18] sm:$0xff]  }
 0x52f   :  { %5277 = vmatprep.mubr.msk.bf16.mxu0 %vm6794_vm0, %v6793_v37  ;;  %5258 = vmatpush3.bf16.msra.mxu1 %v5950_v16  ;;  %v5974_v16 = vld [vmem:[#allocation28] sm:$0xff]  }
 0x530   :  { %5259 = vmatprep.subr.bf16.mxu1 %v6793_v37  ;;  %5270 = vmatpush3.bf16.msra.mxu0 %v5962_v20 }
 0x531   :  { %5271 = vmatprep.subr.bf16.mxu0 %v6793_v37 }
 0x533   :  { %5260 = vmatpush3.bf16.msra.mxu1 %v5951_v17 }
 0x534   :  { %5261 = vmatprep.subr.bf16.mxu1 %v6793_v37  ;;  %5272 = vmatpush3.bf16.msra.mxu0 %v5963_v21 }
 0x535   :  { %5273 = vmatprep.subr.bf16.mxu0 %v6793_v37 }
 0x537   :  { %5262 = vmatpush3.bf16.msra.mxu1 %v5952_v18  ;;  %v5020_v18 = vld [vmem:[#allocation26] ss:$0 sm:$0xff] }
 0x538   :  { %5263 = vmatprep.subr.bf16.mxu1 %v6793_v37  ;;  %5274 = vmatpush3.bf16.msra.mxu0 %v5964_v50 }
 0x539   :  { %5275 = vmatprep.subr.bf16.mxu0 %v6793_v37 }
 0x53b   :  { %5264 = vmatpush3.bf16.msra.mxu1 %v5953_v19 }
 0x53c   :  { %5281 = vmatprep.subr.bf16.mxu1 %v6793_v37  ;;  %5276 = vmatpush3.bf16.msra.mxu0 %v5965_v51 }
 0x53d   :  { %5301 = vmatprep.subr.bf16.mxu0 %v6793_v37 }
 0x5ce   :  { %v3020_v22 = vpop.f32.mrf.mxu0 }
 0x5cf   :  { %v3021_v34 = vadd.f32 %v4954_v28, %v3020_v22 }
 0x5d0   :  { %v5247_v23 = vpop.f32.mrf.mxu0 }
 0x5d2   :  { %v3023_v24 = vpop.f32.mrf.mxu0 }
 0x5d4   :  { %v5248_v25 = vpop.f32.mrf.mxu0 }
 0x5ee   :  { %v5163_v27 = vpop.f32.mrf.mxu0 }
 0x5f0   :  { %v5164_v29 = vpop.f32.mrf.mxu0 }
 0x5f1   :  { %v5165_v31 = vadd.f32 %v5164_v29, %v5163_v27 }
 0x5f2   :  { %v5166_v32 = vpop.f32.mrf.mxu0 }
 0x5f3   :  { %v3364_v35 = vadd.f32 %v5165_v31, %v3324_v30  ;;  %v5975_v30 = vld [vmem:[#allocation32] sm:$0xff]   ;;  %v5976_v31 = vld [vmem:[#allocation38] sm:$0xff]   ;;  %v5029_v32 = vld [vmem:[#allocation31] ss:$0 sm:$0xff] }
 0x5f4   :  { %v5167_v36 = vpop.f32.mrf.mxu0 }
 0x5f5   :  { %v3369_v38 = vadd.f32 %v3364_v35, %v3021_v34  ;;  %v5026_v34 = vld [vmem:[#allocation29] ss:$0 sm:$0xff] }
 0x5f7   :  { %v3370_v39 = vmax.f32 %v3369_v38, 0.0 }
 0x5f9   :  { %v3371_v42 = vpack.c.bf16 %v3370_v39, %v3370_v39 }
 0x5fb   :  { %5266 = vmatmul.mubr.bf16.vlgmr.msra.gmra.mxu1 %v3371_v42 }
 0x5fc   :  { %5282 = vmatpush3.bf16.msra.mxu1 %v5954_v41  ;;  %5297 = vmatprep.mubr.msk.bf16.mxu1 %vm6794_vm0, %v6793_v37 }
 0x5fd   :  { %5283 = vmatprep.subr.bf16.mxu1 %v6793_v37 }
 0x600   :  { %5284 = vmatpush3.bf16.msra.mxu1 %v5955_v43 }
 0x601   :  { %5285 = vmatprep.subr.bf16.mxu1 %v6793_v37 }
 0x604   :  { %5286 = vmatpush3.bf16.msra.mxu1 %v5956_v44 }
 0x605   :  { %5287 = vmatprep.subr.bf16.mxu1 %v6793_v37 }
 0x608   :  { %5288 = vmatpush3.bf16.msra.mxu1 %v5957_v45  ;;  %v5977_v45 = vld [vmem:[#allocation35] sm:$0xff]  }
 0x609   :  { %5289 = vmatprep.subr.bf16.mxu1 %v6793_v37 }
 0x60c   :  { %5290 = vmatpush3.bf16.msra.mxu1 %v5958_v46 }
 0x60d   :  { %5291 = vmatprep.subr.bf16.mxu1 %v6793_v37 }
 0x610   :  { %5292 = vmatpush3.bf16.msra.mxu1 %v5959_v47  ;;  %v5035_v47 = vld [vmem:[#allocation34] ss:$0 sm:$0xff] }
 0x611   :  { %5293 = vmatprep.subr.bf16.mxu1 %v6793_v37 }
 0x614   :  { %5294 = vmatpush3.bf16.msra.mxu1 %v5960_v48 }
 0x615   :  { %5295 = vmatprep.subr.bf16.mxu1 %v6793_v37 }
 0x618   :  { %5296 = vmatpush3.bf16.msra.mxu1 %v5961_v49 }
 0x619   :  { %5319 = vmatprep.subr.bf16.mxu1 %v6793_v37 }
 0x61b   :  { %5298 = vmatmul.mubr.bf16.vlgmr.msra.gmra.mxu1 %v3371_v42 }
 0x61c   :  { %5327 = vmatprep.mubr.msk.bf16.mxu1 %vm6794_vm0, %v6793_v37  ;;  %5320 = vmatpush3.bf16.msra.mxu1 %v5967_v53 }
 0x61d   :  { %5321 = vmatprep.subr.bf16.mxu1 %v6793_v37 }
 0x620   :  { %5322 = vmatpush3.bf16.msra.mxu1 %v5969_v54 }
 0x621   :  { %5323 = vmatprep.subr.bf16.mxu1 %v6793_v37 }
 0x624   :  { %5324 = vmatpush3.bf16.msra.mxu1 %v5971_v10 }
 0x625   :  { %5325 = vmatprep.subr.bf16.mxu1 %v6793_v37 }
 0x628   :  { %5326 = vmatpush3.bf16.msra.mxu1 %v5973_v11  ;;  %v5979_v11 = vld [vmem:[#allocation47] sm:$0xff]  }
 0x629   :  { %5343 = vmatprep.subr.bf16.mxu1 %v6793_v37 }
 0x6bb   :  { %v3477_v56 = vpop.f32.mrf.mxu1 }
 0x6bc   :  { %v3478_v57 = vadd.f32 %v4996_v55, %v3477_v56 }
 0x6bd   :  { %v5267_v40 = vpop.f32.mrf.mxu1 }
 0x6be   :  { %v3483_v5 = vmax.f32 %v3478_v57, 0.0 }
 0x6bf   :  { %v3480_v33 = vpop.f32.mrf.mxu1 }
 0x6c0   :  { %v3484_v59 = vpack.c.bf16 %v3483_v5, %v3483_v5  ;;  %v5978_v33 = vld [vmem:[#allocation41] sm:$0xff]  }
 0x6c1   :  { %v5268_v60 = vpop.f32.mrf.mxu1 }
 0x6c2   :  { %5278 = vmatmul.mubr.msk.bf16.vlgmr.msra.gmra.mxu0 %vm3524_vm1, %v3484_v59  ;;  %v5041_v59 = vld [vmem:[#allocation40] ss:$0 sm:$0xff]  ;;  %v5038_v60 = vld [vmem:[#allocation37] ss:$0 sm:$0xff] }
 0x6c3   :  { %5302 = vmatpush3.bf16.msra.mxu0 %v5966_v58  ;;  %5309 = vmatprep.mubr.msk.bf16.mxu0 %vm6794_vm0, %v6793_v37  ;;  %v5980_v58 = vld [vmem:[#allocation44] sm:$0xff]  }
 0x6c4   :  { %5303 = vmatprep.subr.bf16.mxu0 %v6793_v37 }
 0x6c7   :  { %5304 = vmatpush3.bf16.msra.mxu0 %v5968_v61 }
 0x6c8   :  { %5305 = vmatprep.subr.bf16.mxu0 %v6793_v37 }
 0x6cb   :  { %5306 = vmatpush3.bf16.msra.mxu0 %v5970_v1 }
 0x6cc   :  { %5307 = vmatprep.subr.bf16.mxu0 %v6793_v37 }
 0x6cf   :  { %5308 = vmatpush3.bf16.msra.mxu0 %v5972_v2 }
 0x6d0   :  { %5313 = vmatprep.subr.bf16.mxu0 %v6793_v37 }
 0x6db   :  { %v3673_v62 = vpop.f32.mrf.mxu1 }
 0x6dc   :  { %v3674_v6 = vadd.f32 %v5011_v3, %v3673_v62 }
 0x6dd   :  { %v5299_v52 = vpop.f32.mrf.mxu1 }
 0x6df   :  { %v3676_v63 = vpop.f32.mrf.mxu1 }
 0x6e1   :  { %v5300_v0 = vpop.f32.mrf.mxu1 }
 0x782   :  { %v3562_v13 = vpop.f32.mrf.mxu0 }
 0x783   :  { %v3563_v14 = vadd.f32 %v5005_v4, %v3562_v13  ;;  %v5044_v4 = vld [vmem:[#allocation43] ss:$0 sm:$0xff] }
 0x784   :  { %v5279_v7 = vpop.f32.mrf.mxu0 }
 0x785   :  { %v3679_v8 = vadd.f32 %v3674_v6, %v3563_v14 }
 0x786   :  { %v3565_v9 = vpop.f32.mrf.mxu0 }
 0x787   :  { %v3680_v12 = vmax.f32 %v3679_v8, 0.0 }
 0x788   :  { %v5280_v15 = vpop.f32.mrf.mxu0 }
 0x789   :  { %v3681_v17 = vpack.c.bf16 %v3680_v12, %v3680_v12 }
 0x78b   :  { %5310 = vmatmul.mubr.msk.bf16.vlgmr.msra.gmra.mxu0 %vm3524_vm1, %v3681_v17  ;;  %5328 = vmatmul.mubr.msk.bf16.vlgmr.msra.gmra.mxu1 %vm3524_vm1, %v3681_v17 }
 0x78c   :  { %5314 = vmatpush3.bf16.msra.mxu0 %v5974_v16  ;;  %5315 = vmatprep.mubr.msk.bf16.mxu0 %vm6794_vm0, %v6793_v37 }
 0x78d   :  { %5331 = vmatprep.subr.bf16.mxu0 %v6793_v37  ;;  %5345 = vmatprep.mubr.msk.bf16.mxu1 %vm6794_vm0, %v6793_v37 }
 0x78e   :  { %5344 = vmatpush3.bf16.msra.mxu1 %v5976_v31  ;;  %v5982_v31 = vld [vmem:[#allocation52] sm:$0xff]  }
 0x78f   :  { %5355 = vmatprep.subr.bf16.mxu1 %v6793_v37 }
 0x84b   :  { %v3758_v19 = vpop.f32.mrf.mxu0  ;;  %v3898_v20 = vpop.f32.mrf.mxu1 }
 0x84c   :  { %v3759_v21 = vadd.f32 %v5020_v18, %v3758_v19  ;;  %v3899_v36 = vadd.f32 %v5029_v32, %v3898_v20  ;;  %v5981_v19 = vld [vmem:[#allocation50] sm:$0xff]  }
 0x84d   :  { %v5311_v22 = vpop.f32.mrf.mxu0  ;;  %v5329_v23 = vpop.f32.mrf.mxu1  ;;  %v5983_v20 = vld [vmem:[%s7392_s1 + $0x8] sm:$0xff]  }
 0x84e   :  { %v3764_v24 = vmax.f32 %v3759_v21, 0.0  ;;  %v5050_v21 = vld [vmem:[#allocation49] ss:$0 sm:$0xff]  ;;  %v5047_v22 = vld [vmem:[#allocation46] ss:$0 sm:$0xff] }
 0x84f   :  { %v3761_v25 = vpop.f32.mrf.mxu0  ;;  %v3901_v26 = vpop.f32.mrf.mxu1 }
 0x850   :  { %v3765_v27 = vpack.c.bf16 %v3764_v24, %v3764_v24 }
 0x851   :  { %v5312_v28 = vpop.f32.mrf.mxu0  ;;  %v5330_v29 = vpop.f32.mrf.mxu1 }
 0x852   :  { %5316 = vmatmul.mubr.msk.bf16.vlgmr.msra.gmra.mxu0 %vm3781_vm2, %v3765_v27 }
 0x853   :  { %5333 = vmatprep.mubr.msk.bf16.mxu0 %vm6794_vm0, %v6793_v37  ;;  %5332 = vmatpush3.bf16.msra.mxu0 %v5975_v30 }
 0x854   :  { %5337 = vmatprep.subr.bf16.mxu0 %v6793_v37 }
 0x912   :  { %v3819_v35 = vpop.f32.mrf.mxu0 }
 0x913   :  { %v3820_v38 = vadd.f32 %v5026_v34, %v3819_v35  ;;  %v5984_v34 = vld [vmem:[%s7392_s1] sm:$0xff]  }
 0x914   :  { %v5317_v39 = vpop.f32.mrf.mxu0  ;;  %v5053_v35 = vld [vmem:[%s7393_s14] ss:$0 sm:$0xff] }
 0x915   :  { %v3904_v41 = vadd.f32 %v3899_v36, %v3820_v38 }
 0x916   :  { %v3822_v42 = vpop.f32.mrf.mxu0 }
 0x917   :  { %v3905_v43 = vmax.f32 %v3904_v41, 0.0 }
 0x918   :  { %v5318_v44 = vpop.f32.mrf.mxu0 }
 0x919   :  { %v3906_v46 = vpack.c.bf16 %v3905_v43, %v3905_v43 }
 0x91b   :  { %5334 = vmatmul.mubr.msk.bf16.vlgmr.msra.gmra.mxu0 %vm3781_vm2, %v3906_v46  ;;  %5346 = vmatmul.mubr.msk.bf16.vlgmr.msra.gmra.mxu1 %vm3781_vm2, %v3906_v46 }
 0x91c   :  { %5338 = vmatpush3.bf16.msra.mxu0 %v5977_v45  ;;  %5339 = vmatprep.mubr.msk.bf16.mxu0 %vm6794_vm0, %v6793_v37 }
 0x91d   :  { %5349 = vmatprep.subr.bf16.mxu0 %v6793_v37  ;;  %5357 = vmatprep.mubr.msk.bf16.mxu1 %vm6794_vm0, %v6793_v37 }
 0x91e   :  { %5356 = vmatpush3.bf16.msra.mxu1 %v5980_v58 }
 0x91f   :  { %5367 = vmatprep.subr.bf16.mxu1 %v6793_v37 }
 0x9db   :  { %v3959_v48 = vpop.f32.mrf.mxu0  ;;  %v4074_v49 = vpop.f32.mrf.mxu1 }
 0x9dc   :  { %v3960_v50 = vadd.f32 %v5035_v47, %v3959_v48  ;;  %v4075_v62 = vadd.f32 %v5041_v59, %v4074_v49  ;;  %v5985_v49 = vld [vmem:[%s7394_s2 + $0x8] sm:$0xff]  }
 0x9dd   :  { %v5335_v51 = vpop.f32.mrf.mxu0  ;;  %v5347_v53 = vpop.f32.mrf.mxu1 }
 0x9de   :  { %v3965_v54 = vmax.f32 %v3960_v50, 0.0  ;;  %v5986_v50 = vld [vmem:[%s7394_s2] sm:$0xff]   ;;  %v5987_v51 = vld [vmem:[%s7029_s5 + $0x8] sm:$0xff]  }
 0x9df   :  { %v3962_v55 = vpop.f32.mrf.mxu0  ;;  %v4077_v56 = vpop.f32.mrf.mxu1  ;;  %v5060_v53 = vld [vmem:[%s7395_s6] ss:$0 sm:$0xff] }
 0x9e0   :  { %v3966_v57 = vpack.c.bf16 %v3965_v54, %v3965_v54  ;;  %v5056_v54 = vld [vmem:[%s7396_s4] ss:$0 sm:$0xff] }
 0x9e1   :  { %v5336_v40 = vpop.f32.mrf.mxu0  ;;  %v5348_v5 = vpop.f32.mrf.mxu1 }
 0x9e2   :  { %5340 = vmatmul.mubr.msk.bf16.vlgmr.msra.gmra.mxu0 %vm3781_vm2, %v3966_v57 }
 0x9e3   :  { %5351 = vmatprep.mubr.msk.bf16.mxu0 %vm6794_vm0, %v6793_v37  ;;  %5350 = vmatpush3.bf16.msra.mxu0 %v5978_v33 }
 0x9e4   :  { %5361 = vmatprep.subr.bf16.mxu0 %v6793_v37 }
 0xaa2   :  { %v4019_v61 = vpop.f32.mrf.mxu0 }
 0xaa3   :  { %v4020_v52 = vadd.f32 %v5038_v60, %v4019_v61  ;;  %v5988_v61 = vld [vmem:[%s7029_s5] sm:$0xff]   ;;  %s6795_s5 = smov [#allocation53]  }
 0xaa4   :  { %v5341_v63 = vpop.f32.mrf.mxu0 }
 0xaa5   :  { %v4080_v0 = vadd.f32 %v4075_v62, %v4020_v52  ;;  %v5063_v62 = vld [vmem:[%s7024_s20] ss:$0 sm:$0xff]  ;;  %s4592_s20 = sshll.u32 %s6795_s5, 4  ;;  %s4593_s20 = int_to_ptr.vmem [resolvable:$true] %s4592_s20 }
 0xaa6   :  { %v4022_v1 = vpop.f32.mrf.mxu0  ;;  %s6653_s7 = scalar_lea.vmem %s4593_s20, 32  ;;  %p6658_p12 = scmp.lt.s32.totalorder %s4593_s20, %s4593_s20 }
 0xaa7   :  { %v4081_v10 = vmax.f32 %v4080_v0, 0.0  ;;  %p6654_p11 = scmp.ne.s32.totalorder %s4593_s20, %s6653_s7  ;;  %p6659_p13 = scmp.lt.s32.totalorder %s6653_s7, %s6653_s7 }
 0xaa8   :  { %v5342_v2 = vpop.f32.mrf.mxu0 }
 0xaa9   :  { %v4082_v3 = vpack.c.bf16 %v4081_v10, %v4081_v10  ;;  %p6660_p0 = por %p6659_p13, %p6658_p12 }
 0xaab   :  { %5352 = vmatmul.mubr.msk.bf16.vlgmr.msra.gmra.mxu0 %vm3781_vm2, %v4082_v3  ;;  %p6661_p1 = pnand %p6660_p0, %p6654_p11 }
 0xaac   :  { %5362 = vmatpush3.bf16.msra.mxu0 %v5979_v11  ;;  %5363 = vmatprep.mubr.msk.bf16.mxu0 %vm6794_vm0, %v6793_v37  ;;  %v5067_v11 = vld [vmem:[%s7034_s30] ss:$0 sm:$0xff] }
 0xaad   :  { %5373 = vmatprep.subr.bf16.mxu0 %v6793_v37 }
 0xab3   :  { %5364 = vmatmul.mubr.msk.bf16.vlgmr.msra.gmra.mxu0 %vm3781_vm2, %v4082_v3 }
 0xab4   :  { %5377 = vmatprep.mubr.msk.bf16.mxu0 %vm6794_vm0, %v6793_v37  ;;  %5374 = vmatpush3.bf16.msra.mxu0 %v5983_v20 }
 0xab5   :  { %5375 = vmatprep.subr.bf16.mxu0 %v6793_v37 }
 0xab8   :  { %5376 = vmatpush3.bf16.msra.mxu0 %v5984_v34 }
 0xab9   :  { %5387 = vmatprep.subr.bf16.mxu0 %v6793_v37 }
 0xb6b   :  { %v4135_v13 = vpop.f32.mrf.mxu0 }
 0xb6c   :  { %v4136_v6 = vadd.f32 %v5044_v4, %v4135_v13 }
 0xb6d   :  { %v5353_v14 = vpop.f32.mrf.mxu0 }
 0xb6e   :  { %v4141_v7 = vmax.f32 %v4136_v6, 0.0 }
 0xb6f   :  { %v4138_v8 = vpop.f32.mrf.mxu0 }
 0xb70   :  { %v4142_v9 = vpack.c.bf16 %v4141_v7, %v4141_v7 }
 0xb71   :  { %v5354_v12 = vpop.f32.mrf.mxu0 }
 0xb72   :  { %5358 = vmatmul.mubr.msk.bf16.vlgmr.msra.gmra.mxu1 %vm3781_vm2, %v4142_v9 }
 0xb73   :  { %v4250_v15 = vpop.f32.mrf.mxu0  ;;  %5369 = vmatprep.mubr.msk.bf16.mxu1 %vm6794_vm0, %v6793_v37  ;;  %5368 = vmatpush3.bf16.msra.mxu1 %v5981_v19 }
 0xb74   :  { %5381 = vmatprep.subr.bf16.mxu1 %v6793_v37  ;;  %v4251_v24 = vadd.f32 %v5050_v21, %v4250_v15 }
 0xb75   :  { %v5365_v16 = vpop.f32.mrf.mxu0 }
 0xb77   :  { %v4253_v17 = vpop.f32.mrf.mxu0 }
 0xb79   :  { %v5366_v18 = vpop.f32.mrf.mxu0 }
 0xc32   :  { %v4195_v23 = vpop.f32.mrf.mxu1 }
 0xc33   :  { %v4196_v25 = vadd.f32 %v5047_v22, %v4195_v23 }
 0xc34   :  { %v5359_v26 = vpop.f32.mrf.mxu1 }
 0xc35   :  { %v4256_v27 = vadd.f32 %v4251_v24, %v4196_v25 }
 0xc36   :  { %v4198_v28 = vpop.f32.mrf.mxu1 }
 0xc37   :  { %v4257_v29 = vmax.f32 %v4256_v27, 0.0 }
 0xc38   :  { %v5360_v30 = vpop.f32.mrf.mxu1 }
 0xc39   :  { %v4258_v32 = vpack.c.bf16 %v4257_v29, %v4257_v29 }
 0xc3b   :  { %5370 = vmatmul.mubr.msk.bf16.vlgmr.msra.gmra.mxu1 %vm3781_vm2, %v4258_v32 }
 0xc3c   :  { %5382 = vmatpush3.bf16.msra.mxu1 %v5982_v31  ;;  %5383 = vmatprep.mubr.msk.bf16.mxu1 %vm6794_vm0, %v6793_v37 }
 0xc3d   :  { %5395 = vmatprep.subr.bf16.mxu1 %v6793_v37 }
 0xc43   :  { %5384 = vmatmul.mubr.msk.bf16.vlgmr.msra.gmra.mxu1 %vm3781_vm2, %v4258_v32 }
 0xc44   :  { %5399 = vmatprep.mubr.msk.bf16.mxu1 %vm6794_vm0, %v6793_v37  ;;  %5396 = vmatpush3.bf16.msra.mxu1 %v5987_v51 }
 0xc45   :  { %5397 = vmatprep.subr.bf16.mxu1 %v6793_v37 }
 0xc48   :  { %5398 = vmatpush3.bf16.msra.mxu1 %v5988_v61 }
 0xcfb   :  { %v4311_v36 = vpop.f32.mrf.mxu1 }
 0xcfc   :  { %v4312_v38 = vadd.f32 %v5053_v35, %v4311_v36 }
 0xcfd   :  { %v5371_v39 = vpop.f32.mrf.mxu1 }
 0xcfe   :  { %v4317_v41 = vmax.f32 %v4312_v38, 0.0 }
 0xcff   :  { %v4314_v42 = vpop.f32.mrf.mxu1 }
 0xd00   :  { %v4318_v43 = vpack.c.bf16 %v4317_v41, %v4317_v41 }
 0xd01   :  { %v5372_v44 = vpop.f32.mrf.mxu1 }
 0xd02   :  { %5378 = vmatmul.mubr.msk.bf16.vlgmr.msra.gmra.mxu0 %vm4342_vm3, %v4318_v43 }
 0xd03   :  { %v4435_v45 = vpop.f32.mrf.mxu1  ;;  %5391 = vmatprep.mubr.msk.bf16.mxu0 %vm6794_vm0, %v6793_v37  ;;  %5388 = vmatpush3.bf16.msra.mxu0 %v5985_v49 }
 0xd04   :  { %5389 = vmatprep.subr.bf16.mxu0 %v6793_v37  ;;  %v4436_v56 = vadd.f32 %v5060_v53, %v4435_v45 }
 0xd05   :  { %v5385_v46 = vpop.f32.mrf.mxu1 }
 0xd07   :  { %v4438_v47 = vpop.f32.mrf.mxu1  ;;  %5390 = vmatpush3.bf16.msra.mxu0 %v5986_v50 }
 0xd09   :  { %v5386_v48 = vpop.f32.mrf.mxu1 }
 0xdc2   :  { %v4380_v55 = vpop.f32.mrf.mxu0 }
 0xdc3   :  { %v4381_v57 = vadd.f32 %v5056_v54, %v4380_v55 }
 0xdc4   :  { %v5379_v40 = vpop.f32.mrf.mxu0 }
 0xdc5   :  { %v4441_v5 = vadd.f32 %v4436_v56, %v4381_v57 }
 0xdc6   :  { %v4383_v33 = vpop.f32.mrf.mxu0 }
 0xdc7   :  { %v4442_v58 = vmax.f32 %v4441_v5, 0.0 }
 0xdc8   :  { %v5380_v59 = vpop.f32.mrf.mxu0 }
 0xdc9   :  { %v4443_v60 = vpack.c.bf16 %v4442_v58, %v4442_v58 }
 0xdcb   :  { %5392 = vmatmul.mubr.msk.bf16.vlgmr.msra.gmra.mxu0 %vm4342_vm3, %v4443_v60 }
 0xe8b   :  { %v4504_v52 = vpop.f32.mrf.mxu0 }
 0xe8c   :  { %v4505_v63 = vadd.f32 %v5063_v62, %v4504_v52 }
 0xe8d   :  { %v5393_v37 = vpop.f32.mrf.mxu0 }
 0xe8e   :  { %v4510_v0 = vmax.f32 %v4505_v63, 0.0 }
 0xe8f   :  { %v4507_v1 = vpop.f32.mrf.mxu0 }
 0xe90   :  { %v4511_v10 = vpack.c.bf16 %v4510_v0, %v4510_v0 }
 0xe91   :  { %v5394_v2 = vpop.f32.mrf.mxu0 }
 0xe92   :  { %5400 = vmatmul.mubr.msk.bf16.vlgmr.msra.gmra.mxu1 %vm4342_vm3, %v4511_v10 }
 0xf52   :  { %v4572_v3 = vpop.f32.mrf.mxu1 }
 0xf53   :  { %v4573_v4 = vadd.f32 %v5067_v11, %v4572_v3 }
 0xf54   :  { %v5401_v13 = vpop.f32.mrf.mxu1 }
 0xf55   :  { %v5071_v6 = vmul.f32 -1.442695, %v4573_v4 }
 0xf56   :  { %v4575_v14 = vpop.f32.mrf.mxu1 }
 0xf57   :  { %5989 = vpow2.f32 %v5071_v6 }
 0xf58   :  { %v5402_v7 = vpop.f32.mrf.mxu1 }
 0xf64   :  { %v5990_v8 = vpop.eup %5989 }
 0xf65   :  { %v4581_v9 = vadd.f32 1.0, %v5990_v8 }
 0xf67   :  { %5991 = vrcp.f32 %v4581_v9 }
 0xf74   :  { %v5992_v12 = vpop.eup %5991 }
 0xf75   :  { %4585 = vst.msk [vmem:[#allocation53] sm:$0x3] %vm4584_vm4, %v5992_v12 }
 0xf76   :  { %6664 = shalt.err (!%p6661_p1)
}
 0xf77   :  { %4595 = dma.vmem_to_hbm [thread:$0]  %s4593_s20, 32, %s7039_s13, [#allocation4]  }
 0xf78   :  { %6707 = dma.done.wait [#allocation4], 32  }
 0xf79   :  { %6708 = vsyncadd [#allocation4], 4294967264 }
 0xf7a   :  { %4599 = vsyncpa [#allocation3], 1 }
 0xf7b   :  { %4600 = vsyncpa [#allocation6], 1 }
 0xf7c   :  { %4601 = vsyncpa [#allocation9], 1 }
 0xf7d   :  { %4602 = vsyncpa [#allocation12], 1 }
 0xf7e   :  { %4603 = vsyncpa [#allocation15], 1 }
 0xf7f   :  { %4604 = vsyncpa [#allocation18], 1 }
 0xf80   :  { %4605 = vsyncpa [#allocation21], 1 }
 0xf81   :  { %4606 = vsyncpa [#allocation24], 1 }
 0xf82   :  { %4607 = vsyncpa [#allocation27], 1 }
 0xf83   :  { %4608 = vsyncpa [#allocation30], 1 }
 0xf84   :  { %4609 = vsyncpa [#allocation33], 1 }
 0xf85   :  { %4610 = vsyncpa [#allocation36], 1 }
 0xf86   :  { %4611 = vsyncpa [#allocation39], 1 }
 0xf87   :  { %4612 = vsyncpa [#allocation42], 1 }
 0xf88   :  { %4613 = vsyncpa [#allocation45], 1 }
 0xf89   :  { %4614 = vsyncpa [#allocation48], 1 }
 0xf8a   :  { %4615 = vsyncpa [#allocation51], 1 }
 0xf8b   :  { %4616 = vsyncpa [#allocation4], 1 }

</bundles_post_ra>
